<compile_context>
chip_gen: v6e
topology: v6e:2x2x1
jax: 0.10.0
libtpu: 0.0.40
codegen_flags: <defaults>
</compile_context>

<pallas_src>
import jax
import jax.numpy as jnp
from jax.experimental import pallas as pl
from jax.experimental.pallas import tpu as pltpu

IN_F = 784 * 3   # 2352
HID = 256
OUT_F = 1
NEG_SLOPE = 0.02

_MIN_TILE = 8    # sublane granularity


def _leaky_relu(x, slope=NEG_SLOPE):
    return jnp.where(x > 0, x, slope * x)


def _round_up(x, m):
    return (x + m - 1) // m * m


def _vmem_capacity_bytes():
    """Trace-time VMEM capacity query; conservative fallback (v7x: 64 MiB)."""
    try:
        cap = getattr(pltpu.get_tpu_info(), "vmem_capacity_bytes", None)
        if cap:
            return int(cap)
    except Exception:
        pass
    return 64 << 20


def _vmem_bytes(bt, x_itemsize):
    """Conservative VMEM working-set estimate for one pipelined grid step."""
    x_buf = 2 * bt * IN_F * x_itemsize                       # double-buffered x tile
    w_buf = 2 * (IN_F * HID * 2 + HID * HID * 2              # bf16 w1, w2
                 + (3 * HID + OUT_F) * 4)                    # f32 b1, b2, w3 row, b3
    o_buf = 2 * bt * OUT_F * 4                               # double-buffered output
    tmp = bt * IN_F * 2 + 3 * bt * HID * 4                   # bf16 x copy, h1/h2 temps
    return x_buf + w_buf + o_buf + tmp + (2 << 20)           # + margin


def discriminator_kernel(x_ref, w1_ref, b1_ref, w2_ref, b2_ref, w3_ref, b3_ref,
                         o_ref):
    # Fused MLP for one batch tile. bf16 MXU matmuls, f32 accumulation,
    # f32 bias/activation/sigmoid.
    x = x_ref[...].astype(jnp.bfloat16)   # no-op cast when x is already bf16

    # Layer 1: Linear(2352 -> 256) + LeakyReLU(0.02)
    h1 = jnp.dot(x, w1_ref[...], preferred_element_type=jnp.float32)
    h1 = _leaky_relu(h1 + b1_ref[...])

    # Layer 2: Linear(256 -> 256) + LeakyReLU(0.02)
    h2 = jnp.dot(h1.astype(jnp.bfloat16), w2_ref[...],
                 preferred_element_type=jnp.float32)
    h2 = _leaky_relu(h2 + b2_ref[...])

    # Layer 3: Linear(256 -> 1) + Sigmoid.  N=1 would waste 255/256 of the MXU
    # output lanes, so use a VPU multiply + cross-lane (XLU) reduction instead.
    logits = jnp.sum(h2 * w3_ref[...], axis=-1, keepdims=True) + b3_ref[...]
    o_ref[...] = jax.nn.sigmoid(logits).astype(o_ref.dtype)


def discriminator_forward(x, params, *, batch_tile=None):
    """x: [B, 2352] (f32 or bf16) -> [B, 1] float32."""
    w1, b1, w2, b2, w3, b3 = params
    assert x.shape[1] == IN_F
    B = x.shape[0]
    x_itemsize = jnp.dtype(x.dtype).itemsize

    # ---- generation-aware tile / VMEM budget --------------------------------
    vmem_cap = _vmem_capacity_bytes()
    budget = vmem_cap * 7 // 10                 # leave headroom for the compiler
    if batch_tile is None:
        batch_tile = 2048 if vmem_cap >= (96 << 20) else 1024

    bt = min(_round_up(batch_tile, _MIN_TILE), _round_up(B, _MIN_TILE))
    # >= 4 grid steps when the batch allows it (>= 2 per v7x TensorCore), so
    # the megacore-sharded "parallel" axis still overlaps DMA with compute.
    min_steps = 4
    if _round_up(B, _MIN_TILE) >= min_steps * _MIN_TILE:
        while pl.cdiv(B, bt) < min_steps and bt > _MIN_TILE:
            bt = max(_MIN_TILE, (bt // 2) // _MIN_TILE * _MIN_TILE)
    # Shrink until the double-buffered working set fits the VMEM budget.
    while bt > _MIN_TILE and _vmem_bytes(bt, x_itemsize) > budget:
        bt = max(_MIN_TILE, (bt // 2) // _MIN_TILE * _MIN_TILE)

    grid = (pl.cdiv(B, bt),)   # ragged last block handled by Pallas masking

    # bf16 weights for the MXU path; biases + final row stay f32 (VPU/XLU).
    w1 = w1.astype(jnp.bfloat16)
    w2 = w2.astype(jnp.bfloat16)
    b1 = b1.astype(jnp.float32)
    b2 = b2.astype(jnp.float32)
    w3 = w3.astype(jnp.float32)
    b3 = b3.astype(jnp.float32)

    weight_bytes = IN_F * HID * 2 + HID * HID * 2 + (3 * HID + OUT_F) * 4
    flops = 2 * B * (IN_F * HID + HID * HID + HID * OUT_F)
    bytes_accessed = B * IN_F * x_itemsize + B * OUT_F * 4 + weight_bytes
    cost = pl.CostEstimate(flops=flops, transcendentals=B,
                           bytes_accessed=bytes_accessed)

    vmem_limit = int(min(max(_vmem_bytes(bt, x_itemsize) * 5 // 4, 32 << 20),
                         budget))

    def _call(weight_pipeline_mode):
        def const_spec(shape):
            # Grid-invariant blocks (index_map always (0, 0)).
            if weight_pipeline_mode is None:
                return pl.BlockSpec(shape, lambda i: (0, 0))
            return pl.BlockSpec(shape, lambda i: (0, 0),
                                pipeline_mode=weight_pipeline_mode)

        return pl.pallas_call(
            discriminator_kernel,
            out_shape=jax.ShapeDtypeStruct((B, OUT_F), jnp.float32),
            grid_spec=pltpu.PrefetchScalarGridSpec(
                num_scalar_prefetch=0,
                grid=grid,
                in_specs=[
                    pl.BlockSpec((bt, IN_F), lambda i: (i, 0)),  # x tile
                    const_spec((IN_F, HID)),    # w1 (bf16)
                    const_spec((1, HID)),       # b1
                    const_spec((HID, HID)),     # w2 (bf16)
                    const_spec((1, HID)),       # b2
                    const_spec((1, HID)),       # w3 row (f32)
                    const_spec((1, OUT_F)),     # b3
                ],
                out_specs=pl.BlockSpec((bt, OUT_F), lambda i: (i, 0)),
            ),
            compiler_params=pltpu.CompilerParams(
                dimension_semantics=("parallel",),
                vmem_limit_bytes=vmem_limit),
            cost_estimate=cost,
        )(x, w1, b1, w2, b2, w3, b3)

    try:
        # Weights never change across the grid: single-buffer them to free
        # VMEM toward larger x tiles (most valuable on v7x's 64 MiB).
        return _call(pl.Buffered(1))
    except Exception:
        # Fallback: default double-buffering if this JAX rejects Buffered(1).
        return _call(None)


def init_params(key):
    """PyTorch nn.Linear default init: U(-1/sqrt(fan_in), 1/sqrt(fan_in)).
    w1, w2 stored as [in, out]; the final layer stored as a row vector [1, 256]
    (it is applied on the VPU inside the kernel)."""
    ks = jax.random.split(key, 6)

    def linear(kw, kb, fan_in, w_shape, b_shape):
        bound = 1.0 / jnp.sqrt(jnp.float32(fan_in))
        w = jax.random.uniform(kw, w_shape, jnp.float32, -bound, bound)
        b = jax.random.uniform(kb, b_shape, jnp.float32, -bound, bound)
        return w, b

    w1, b1 = linear(ks[0], ks[1], IN_F, (IN_F, HID), (1, HID))
    w2, b2 = linear(ks[2], ks[3], HID, (HID, HID), (1, HID))
    w3, b3 = linear(ks[4], ks[5], HID, (1, HID), (1, OUT_F))
    return (w1, b1, w2, b2, w3, b3)


def reference_forward(x, params):
    """Pure-JAX f32 reference matching the PyTorch module."""
    w1, b1, w2, b2, w3, b3 = params
    h = _leaky_relu(x @ w1 + b1)
    h = _leaky_relu(h @ w2 + b2)
    logits = jnp.sum(h * w3, axis=-1, keepdims=True) + b3
    return jax.nn.sigmoid(logits)


if __name__ == "__main__":
    key = jax.random.PRNGKey(0)
    k_params, k_x = jax.random.split(key)

    params = init_params(k_params)

    B = 20  # deliberately not a multiple of 8 to exercise the ragged last block
    # Producer emits bf16 directly (halves HBM bytes on the dominant stream);
    # no wrapper-side astype pass is added.
    x = jax.random.normal(k_x, (B, IN_F), jnp.bfloat16)

    out = discriminator_forward(x, params)
    out = jax.block_until_ready(out)

    ref = reference_forward(x.astype(jnp.float32), params)
    assert out.shape == (B, OUT_F)
    # bf16 matmul inputs with f32 accumulation: tolerance loosened vs f32 ref.
    assert jnp.allclose(out, ref, atol=1e-2, rtol=1e-2), "mismatch vs reference"

    print("KERNEL_OK")
</pallas_src>

<mosaic_0001>
module attributes {stable_mosaic.version = 11 : i64} {
  func.func @discriminator_kernel(%arg0: i32, %arg1: memref<24x2352xbf16, #tpu.memory_space<vmem>>, %arg2: memref<2352x256xbf16, #tpu.memory_space<vmem>>, %arg3: memref<1x256xf32, #tpu.memory_space<vmem>>, %arg4: memref<256x256xbf16, #tpu.memory_space<vmem>>, %arg5: memref<1x256xf32, #tpu.memory_space<vmem>>, %arg6: memref<1x256xf32, #tpu.memory_space<vmem>>, %arg7: memref<1x1xf32, #tpu.memory_space<vmem>>, %arg8: memref<24x1xf32, #tpu.memory_space<vmem>>) attributes {dimension_semantics = [#tpu.dimension_semantics<parallel>], iteration_bounds = array<i64: 1>, scalar_prefetch = 0 : i64, scratch_operands = 0 : i64, tpu.core_type = #tpu.core_type<tc>, window_params = [{transform_indices = @transform_0, window_bounds = array<i64: 24, 2352>}, {pipeline_mode = #tpu.pipeline_mode<synchronous>, transform_indices = @transform_1, window_bounds = array<i64: 2352, 256>}, {pipeline_mode = #tpu.pipeline_mode<synchronous>, transform_indices = @transform_2, window_bounds = array<i64: 1, 256>}, {pipeline_mode = #tpu.pipeline_mode<synchronous>, transform_indices = @transform_3, window_bounds = array<i64: 256, 256>}, {pipeline_mode = #tpu.pipeline_mode<synchronous>, transform_indices = @transform_4, window_bounds = array<i64: 1, 256>}, {pipeline_mode = #tpu.pipeline_mode<synchronous>, transform_indices = @transform_5, window_bounds = array<i64: 1, 256>}, {pipeline_mode = #tpu.pipeline_mode<synchronous>, transform_indices = @transform_6, window_bounds = array<i64: 1, 1>}, {transform_indices = @transform_7, window_bounds = array<i64: 24, 1>}]} {
    %c0 = arith.constant 0 : index
    %c0_0 = arith.constant 0 : index
    %0 = vector.load %arg1[%c0, %c0_0] : memref<24x2352xbf16, #tpu.memory_space<vmem>>, vector<24x2352xbf16>
    %c0_1 = arith.constant 0 : index
    %c0_2 = arith.constant 0 : index
    %1 = vector.load %arg2[%c0_1, %c0_2] : memref<2352x256xbf16, #tpu.memory_space<vmem>>, vector<2352x256xbf16>
    %cst = arith.constant dense<0.000000e+00> : vector<24x256xf32>
    %2 = tpu.matmul %0, %1, %cst {dimension_numbers = #tpu.dot_dimension_numbers<[1], [0], [0], [1], [0, 0, 1, 1], [], []>} : vector<24x2352xbf16>, vector<2352x256xbf16>, vector<24x256xf32> -> vector<24x256xf32>
    %c0_3 = arith.constant 0 : index
    %c0_4 = arith.constant 0 : index
    %3 = vector.load %arg3[%c0_3, %c0_4] : memref<1x256xf32, #tpu.memory_space<vmem>>, vector<1x256xf32>
    %4 = vector.broadcast %3 : vector<1x256xf32> to vector<24x256xf32>
    %5 = arith.addf %2, %4 : vector<24x256xf32>
    %cst_5 = arith.constant 0.000000e+00 : f32
    %6 = vector.broadcast %cst_5 : f32 to vector<24x256xf32>
    %7 = arith.cmpf ogt, %5, %6 : vector<24x256xf32>
    %cst_6 = arith.constant 2.000000e-02 : f32
    %8 = vector.broadcast %cst_6 : f32 to vector<24x256xf32>
    %9 = arith.mulf %8, %5 : vector<24x256xf32>
    %10 = arith.select %7, %5, %9 : vector<24x256xi1>, vector<24x256xf32>
    %11 = arith.truncf %10 : vector<24x256xf32> to vector<24x256xbf16>
    %c0_7 = arith.constant 0 : index
    %c0_8 = arith.constant 0 : index
    %12 = vector.load %arg4[%c0_7, %c0_8] : memref<256x256xbf16, #tpu.memory_space<vmem>>, vector<256x256xbf16>
    %cst_9 = arith.constant dense<0.000000e+00> : vector<24x256xf32>
    %13 = tpu.matmul %11, %12, %cst_9 {dimension_numbers = #tpu.dot_dimension_numbers<[1], [0], [0], [1], [0, 0, 1, 1], [], []>} : vector<24x256xbf16>, vector<256x256xbf16>, vector<24x256xf32> -> vector<24x256xf32>
    %c0_10 = arith.constant 0 : index
    %c0_11 = arith.constant 0 : index
    %14 = vector.load %arg5[%c0_10, %c0_11] : memref<1x256xf32, #tpu.memory_space<vmem>>, vector<1x256xf32>
    %15 = vector.broadcast %14 : vector<1x256xf32> to vector<24x256xf32>
    %16 = arith.addf %13, %15 : vector<24x256xf32>
    %cst_12 = arith.constant 0.000000e+00 : f32
    %17 = vector.broadcast %cst_12 : f32 to vector<24x256xf32>
    %18 = arith.cmpf ogt, %16, %17 : vector<24x256xf32>
    %cst_13 = arith.constant 2.000000e-02 : f32
    %19 = vector.broadcast %cst_13 : f32 to vector<24x256xf32>
    %20 = arith.mulf %19, %16 : vector<24x256xf32>
    %21 = arith.select %18, %16, %20 : vector<24x256xi1>, vector<24x256xf32>
    %c0_14 = arith.constant 0 : index
    %c0_15 = arith.constant 0 : index
    %22 = vector.load %arg6[%c0_14, %c0_15] : memref<1x256xf32, #tpu.memory_space<vmem>>, vector<1x256xf32>
    %23 = vector.broadcast %22 : vector<1x256xf32> to vector<24x256xf32>
    %24 = arith.mulf %21, %23 : vector<24x256xf32>
    %cst_16 = arith.constant dense<0.000000e+00> : vector<24xf32>
    %25 = vector.multi_reduction <add>, %24, %cst_16 [1] : vector<24x256xf32> to vector<24xf32>
    %26 = vector.shape_cast %25 : vector<24xf32> to vector<24x1xf32>
    %c0_17 = arith.constant 0 : index
    %c0_18 = arith.constant 0 : index
    %27 = vector.load %arg7[%c0_17, %c0_18] : memref<1x1xf32, #tpu.memory_space<vmem>>, vector<1x1xf32>
    %28 = vector.broadcast %27 : vector<1x1xf32> to vector<24x1xf32>
    %29 = arith.addf %26, %28 : vector<24x1xf32>
    %30 = arith.negf %29 : vector<24x1xf32>
    %31 = math.exp %30 : vector<24x1xf32>
    %cst_19 = arith.constant 1.000000e+00 : f32
    %32 = vector.broadcast %cst_19 : f32 to vector<24x1xf32>
    %33 = arith.addf %32, %31 : vector<24x1xf32>
    %34 = arith.divf %32, %33 : vector<24x1xf32>
    %c0_20 = arith.constant 0 : index
    %c0_21 = arith.constant 0 : index
    %35 = vector.load %arg8[%c0_20, %c0_21] : memref<24x1xf32, #tpu.memory_space<vmem>>, vector<24x1xf32>
    tpu.vector_store %arg8[%c0_20, %c0_21], %34 {strides = array<i32>} : memref<24x1xf32, #tpu.memory_space<vmem>>, vector<24x1xf32>,
    return
  }
  func.func @transform_0(%arg0: i32) -> (i32, i32) {
    %c0_i32 = arith.constant 0 : i32
    %c0_i32_0 = arith.constant 0 : i32
    return %arg0, %c0_i32 : i32, i32
  }
  func.func @transform_1(%arg0: i32) -> (i32, i32) {
    %c0_i32 = arith.constant 0 : i32
    %c0_i32_0 = arith.constant 0 : i32
    %c0_i32_1 = arith.constant 0 : i32
    return %c0_i32, %c0_i32_0 : i32, i32
  }
  func.func @transform_2(%arg0: i32) -> (i32, i32) {
    %c0_i32 = arith.constant 0 : i32
    %c0_i32_0 = arith.constant 0 : i32
    %c0_i32_1 = arith.constant 0 : i32
    return %c0_i32, %c0_i32_0 : i32, i32
  }
  func.func @transform_3(%arg0: i32) -> (i32, i32) {
    %c0_i32 = arith.constant 0 : i32
    %c0_i32_0 = arith.constant 0 : i32
    %c0_i32_1 = arith.constant 0 : i32
    return %c0_i32, %c0_i32_0 : i32, i32
  }
  func.func @transform_4(%arg0: i32) -> (i32, i32) {
    %c0_i32 = arith.constant 0 : i32
    %c0_i32_0 = arith.constant 0 : i32
    %c0_i32_1 = arith.constant 0 : i32
    return %c0_i32, %c0_i32_0 : i32, i32
  }
  func.func @transform_5(%arg0: i32) -> (i32, i32) {
    %c0_i32 = arith.constant 0 : i32
    %c0_i32_0 = arith.constant 0 : i32
    %c0_i32_1 = arith.constant 0 : i32
    return %c0_i32, %c0_i32_0 : i32, i32
  }
  func.func @transform_6(%arg0: i32) -> (i32, i32) {
    %c0_i32 = arith.constant 0 : i32
    %c0_i32_0 = arith.constant 0 : i32
    %c0_i32_1 = arith.constant 0 : i32
    return %c0_i32, %c0_i32_0 : i32, i32
  }
  func.func @transform_7(%arg0: i32) -> (i32, i32) {
    %c0_i32 = arith.constant 0 : i32
    %c0_i32_0 = arith.constant 0 : i32
    return %arg0, %c0_i32 : i32, i32
  }
}

module attributes {stable_mosaic.version = 11 : i64} {
  func.func @discriminator_kernel(%arg0: i32, %arg1: memref<24x2352xbf16, #tpu.memory_space<vmem>>, %arg2: memref<2352x256xbf16, #tpu.memory_space<vmem>>, %arg3: memref<1x256xf32, #tpu.memory_space<vmem>>, %arg4: memref<256x256xbf16, #tpu.memory_space<vmem>>, %arg5: memref<1x256xf32, #tpu.memory_space<vmem>>, %arg6: memref<1x256xf32, #tpu.memory_space<vmem>>, %arg7: memref<1x1xf32, #tpu.memory_space<vmem>>, %arg8: memref<24x1xf32, #tpu.memory_space<vmem>>) attributes {dimension_semantics = [#tpu.dimension_semantics<parallel>], iteration_bounds = array<i64: 1>, scalar_prefetch = 0 : i64, scratch_operands = 0 : i64, tpu.core_type = #tpu.core_type<tc>, window_params = [{transform_indices = @transform_0, window_bounds = array<i64: 24, 2352>}, {pipeline_mode = #tpu.pipeline_mode<synchronous>, transform_indices = @transform_1, window_bounds = array<i64: 2352, 256>}, {pipeline_mode = #tpu.pipeline_mode<synchronous>, transform_indices = @transform_2, window_bounds = array<i64: 1, 256>}, {pipeline_mode = #tpu.pipeline_mode<synchronous>, transform_indices = @transform_3, window_bounds = array<i64: 256, 256>}, {pipeline_mode = #tpu.pipeline_mode<synchronous>, transform_indices = @transform_4, window_bounds = array<i64: 1, 256>}, {pipeline_mode = #tpu.pipeline_mode<synchronous>, transform_indices = @transform_5, window_bounds = array<i64: 1, 256>}, {pipeline_mode = #tpu.pipeline_mode<synchronous>, transform_indices = @transform_6, window_bounds = array<i64: 1, 1>}, {transform_indices = @transform_7, window_bounds = array<i64: 24, 1>}]} {
    %c0 = arith.constant 0 : index
    %c0_0 = arith.constant 0 : index
    %0 = vector.load %arg1[%c0, %c0_0] : memref<24x2352xbf16, #tpu.memory_space<vmem>>, vector<24x2352xbf16>
    %c0_1 = arith.constant 0 : index
    %c0_2 = arith.constant 0 : index
    %1 = vector.load %arg2[%c0_1, %c0_2] : memref<2352x256xbf16, #tpu.memory_space<vmem>>, vector<2352x256xbf16>
    %cst = arith.constant dense<0.000000e+00> : vector<24x256xf32>
    %2 = tpu.matmul %0, %1, %cst {dimension_numbers = #tpu.dot_dimension_numbers<[1], [0], [0], [1], [0, 0, 1, 1], [], []>} : vector<24x2352xbf16>, vector<2352x256xbf16>, vector<24x256xf32> -> vector<24x256xf32>
    %c0_3 = arith.constant 0 : index
    %c0_4 = arith.constant 0 : index
    %3 = vector.load %arg3[%c0_3, %c0_4] : memref<1x256xf32, #tpu.memory_space<vmem>>, vector<1x256xf32>
    %4 = vector.broadcast %3 : vector<1x256xf32> to vector<24x256xf32>
    %5 = arith.addf %2, %4 : vector<24x256xf32>
    %cst_5 = arith.constant 0.000000e+00 : f32
    %6 = vector.broadcast %cst_5 : f32 to vector<24x256xf32>
    %7 = arith.cmpf ogt, %5, %6 : vector<24x256xf32>
    %cst_6 = arith.constant 2.000000e-02 : f32
    %8 = vector.broadcast %cst_6 : f32 to vector<24x256xf32>
    %9 = arith.mulf %8, %5 : vector<24x256xf32>
    %10 = arith.select %7, %5, %9 : vector<24x256xi1>, vector<24x256xf32>
    %11 = arith.truncf %10 : vector<24x256xf32> to vector<24x256xbf16>
    %c0_7 = arith.constant 0 : index
    %c0_8 = arith.constant 0 : index
    %12 = vector.load %arg4[%c0_7, %c0_8] : memref<256x256xbf16, #tpu.memory_space<vmem>>, vector<256x256xbf16>
    %cst_9 = arith.constant dense<0.000000e+00> : vector<24x256xf32>
    %13 = tpu.matmul %11, %12, %cst_9 {dimension_numbers = #tpu.dot_dimension_numbers<[1], [0], [0], [1], [0, 0, 1, 1], [], []>} : vector<24x256xbf16>, vector<256x256xbf16>, vector<24x256xf32> -> vector<24x256xf32>
    %c0_10 = arith.constant 0 : index
    %c0_11 = arith.constant 0 : index
    %14 = vector.load %arg5[%c0_10, %c0_11] : memref<1x256xf32, #tpu.memory_space<vmem>>, vector<1x256xf32>
    %15 = vector.broadcast %14 : vector<1x256xf32> to vector<24x256xf32>
    %16 = arith.addf %13, %15 : vector<24x256xf32>
    %cst_12 = arith.constant 0.000000e+00 : f32
    %17 = vector.broadcast %cst_12 : f32 to vector<24x256xf32>
    %18 = arith.cmpf ogt, %16, %17 : vector<24x256xf32>
    %cst_13 = arith.constant 2.000000e-02 : f32
    %19 = vector.broadcast %cst_13 : f32 to vector<24x256xf32>
    %20 = arith.mulf %19, %16 : vector<24x256xf32>
    %21 = arith.select %18, %16, %20 : vector<24x256xi1>, vector<24x256xf32>
    %c0_14 = arith.constant 0 : index
    %c0_15 = arith.constant 0 : index
    %22 = vector.load %arg6[%c0_14, %c0_15] : memref<1x256xf32, #tpu.memory_space<vmem>>, vector<1x256xf32>
    %23 = vector.broadcast %22 : vector<1x256xf32> to vector<24x256xf32>
    %24 = arith.mulf %21, %23 : vector<24x256xf32>
    %cst_16 = arith.constant dense<0.000000e+00> : vector<24xf32>
    %25 = vector.multi_reduction <add>, %24, %cst_16 [1] : vector<24x256xf32> to vector<24xf32>
    %26 = vector.shape_cast %25 : vector<24xf32> to vector<24x1xf32>
    %c0_17 = arith.constant 0 : index
    %c0_18 = arith.constant 0 : index
    %27 = vector.load %arg7[%c0_17, %c0_18] : memref<1x1xf32, #tpu.memory_space<vmem>>, vector<1x1xf32>
    %28 = vector.broadcast %27 : vector<1x1xf32> to vector<24x1xf32>
    %29 = arith.addf %26, %28 : vector<24x1xf32>
    %30 = arith.negf %29 : vector<24x1xf32>
    %31 = math.exp %30 : vector<24x1xf32>
    %cst_19 = arith.constant 1.000000e+00 : f32
    %32 = vector.broadcast %cst_19 : f32 to vector<24x1xf32>
    %33 = arith.addf %32, %31 : vector<24x1xf32>
    %34 = arith.divf %32, %33 : vector<24x1xf32>
    %c0_20 = arith.constant 0 : index
    %c0_21 = arith.constant 0 : index
    %35 = vector.load %arg8[%c0_20, %c0_21] : memref<24x1xf32, #tpu.memory_space<vmem>>, vector<24x1xf32>
    tpu.vector_store %arg8[%c0_20, %c0_21], %34 {strides = array<i32>} : memref<24x1xf32, #tpu.memory_space<vmem>>, vector<24x1xf32>,
    return
  }
  func.func @transform_0(%arg0: i32) -> (i32, i32) {
    %c0_i32 = arith.constant 0 : i32
    %c0_i32_0 = arith.constant 0 : i32
    return %arg0, %c0_i32 : i32, i32
  }
  func.func @transform_1(%arg0: i32) -> (i32, i32) {
    %c0_i32 = arith.constant 0 : i32
    %c0_i32_0 = arith.constant 0 : i32
    %c0_i32_1 = arith.constant 0 : i32
    return %c0_i32, %c0_i32_0 : i32, i32
  }
  func.func @transform_2(%arg0: i32) -> (i32, i32) {
    %c0_i32 = arith.constant 0 : i32
    %c0_i32_0 = arith.constant 0 : i32
    %c0_i32_1 = arith.constant 0 : i32
    return %c0_i32, %c0_i32_0 : i32, i32
  }
  func.func @transform_3(%arg0: i32) -> (i32, i32) {
    %c0_i32 = arith.constant 0 : i32
    %c0_i32_0 = arith.constant 0 : i32
    %c0_i32_1 = arith.constant 0 : i32
    return %c0_i32, %c0_i32_0 : i32, i32
  }
  func.func @transform_4(%arg0: i32) -> (i32, i32) {
    %c0_i32 = arith.constant 0 : i32
    %c0_i32_0 = arith.constant 0 : i32
    %c0_i32_1 = arith.constant 0 : i32
    return %c0_i32, %c0_i32_0 : i32, i32
  }
  func.func @transform_5(%arg0: i32) -> (i32, i32) {
    %c0_i32 = arith.constant 0 : i32
    %c0_i32_0 = arith.constant 0 : i32
    %c0_i32_1 = arith.constant 0 : i32
    return %c0_i32, %c0_i32_0 : i32, i32
  }
  func.func @transform_6(%arg0: i32) -> (i32, i32) {
    %c0_i32 = arith.constant 0 : i32
    %c0_i32_0 = arith.constant 0 : i32
    %c0_i32_1 = arith.constant 0 : i32
    return %c0_i32, %c0_i32_0 : i32, i32
  }
  func.func @transform_7(%arg0: i32) -> (i32, i32) {
    %c0_i32 = arith.constant 0 : i32
    %c0_i32_0 = arith.constant 0 : i32
    return %arg0, %c0_i32 : i32, i32
  }
}

</mosaic_0001>

<bundles_post_ra>
// kernel: tpu_custom_call.1
= control target key start
LH: loop header
LB: loop body
LE: loop exit
PB: predicated region body
PF: predicated region fallthrough
CT: control target
= control target key end

     0   :  { %s4147_s0 = inlined_call_operand.hbm [shape: bf16[20,2352], index: 0, kind: input, shape index: {}]   ;;  %s4148_s1 = inlined_call_operand.hbm [shape: bf16[2352,256], index: 1, kind: input, shape index: {}]   ;;  %s4149_s2 = inlined_call_operand.hbm [shape: f32[1,256], index: 2, kind: input, shape index: {}]   ;;  %s4150_s3 = inlined_call_operand.hbm [shape: bf16[256,256], index: 3, kind: input, shape index: {}]   ;;  %s4151_s4 = inlined_call_operand.hbm [shape: f32[1,256], index: 4, kind: input, shape index: {}]   ;;  %s4152_s5 = inlined_call_operand.hbm [shape: f32[1,256], index: 5, kind: input, shape index: {}]   ;;  %s4153_s6 = inlined_call_operand.<no memory space> [shape: f32[1,1], index: 6, kind: input, shape index: {}]   ;;  %s4154_s7 = inlined_call_operand.vmem [shape: f32[20,1], index: 7, kind: output, shape index: {}]  }
   0x1   :  { %v12_v0 = vstv %s4153_s6 }
   0x2   :  { %13 = vst [vmem:[#allocation2] sm:$0x1] %v12_v0 }
   0x3   :  { %14 = vsyncpa [#allocation4], 0 }
   0x4   :  { %15 = vsyncpa [#allocation6], 0 }
   0x5   :  { %16 = vsyncpa [#allocation9], 0 }
   0x6   :  { %17 = vsyncpa [#allocation12], 0  ;;  %s4008_s26 = smov [#allocation5]  }
   0x7   :  { %s35_s27 = sshll.u32 %s4008_s26, 4  ;;  %s36_s27 = int_to_ptr.vmem [resolvable:$true] %s35_s27 }
   0x8   :  { %s3888_s28 = scalar_lea.vmem %s36_s27, 37632  ;;  %p3893_p1 = scmp.lt.s32.totalorder %s36_s27, %s36_s27 }
   0x9   :  { %p3889_p0 = scmp.ne.s32.totalorder %s36_s27, %s3888_s28  ;;  %p3894_p2 = scmp.lt.s32.totalorder %s3888_s28, %s3888_s28 }
   0xb   :  { %p3895_p3 = por %p3894_p2, %p3893_p1 }
   0xd   :  { %p3896_p4 = pnand %p3895_p3, %p3889_p0 }
   0xf   :  { %3899 = shalt.err (!%p3896_p4)
}
  0x10   :  { %s4009_s29 = smov 128   ;;  %s4010_s30 = smov 8  }
  0x11   :  { %41 = dma.hbm_to_vmem [thread:$0]  %s4148_s1, 37632, %s36_s27, [#allocation6], %s4009_s29, %s4009_s29, %s4010_s30  }
  0x12   :  { %s4011_s6 = smov [#allocation8]   ;;  %s4012_s11 = smov [#allocation3]  }
  0x13   :  { %s57_s10 = sshll.u32 %s4011_s6, 4  ;;  %s23_s12 = sshll.u32 %s4012_s11, 4  ;;  %s58_s10 = int_to_ptr.vmem [resolvable:$true] %s57_s10  ;;  %s24_s12 = int_to_ptr.vmem [resolvable:$true] %s23_s12 }
  0x14   :  { %s3908_s13 = scalar_lea.vmem %s58_s10, 4096  ;;  %p3913_p6 = scmp.lt.s32.totalorder %s58_s10, %s58_s10 }
  0x15   :  { %p3909_p5 = scmp.ne.s32.totalorder %s58_s10, %s3908_s13  ;;  %p3914_p7 = scmp.lt.s32.totalorder %s3908_s13, %s3908_s13 }
  0x17   :  { %p3915_p8 = por %p3914_p7, %p3913_p6 }
  0x19   :  { %p3916_p9 = pnand %p3915_p8, %p3909_p5 }
  0x1b   :  { %3919 = shalt.err (!%p3916_p9)
}
  0x1c   :  { %63 = dma.hbm_to_vmem [thread:$0]  %s4150_s3, 4096, %s58_s10, [#allocation9], %s4009_s29, %s4009_s29, %s4010_s30  }
  0x1d   :  { %s3928_s16 = scalar_lea.vmem %s24_s12, 3648  ;;  %p3933_p11 = scmp.lt.s32.totalorder %s24_s12, %s24_s12 }
  0x1e   :  { %p3929_p10 = scmp.ne.s32.totalorder %s24_s12, %s3928_s16  ;;  %p3934_p12 = scmp.lt.s32.totalorder %s3928_s16, %s3928_s16 }
  0x20   :  { %p3935_p13 = por %p3934_p12, %p3933_p11 }
  0x22   :  { %p3936_p0 = pnand %p3935_p13, %p3929_p10 }
  0x24   :  { %3939 = shalt.err (!%p3936_p0)
}
  0x25   :  { %s4013_s1 = smov 1216   ;;  %s4014_s17 = smov 76  }
  0x26   :  { %29 = dma.hbm_to_vmem [thread:$0]  %s4147_s0, 3648, %s24_s12, [#allocation4], %s4013_s1, %s4013_s1, %s4014_s17  }
  0x27   :  { %s4015_s20 = smov [#allocation7]   ;;  %s4016_s22 = smov [#allocation10]  }
  0x28   :  { %s48_s21 = sshll.u32 %s4015_s20, 4  ;;  %s70_s23 = sshll.u32 %s4016_s22, 4  ;;  %s49_s21 = int_to_ptr.vmem [resolvable:$true] %s48_s21  ;;  %s71_s23 = int_to_ptr.vmem [resolvable:$true] %s70_s23 }
  0x29   :  { %s3948_s3 = scalar_lea.vmem %s49_s21, 32  ;;  %p3953_p2 = scmp.lt.s32.totalorder %s49_s21, %s49_s21 }
  0x2a   :  { %p3949_p1 = scmp.ne.s32.totalorder %s49_s21, %s3948_s3  ;;  %p3954_p3 = scmp.lt.s32.totalorder %s3948_s3, %s3948_s3 }
  0x2c   :  { %p3955_p4 = por %p3954_p3, %p3953_p2 }
  0x2e   :  { %p3956_p5 = pnand %p3955_p4, %p3949_p1 }
  0x30   :  { %3959 = shalt.err (!%p3956_p5)
}
  0x31   :  { %51 = dma.hbm_to_vmem [thread:$0]  %s4149_s2, 32, %s49_s21, [#allocation6]  }
  0x32   :  { %s3968_s26 = scalar_lea.vmem %s71_s23, 32  ;;  %p3973_p7 = scmp.lt.s32.totalorder %s71_s23, %s71_s23 }
  0x33   :  { %p3969_p6 = scmp.ne.s32.totalorder %s71_s23, %s3968_s26  ;;  %p3974_p8 = scmp.lt.s32.totalorder %s3968_s26, %s3968_s26 }
  0x35   :  { %p3975_p9 = por %p3974_p8, %p3973_p7 }
  0x37   :  { %p3976_p10 = pnand %p3975_p9, %p3969_p6 }
  0x39   :  { %3979 = shalt.err (!%p3976_p10)
}
  0x3a   :  { %73 = dma.hbm_to_vmem [thread:$0]  %s4151_s4, 32, %s71_s23, [#allocation9]  }
  0x3b   :  { %s4017_s28 = smov [#allocation11]  }
  0x3c   :  { %s80_s29 = sshll.u32 %s4017_s28, 4  ;;  %s81_s29 = int_to_ptr.vmem [resolvable:$true] %s80_s29 }
  0x3d   :  { %s3988_s30 = scalar_lea.vmem %s81_s29, 32  ;;  %p3993_p12 = scmp.lt.s32.totalorder %s81_s29, %s81_s29 }
  0x3e   :  { %p3989_p11 = scmp.ne.s32.totalorder %s81_s29, %s3988_s30  ;;  %p3994_p13 = scmp.lt.s32.totalorder %s3988_s30, %s3988_s30 }
  0x40   :  { %p3995_p0 = por %p3994_p13, %p3993_p12 }
  0x42   :  { %p3996_p1 = pnand %p3995_p0, %p3989_p11 }
  0x44   :  { %3999 = shalt.err (!%p3996_p1)
}
  0x45   :  { %83 = dma.hbm_to_vmem [thread:$0]  %s4152_s5, 32, %s81_s29, [#allocation12]  }
  0x46   :  { %4000 = dma.done.wait [#allocation4], 3648  }
  0x47   :  { %4001 = vsyncadd [#allocation4], 4294963648 }
  0x48   :  { %4002 = dma.done.wait [#allocation6], 37664  }
  0x49   :  { %4003 = vsyncadd [#allocation6], 4294929632 }
  0x4a   :  { %4004 = dma.done.wait [#allocation9], 4128  }
  0x4b   :  { %4005 = vsyncadd [#allocation9], 4294963168 }
  0x4c   :  { %4006 = dma.done.wait [#allocation12], 32  }
  0x4d   :  { %4007 = vsyncadd [#allocation12], 4294967264  ;;  %v3332_v1 = vld [vmem:[#allocation5 + $0x74] ss:$8 sps:$4 sm:$0xff]   ;;  %v3334_v2 = vld [vmem:[#allocation5 + $0x70] ss:$8 sps:$4 sm:$0xff]  }
  0x4e   :  { %2079 = vmatprep.subr.bf16.mxu0 %v3332_v1  ;;  %v3335_v3 = vld [vmem:[#allocation5 + $0x174] ss:$8 sps:$4 sm:$0xff]   ;;  %v3337_v4 = vld [vmem:[#allocation5 + $0x170] ss:$8 sps:$4 sm:$0xff]   ;;  %v3338_v5 = vld [vmem:[#allocation5 + $0x64] ss:$8 sps:$4 sm:$0xff]  }
  0x4f   :  { %2080 = vmatpush1.bf16.msra.mxu0 %v3334_v2  ;;  %v3340_v6 = vld [vmem:[#allocation5 + $0x60] ss:$8 sps:$4 sm:$0xff]   ;;  %2130 = vmatprep.subr.bf16.mxu1 %v3335_v3  ;;  %v3341_v7 = vld [vmem:[#allocation5 + $0x164] ss:$8 sps:$4 sm:$0xff]   ;;  %v3344_v9 = vld [vmem:[#allocation5 + $0x54] ss:$8 sps:$4 sm:$0xff]  }
  0x50   :  { %2131 = vmatpush1.bf16.msra.mxu1 %v3337_v4  ;;  %2081 = vmatprep.subr.bf16.mxu0 %v3338_v5  ;;  %v3343_v8 = vld [vmem:[#allocation5 + $0x160] ss:$8 sps:$4 sm:$0xff]   ;;  %v3346_v10 = vld [vmem:[#allocation5 + $0x50] ss:$8 sps:$4 sm:$0xff]   ;;  %v3347_v11 = vld [vmem:[#allocation5 + $0x154] ss:$8 sps:$4 sm:$0xff]  }
  0x51   :  { %2132 = vmatprep.subr.bf16.mxu1 %v3341_v7  ;;  %v3350_v12 = vld [vmem:[#allocation5 + $0x44] ss:$8 sps:$4 sm:$0xff]   ;;  %v3349_v13 = vld [vmem:[#allocation5 + $0x150] ss:$8 sps:$4 sm:$0xff]   ;;  %v3352_v15 = vld [vmem:[#allocation5 + $0x40] ss:$8 sps:$4 sm:$0xff]  }
  0x52   :  { %v3353_v14 = vld [vmem:[#allocation5 + $0x144] ss:$8 sps:$4 sm:$0xff]   ;;  %v3356_v16 = vld [vmem:[#allocation5 + $0x34] ss:$8 sps:$4 sm:$0xff]   ;;  %v3355_v17 = vld [vmem:[#allocation5 + $0x140] ss:$8 sps:$4 sm:$0xff]  }
  0x53   :  { %2082 = vmatpush1.bf16.msra.mxu0 %v3340_v6  ;;  %v3359_v18 = vld [vmem:[#allocation5 + $0x134] ss:$8 sps:$4 sm:$0xff]   ;;  %v3358_v19 = vld [vmem:[#allocation5 + $0x30] ss:$8 sps:$4 sm:$0xff]   ;;  %v3362_v20 = vld [vmem:[#allocation5 + $0x24] ss:$8 sps:$4 sm:$0xff]  }
  0x54   :  { %2083 = vmatprep.subr.bf16.mxu0 %v3344_v9  ;;  %2133 = vmatpush1.bf16.msra.mxu1 %v3343_v8  ;;  %v3361_v21 = vld [vmem:[#allocation5 + $0x130] ss:$8 sps:$4 sm:$0xff]   ;;  %v3365_v22 = vld [vmem:[#allocation5 + $0x124] ss:$8 sps:$4 sm:$0xff]   ;;  %v3364_v23 = vld [vmem:[#allocation5 + $0x20] ss:$8 sps:$4 sm:$0xff]  }
  0x55   :  { %2134 = vmatprep.subr.bf16.mxu1 %v3347_v11  ;;  %v3368_v24 = vld [vmem:[#allocation5 + $0x14] ss:$8 sps:$4 sm:$0xff]   ;;  %v3367_v25 = vld [vmem:[#allocation5 + $0x120] ss:$8 sps:$4 sm:$0xff]   ;;  %v3370_v27 = vld [vmem:[#allocation5 + $0x10] ss:$8 sps:$4 sm:$0xff]  }
  0x56   :  { %v3371_v26 = vld [vmem:[#allocation5 + $0x114] ss:$8 sps:$4 sm:$0xff]   ;;  %v3374_v28 = vld [vmem:[#allocation5 + $0x4] ss:$8 sps:$4 sm:$0xff]   ;;  %v3373_v29 = vld [vmem:[#allocation5 + $0x110] ss:$8 sps:$4 sm:$0xff]  }
  0x57   :  { %2084 = vmatpush1.bf16.msra.mxu0 %v3346_v10  ;;  %v3377_v30 = vld [vmem:[#allocation5 + $0x104] ss:$8 sps:$4 sm:$0xff]   ;;  %v3376_v31 = vld [vmem:[#allocation5] ss:$8 sps:$4 sm:$0xff]   ;;  %v3380_v32 = vld [vmem:[#allocation5 + $0xf4] ss:$8 sps:$4 sm:$0xff]  }
  0x58   :  { %2085 = vmatprep.subr.bf16.mxu0 %v3350_v12  ;;  %2135 = vmatpush1.bf16.msra.mxu1 %v3349_v13  ;;  %v3379_v33 = vld [vmem:[#allocation5 + $0x100] ss:$8 sps:$4 sm:$0xff]   ;;  %v3383_v34 = vld [vmem:[#allocation5 + $0x1f4] ss:$8 sps:$4 sm:$0xff]   ;;  %v3382_v35 = vld [vmem:[#allocation5 + $0xf0] ss:$8 sps:$4 sm:$0xff]  }
  0x59   :  { %2136 = vmatprep.subr.bf16.mxu1 %v3353_v14  ;;  %v3386_v36 = vld [vmem:[#allocation5 + $0xe4] ss:$8 sps:$4 sm:$0xff]   ;;  %v3385_v37 = vld [vmem:[#allocation5 + $0x1f0] ss:$8 sps:$4 sm:$0xff]   ;;  %v3388_v39 = vld [vmem:[#allocation5 + $0xe0] ss:$8 sps:$4 sm:$0xff]  }
  0x5a   :  { %v3389_v38 = vld [vmem:[#allocation5 + $0x1e4] ss:$8 sps:$4 sm:$0xff]   ;;  %v3392_v40 = vld [vmem:[#allocation5 + $0xd4] ss:$8 sps:$4 sm:$0xff]   ;;  %v3391_v41 = vld [vmem:[#allocation5 + $0x1e0] ss:$8 sps:$4 sm:$0xff]  }
  0x5b   :  { %2086 = vmatpush1.bf16.msra.mxu0 %v3352_v15  ;;  %v3395_v42 = vld [vmem:[#allocation5 + $0x1d4] ss:$8 sps:$4 sm:$0xff]   ;;  %v3394_v43 = vld [vmem:[#allocation5 + $0xd0] ss:$8 sps:$4 sm:$0xff]   ;;  %v3398_v44 = vld [vmem:[#allocation5 + $0xc4] ss:$8 sps:$4 sm:$0xff]  }
  0x5c   :  { %2087 = vmatprep.subr.bf16.mxu0 %v3356_v16  ;;  %2137 = vmatpush1.bf16.msra.mxu1 %v3355_v17  ;;  %v3397_v45 = vld [vmem:[#allocation5 + $0x1d0] ss:$8 sps:$4 sm:$0xff]   ;;  %v3401_v46 = vld [vmem:[#allocation5 + $0x1c4] ss:$8 sps:$4 sm:$0xff]   ;;  %v3400_v47 = vld [vmem:[#allocation5 + $0xc0] ss:$8 sps:$4 sm:$0xff]  }
  0x5d   :  { %2138 = vmatprep.subr.bf16.mxu1 %v3359_v18  ;;  %v3429_v48 = vld [vmem:[#allocation3 + $0x4] ss:$76 sps:$4 sm:$0xff]   ;;  %v3404_v49 = vld [vmem:[#allocation5 + $0xb4] ss:$8 sps:$4 sm:$0xff]   ;;  %v3406_v53 = vld [vmem:[#allocation5 + $0xb0] ss:$8 sps:$4 sm:$0xff]  }
  0x5e   :  { %v3403_v50 = vld [vmem:[#allocation5 + $0x1c0] ss:$8 sps:$4 sm:$0xff]   ;;  %2111 = vmatprep.mubr.bf16.mxu0 %v3429_v48  ;;  %v3407_v51 = vld [vmem:[#allocation5 + $0x1b4] ss:$8 sps:$4 sm:$0xff]   ;;  %v3410_v54 = vld [vmem:[#allocation5 + $0xa4] ss:$8 sps:$4 sm:$0xff]  }
  0x5f   :  { %2088 = vmatpush1.bf16.msra.mxu0 %v3358_v19  ;;  %v3436_v52 = vld [vmem:[#allocation3 + $0xc] ss:$76 sps:$4 sm:$0xff]   ;;  %v3409_v55 = vld [vmem:[#allocation5 + $0x1b0] ss:$8 sps:$4 sm:$0xff]   ;;  %v3413_v56 = vld [vmem:[#allocation5 + $0x1a4] ss:$8 sps:$4 sm:$0xff]  }
  0x60   :  { %2089 = vmatprep.subr.bf16.mxu0 %v3362_v20  ;;  %2139 = vmatpush1.bf16.msra.mxu1 %v3361_v21  ;;  %v3412_v57 = vld [vmem:[#allocation5 + $0xa0] ss:$8 sps:$4 sm:$0xff]   ;;  %v3416_v58 = vld [vmem:[#allocation5 + $0x94] ss:$8 sps:$4 sm:$0xff]   ;;  %v3418_v61 = vld [vmem:[#allocation5 + $0x90] ss:$8 sps:$4 sm:$0xff]  }
  0x61   :  { %2140 = vmatprep.subr.bf16.mxu1 %v3365_v22  ;;  %2162 = vmatprep.mubr.bf16.mxu1 %v3436_v52  ;;  %v3415_v59 = vld [vmem:[#allocation5 + $0x1a0] ss:$8 sps:$4 sm:$0xff]   ;;  %v3419_v60 = vld [vmem:[#allocation5 + $0x194] ss:$8 sps:$4 sm:$0xff]   ;;  %v3422_v62 = vld [vmem:[#allocation5 + $0x84] ss:$8 sps:$4 sm:$0xff]  }
  0x62   :  { %v3421_v63 = vld [vmem:[#allocation5 + $0x190] ss:$8 sps:$4 sm:$0xff]   ;;  %v3425_v0 = vld [vmem:[#allocation5 + $0x184] ss:$8 sps:$4 sm:$0xff]   ;;  %v3424_v1 = vld [vmem:[#allocation5 + $0x80] ss:$8 sps:$4 sm:$0xff]  }
  0x63   :  { %2090 = vmatpush1.bf16.msra.mxu0 %v3364_v23  ;;  %v3433_v2 = vld [vmem:[#allocation5 + $0x274] ss:$8 sps:$4 sm:$0xff]   ;;  %v3430_v3 = vld [vmem:[#allocation5 + $0x180] ss:$8 sps:$4 sm:$0xff]   ;;  %v3431_v6 = vld [vmem:[#allocation5 + $0x270] ss:$8 sps:$4 sm:$0xff]  }
  0x64   :  { %2091 = vmatprep.subr.bf16.mxu0 %v3368_v24  ;;  %2141 = vmatpush1.bf16.msra.mxu1 %v3367_v25  ;;  %v3427_v4 = vld [vmem:[#allocation3] ss:$76 sps:$4 sm:$0xff]   ;;  %v3434_v7 = vld [vmem:[#allocation3 + $0x8] ss:$76 sps:$4 sm:$0xff]   ;;  %v125_v23 = vld [vmem:[#allocation3 + $0x98] sm:$0xff]  ;;  %vm2072_vm0 = vcmask 392192  }
  0x65   :  { %2142 = vmatprep.subr.bf16.mxu1 %v3371_v26  ;;  %v3439_v5 = vld [vmem:[#allocation5 + $0x374] ss:$8 sps:$4 sm:$0xff]   ;;  %v3442_v8 = vld [vmem:[#allocation5 + $0x264] ss:$8 sps:$4 sm:$0xff]   ;;  %v3437_v9 = vld [vmem:[#allocation5 + $0x370] ss:$8 sps:$4 sm:$0xff]   ;;  %v2971_v25 = vcombine.high %v125_v23, %v125_v23  ;;  %v2970_v26 = vcombine.low %v125_v23, %v125_v23 }
  0x66   :  { %v3445_v10 = vld [vmem:[#allocation5 + $0x364] ss:$8 sps:$4 sm:$0xff]   ;;  %v3440_v11 = vld [vmem:[#allocation5 + $0x260] ss:$8 sps:$4 sm:$0xff]   ;;  %v3448_v12 = vld [vmem:[#allocation5 + $0x254] ss:$8 sps:$4 sm:$0xff]  }
  0x67   :  { %2092 = vmatpush1.bf16.msra.mxu0 %v3370_v27  ;;  %v3443_v13 = vld [vmem:[#allocation5 + $0x360] ss:$8 sps:$4 sm:$0xff]   ;;  %v3451_v14 = vld [vmem:[#allocation5 + $0x354] ss:$8 sps:$4 sm:$0xff]   ;;  %v3446_v15 = vld [vmem:[#allocation5 + $0x250] ss:$8 sps:$4 sm:$0xff]  }
  0x68   :  { %2093 = vmatprep.subr.bf16.mxu0 %v3374_v28  ;;  %2143 = vmatpush1.bf16.msra.mxu1 %v3373_v29  ;;  %v3454_v16 = vld [vmem:[#allocation5 + $0x244] ss:$8 sps:$4 sm:$0xff]   ;;  %v3449_v17 = vld [vmem:[#allocation5 + $0x350] ss:$8 sps:$4 sm:$0xff]   ;;  %v3452_v19 = vld [vmem:[#allocation5 + $0x240] ss:$8 sps:$4 sm:$0xff]  }
  0x69   :  { %2144 = vmatprep.subr.bf16.mxu1 %v3377_v30  ;;  %v3457_v18 = vld [vmem:[#allocation5 + $0x344] ss:$8 sps:$4 sm:$0xff]   ;;  %v3460_v20 = vld [vmem:[#allocation5 + $0x234] ss:$8 sps:$4 sm:$0xff]   ;;  %v3455_v21 = vld [vmem:[#allocation5 + $0x340] ss:$8 sps:$4 sm:$0xff]  }
  0x6a   :  { %v3463_v22 = vld [vmem:[#allocation5 + $0x334] ss:$8 sps:$4 sm:$0xff]   ;;  %v3458_v24 = vld [vmem:[#allocation5 + $0x230] ss:$8 sps:$4 sm:$0xff]   ;;  %v3466_v27 = vld [vmem:[#allocation5 + $0x224] ss:$8 sps:$4 sm:$0xff]  }
  0x6b   :  { %2094 = vmatpush1.bf16.msra.mxu0 %v3376_v31  ;;  %v3461_v28 = vld [vmem:[#allocation5 + $0x330] ss:$8 sps:$4 sm:$0xff]   ;;  %v3464_v29 = vld [vmem:[#allocation5 + $0x220] ss:$8 sps:$4 sm:$0xff]   ;;  %v3469_v30 = vld [vmem:[#allocation5 + $0x324] ss:$8 sps:$4 sm:$0xff]  }
  0x6c   :  { %2095 = vmatprep.subr.bf16.mxu0 %v3380_v32  ;;  %2145 = vmatpush1.bf16.msra.mxu1 %v3379_v33  ;;  %v126_v31 = vld [vmem:[#allocation3 + $0xa0] sm:$0xff]  ;;  %v3490_v48 = vld [vmem:[#allocation5 + $0x2e4] ss:$8 sps:$4 sm:$0xff]   ;;  %vm2939_vm13 = vcmask 7168  }
  0x6d   :  { %2146 = vmatprep.subr.bf16.mxu1 %v3383_v34  ;;  %v3472_v32 = vld [vmem:[#allocation5 + $0x214] ss:$8 sps:$4 sm:$0xff]   ;;  %v2973_v33 = vcombine.high %v126_v31, %v126_v31  ;;  %v2972_v34 = vcombine.low %v126_v31, %v126_v31  ;;  %v3642_v31 = vld [vmem:[#allocation3 + $0x24] ss:$76 sps:$4 sm:$0xff]  }
  0x6e   :  { %v3496_v52 = vld [vmem:[#allocation5 + $0x2d4] ss:$8 sps:$4 sm:$0xff]  }
  0x6f   :  { %2096 = vmatpush2.bf16.msra.mxu0 %v3382_v35  ;;  %v3467_v35 = vld [vmem:[#allocation5 + $0x320] ss:$8 sps:$4 sm:$0xff]  }
  0x70   :  { %2097 = vmatprep.subr.bf16.mxu0 %v3386_v36  ;;  %2147 = vmatpush2.bf16.msra.mxu1 %v3385_v37  ;;  %v3475_v36 = vld [vmem:[#allocation5 + $0x314] ss:$8 sps:$4 sm:$0xff]   ;;  %v3470_v37 = vld [vmem:[#allocation5 + $0x210] ss:$8 sps:$4 sm:$0xff]  }
  0x71   :  { %2148 = vmatprep.subr.bf16.mxu1 %v3389_v38  ;;  %v3478_v38 = vld [vmem:[#allocation5 + $0x204] ss:$8 sps:$4 sm:$0xff]  }
  0x73   :  { %2098 = vmatpush2.bf16.msra.mxu0 %v3388_v39  ;;  %v3473_v39 = vld [vmem:[#allocation5 + $0x310] ss:$8 sps:$4 sm:$0xff]  }
  0x74   :  { %2099 = vmatprep.subr.bf16.mxu0 %v3392_v40  ;;  %2149 = vmatpush2.bf16.msra.mxu1 %v3391_v41  ;;  %v3536_v40 = vld [vmem:[#allocation3 + $0x14] ss:$76 sps:$4 sm:$0xff]   ;;  %v3481_v41 = vld [vmem:[#allocation5 + $0x304] ss:$8 sps:$4 sm:$0xff]  }
  0x75   :  { %2150 = vmatprep.subr.bf16.mxu1 %v3395_v42  ;;  %v3476_v42 = vld [vmem:[#allocation5 + $0x200] ss:$8 sps:$4 sm:$0xff]  }
  0x77   :  { %2100 = vmatpush2.bf16.msra.mxu0 %v3394_v43  ;;  %v3484_v43 = vld [vmem:[#allocation5 + $0x2f4] ss:$8 sps:$4 sm:$0xff]  }
  0x78   :  { %2101 = vmatprep.subr.bf16.mxu0 %v3398_v44  ;;  %2151 = vmatpush2.bf16.msra.mxu1 %v3397_v45  ;;  %v3542_v44 = vld [vmem:[#allocation3 + $0x1c] ss:$76 sps:$4 sm:$0xff]   ;;  %v3479_v45 = vld [vmem:[#allocation5 + $0x300] ss:$8 sps:$4 sm:$0xff]  }
  0x79   :  { %2152 = vmatprep.subr.bf16.mxu1 %v3401_v46  ;;  %v3487_v46 = vld [vmem:[#allocation5 + $0x3f4] ss:$8 sps:$4 sm:$0xff]  }
  0x7b   :  { %2102 = vmatpush2.bf16.msra.mxu0 %v3400_v47  ;;  %v3482_v47 = vld [vmem:[#allocation5 + $0x2f0] ss:$8 sps:$4 sm:$0xff]  }
  0x7c   :  { %2103 = vmatprep.subr.bf16.mxu0 %v3404_v49  ;;  %2153 = vmatpush2.bf16.msra.mxu1 %v3403_v50  ;;  %v3485_v49 = vld [vmem:[#allocation5 + $0x3f0] ss:$8 sps:$4 sm:$0xff]   ;;  %v3493_v50 = vld [vmem:[#allocation5 + $0x3e4] ss:$8 sps:$4 sm:$0xff]  }
  0x7d   :  { %2154 = vmatprep.subr.bf16.mxu1 %v3407_v51  ;;  %v3488_v51 = vld [vmem:[#allocation5 + $0x2e0] ss:$8 sps:$4 sm:$0xff]  }
  0x7f   :  { %2104 = vmatpush2.bf16.msra.mxu0 %v3406_v53  ;;  %v3491_v53 = vld [vmem:[#allocation5 + $0x3e0] ss:$8 sps:$4 sm:$0xff]  }
  0x80   :  { %2105 = vmatprep.subr.bf16.mxu0 %v3410_v54  ;;  %2155 = vmatpush2.bf16.msra.mxu1 %v3409_v55  ;;  %v3499_v54 = vld [vmem:[#allocation5 + $0x3d4] ss:$8 sps:$4 sm:$0xff]   ;;  %v3494_v55 = vld [vmem:[#allocation5 + $0x2d0] ss:$8 sps:$4 sm:$0xff]  }
  0x81   :  { %2156 = vmatprep.subr.bf16.mxu1 %v3413_v56  ;;  %v3502_v56 = vld [vmem:[#allocation5 + $0x2c4] ss:$8 sps:$4 sm:$0xff]  }
  0x83   :  { %2106 = vmatpush2.bf16.msra.mxu0 %v3412_v57  ;;  %v3497_v57 = vld [vmem:[#allocation5 + $0x3d0] ss:$8 sps:$4 sm:$0xff]  }
  0x84   :  { %2107 = vmatprep.subr.bf16.mxu0 %v3416_v58  ;;  %2157 = vmatpush2.bf16.msra.mxu1 %v3415_v59  ;;  %v3505_v58 = vld [vmem:[#allocation5 + $0x3c4] ss:$8 sps:$4 sm:$0xff]   ;;  %v3500_v59 = vld [vmem:[#allocation5 + $0x2c0] ss:$8 sps:$4 sm:$0xff]  }
  0x85   :  { %2158 = vmatprep.subr.bf16.mxu1 %v3419_v60  ;;  %v3508_v60 = vld [vmem:[#allocation5 + $0x2b4] ss:$8 sps:$4 sm:$0xff]  }
  0x87   :  { %2108 = vmatpush2.bf16.msra.mxu0 %v3418_v61  ;;  %v3503_v61 = vld [vmem:[#allocation5 + $0x3c0] ss:$8 sps:$4 sm:$0xff]  }
  0x88   :  { %2109 = vmatprep.subr.bf16.mxu0 %v3422_v62  ;;  %2159 = vmatpush2.bf16.msra.mxu1 %v3421_v63  ;;  %v3512_v62 = vld [vmem:[#allocation5 + $0x3b4] ss:$8 sps:$4 sm:$0xff]   ;;  %v3506_v63 = vld [vmem:[#allocation5 + $0x2b0] ss:$8 sps:$4 sm:$0xff]  }
  0x89   :  { %2160 = vmatprep.subr.bf16.mxu1 %v3425_v0  ;;  %v3516_v0 = vld [vmem:[#allocation5 + $0x2a4] ss:$8 sps:$4 sm:$0xff]  }
  0x8b   :  { %2110 = vmatpush2.bf16.msra.mxu0 %v3424_v1  ;;  %v3510_v1 = vld [vmem:[#allocation5 + $0x3b0] ss:$8 sps:$4 sm:$0xff]  }
  0x8c   :  { %2181 = vmatprep.subr.bf16.mxu0 %v3433_v2  ;;  %2161 = vmatpush2.bf16.msra.mxu1 %v3430_v3  ;;  %v3519_v2 = vld [vmem:[#allocation5 + $0x3a4] ss:$8 sps:$4 sm:$0xff]   ;;  %v3514_v3 = vld [vmem:[#allocation5 + $0x2a0] ss:$8 sps:$4 sm:$0xff]  }
  0x8d   :  { %2232 = vmatprep.subr.bf16.mxu1 %v3439_v5  ;;  %v3517_v5 = vld [vmem:[#allocation5 + $0x3a0] ss:$8 sps:$4 sm:$0xff]  }
  0x8e   :  { %2112 = vmatmul.mubr.bf16.vlgmr.msra.gmra.mxu0 %v3427_v4  ;;  %v3523_v4 = vld [vmem:[#allocation5 + $0x294] ss:$8 sps:$4 sm:$0xff]  }
  0x8f   :  { %2182 = vmatpush1.bf16.msra.mxu0 %v3431_v6  ;;  %2163 = vmatmul.mubr.bf16.vlgmr.msra.gmra.mxu1 %v3434_v7  ;;  %v3527_v6 = vld [vmem:[#allocation5 + $0x394] ss:$8 sps:$4 sm:$0xff]   ;;  %v3521_v7 = vld [vmem:[#allocation5 + $0x290] ss:$8 sps:$4 sm:$0xff]  }
  0x90   :  { %2183 = vmatprep.subr.bf16.mxu0 %v3442_v8  ;;  %2233 = vmatpush1.bf16.msra.mxu1 %v3437_v9  ;;  %v3530_v8 = vld [vmem:[#allocation5 + $0x284] ss:$8 sps:$4 sm:$0xff]   ;;  %v3525_v9 = vld [vmem:[#allocation5 + $0x390] ss:$8 sps:$4 sm:$0xff]  }
  0x91   :  { %2234 = vmatprep.subr.bf16.mxu1 %v3445_v10  ;;  %2121 = vmatprep.mubr.bf16.mxu0 %v2971_v25  ;;  %v3528_v10 = vld [vmem:[#allocation5 + $0x280] ss:$8 sps:$4 sm:$0xff]  }
  0x92   :  { %2172 = vmatprep.mubr.bf16.mxu1 %v2973_v33  ;;  %v3546_v25 = vld [vmem:[#allocation5 + $0x460] ss:$8 sps:$4 sm:$0xff]   ;;  %v3564_v33 = vld [vmem:[#allocation5 + $0x444] ss:$8 sps:$4 sm:$0xff]  }
  0x93   :  { %2184 = vmatpush1.bf16.msra.mxu0 %v3440_v11  ;;  %v3533_v11 = vld [vmem:[#allocation5 + $0x384] ss:$8 sps:$4 sm:$0xff]  }
  0x94   :  { %2185 = vmatprep.subr.bf16.mxu0 %v3448_v12  ;;  %2235 = vmatpush1.bf16.msra.mxu1 %v3443_v13  ;;  %v3531_v12 = vld [vmem:[#allocation5 + $0x380] ss:$8 sps:$4 sm:$0xff]   ;;  %v3539_v13 = vld [vmem:[#allocation5 + $0x474] ss:$8 sps:$4 sm:$0xff]  }
  0x95   :  { %2236 = vmatprep.subr.bf16.mxu1 %v3451_v14  ;;  %v127_v14 = vld [vmem:[#allocation3 + $0xa8] sm:$0xff] }
  0x96   :  { %2122 = vmatmul.mubr.bf16.gmra.mxu0 %v2970_v26  ;;  %v3556_v26 = vld [vmem:[#allocation5 + $0x454] ss:$8 sps:$4 sm:$0xff]  }
  0x97   :  { %2186 = vmatpush1.bf16.msra.mxu0 %v3446_v15  ;;  %2173 = vmatmul.mubr.bf16.gmra.mxu1 %v2972_v34  ;;  %v3534_v15 = vld [vmem:[#allocation3 + $0x10] ss:$76 sps:$4 sm:$0xff]  }
  0x98   :  { %2187 = vmatprep.subr.bf16.mxu0 %v3454_v16  ;;  %2237 = vmatpush1.bf16.msra.mxu1 %v3449_v17  ;;  %v3545_v16 = vld [vmem:[#allocation5 + $0x574] ss:$8 sps:$4 sm:$0xff]   ;;  %v128_v17 = vld [vmem:[#allocation3 + $0xb0] sm:$0xff] }
  0x99   :  { %2238 = vmatprep.subr.bf16.mxu1 %v3457_v18  ;;  %2213 = vmatprep.mubr.bf16.mxu0 %v3536_v40  ;;  %v3537_v18 = vld [vmem:[#allocation5 + $0x470] ss:$8 sps:$4 sm:$0xff]   ;;  %v2977_v23 = vcombine.high %v128_v17, %v128_v17  ;;  %v3573_v40 = vld [vmem:[#allocation5 + $0x534] ss:$8 sps:$4 sm:$0xff]  }
  0x9a   :  { %2264 = vmatprep.mubr.bf16.mxu1 %v3542_v44  ;;  %v3559_v34 = vld [vmem:[#allocation5 + $0x550] ss:$8 sps:$4 sm:$0xff]   ;;  %v3579_v44 = vld [vmem:[#allocation5 + $0x524] ss:$8 sps:$4 sm:$0xff]  }
  0x9b   :  { %2188 = vmatpush1.bf16.msra.mxu0 %v3452_v19  ;;  %v3540_v19 = vld [vmem:[#allocation3 + $0x18] ss:$76 sps:$4 sm:$0xff]  }
  0x9c   :  { %2189 = vmatprep.subr.bf16.mxu0 %v3460_v20  ;;  %2239 = vmatpush1.bf16.msra.mxu1 %v3455_v21  ;;  %v2975_v20 = vcombine.high %v127_v14, %v127_v14  ;;  %v3548_v21 = vld [vmem:[#allocation5 + $0x464] ss:$8 sps:$4 sm:$0xff]  }
  0x9d   :  { %2240 = vmatprep.subr.bf16.mxu1 %v3463_v22  ;;  %v3543_v22 = vld [vmem:[#allocation5 + $0x570] ss:$8 sps:$4 sm:$0xff]  }
  0x9f   :  { %2190 = vmatpush1.bf16.msra.mxu0 %v3458_v24  ;;  %v3551_v24 = vld [vmem:[#allocation5 + $0x564] ss:$8 sps:$4 sm:$0xff]  }
  0xa0   :  { %2191 = vmatprep.subr.bf16.mxu0 %v3466_v27  ;;  %2241 = vmatpush1.bf16.msra.mxu1 %v3461_v28  ;;  %v3549_v27 = vld [vmem:[#allocation5 + $0x560] ss:$8 sps:$4 sm:$0xff]   ;;  %v2974_v28 = vcombine.low %v127_v14, %v127_v14  ;;  %v3630_v14 = vld [vmem:[#allocation5 + $0x494] ss:$8 sps:$4 sm:$0xff]  }
  0xa1   :  { %2242 = vmatprep.subr.bf16.mxu1 %v3469_v30  ;;  %v3554_v30 = vld [vmem:[#allocation5 + $0x450] ss:$8 sps:$4 sm:$0xff]  }
  0xa3   :  { %2192 = vmatpush1.bf16.msra.mxu0 %v3464_v29  ;;  %v3561_v29 = vld [vmem:[#allocation5 + $0x554] ss:$8 sps:$4 sm:$0xff]  }
  0xa4   :  { %2193 = vmatprep.subr.bf16.mxu0 %v3472_v32  ;;  %2243 = vmatpush1.bf16.msra.mxu1 %v3467_v35  ;;  %v2976_v32 = vcombine.low %v128_v17, %v128_v17  ;;  %v3567_v35 = vld [vmem:[#allocation5 + $0x544] ss:$8 sps:$4 sm:$0xff]   ;;  %v3628_v17 = vld [vmem:[#allocation5 + $0x490] ss:$8 sps:$4 sm:$0xff]  }
  0xa5   :  { %2244 = vmatprep.subr.bf16.mxu1 %v3475_v36  ;;  %v3648_v36 = vld [vmem:[#allocation3 + $0x2c] ss:$76 sps:$4 sm:$0xff]  }
  0xa7   :  { %2194 = vmatpush1.bf16.msra.mxu0 %v3470_v37  ;;  %v3562_v37 = vld [vmem:[#allocation5 + $0x440] ss:$8 sps:$4 sm:$0xff]  }
  0xa8   :  { %2195 = vmatprep.subr.bf16.mxu0 %v3478_v38  ;;  %2245 = vmatpush1.bf16.msra.mxu1 %v3473_v39  ;;  %v3570_v38 = vld [vmem:[#allocation5 + $0x434] ss:$8 sps:$4 sm:$0xff]   ;;  %v3565_v39 = vld [vmem:[#allocation5 + $0x540] ss:$8 sps:$4 sm:$0xff]  }
  0xa9   :  { %2246 = vmatprep.subr.bf16.mxu1 %v3481_v41  ;;  %v3568_v41 = vld [vmem:[#allocation5 + $0x430] ss:$8 sps:$4 sm:$0xff]  }
  0xab   :  { %2196 = vmatpush1.bf16.msra.mxu0 %v3476_v42  ;;  %v3576_v42 = vld [vmem:[#allocation5 + $0x424] ss:$8 sps:$4 sm:$0xff]  }
  0xac   :  { %2197 = vmatprep.subr.bf16.mxu0 %v3484_v43  ;;  %2247 = vmatpush1.bf16.msra.mxu1 %v3479_v45  ;;  %v3571_v43 = vld [vmem:[#allocation5 + $0x530] ss:$8 sps:$4 sm:$0xff]   ;;  %v3574_v45 = vld [vmem:[#allocation5 + $0x420] ss:$8 sps:$4 sm:$0xff]  }
  0xad   :  { %2248 = vmatprep.subr.bf16.mxu1 %v3487_v46  ;;  %v3582_v46 = vld [vmem:[#allocation5 + $0x414] ss:$8 sps:$4 sm:$0xff]  }
  0xaf   :  { %2198 = vmatpush2.bf16.msra.mxu0 %v3482_v47  ;;  %v3577_v47 = vld [vmem:[#allocation5 + $0x520] ss:$8 sps:$4 sm:$0xff]  }
  0xb0   :  { %2199 = vmatprep.subr.bf16.mxu0 %v3490_v48  ;;  %2249 = vmatpush2.bf16.msra.mxu1 %v3485_v49  ;;  %v3585_v48 = vld [vmem:[#allocation5 + $0x514] ss:$8 sps:$4 sm:$0xff]   ;;  %v3580_v49 = vld [vmem:[#allocation5 + $0x410] ss:$8 sps:$4 sm:$0xff]  }
  0xb1   :  { %2250 = vmatprep.subr.bf16.mxu1 %v3493_v50  ;;  %v3588_v50 = vld [vmem:[#allocation5 + $0x404] ss:$8 sps:$4 sm:$0xff]  }
  0xb3   :  { %2200 = vmatpush2.bf16.msra.mxu0 %v3488_v51  ;;  %v3583_v51 = vld [vmem:[#allocation5 + $0x510] ss:$8 sps:$4 sm:$0xff]  }
  0xb4   :  { %2201 = vmatprep.subr.bf16.mxu0 %v3496_v52  ;;  %2251 = vmatpush2.bf16.msra.mxu1 %v3491_v53  ;;  %v3591_v52 = vld [vmem:[#allocation5 + $0x504] ss:$8 sps:$4 sm:$0xff]   ;;  %v3586_v53 = vld [vmem:[#allocation5 + $0x400] ss:$8 sps:$4 sm:$0xff]  }
  0xb5   :  { %2252 = vmatprep.subr.bf16.mxu1 %v3499_v54  ;;  %v3594_v54 = vld [vmem:[#allocation5 + $0x4f4] ss:$8 sps:$4 sm:$0xff]  }
  0xb7   :  { %2202 = vmatpush2.bf16.msra.mxu0 %v3494_v55  ;;  %v3589_v55 = vld [vmem:[#allocation5 + $0x500] ss:$8 sps:$4 sm:$0xff]  }
  0xb8   :  { %2203 = vmatprep.subr.bf16.mxu0 %v3502_v56  ;;  %2253 = vmatpush2.bf16.msra.mxu1 %v3497_v57  ;;  %v3597_v56 = vld [vmem:[#allocation5 + $0x5f4] ss:$8 sps:$4 sm:$0xff]   ;;  %v3592_v57 = vld [vmem:[#allocation5 + $0x4f0] ss:$8 sps:$4 sm:$0xff]  }
  0xb9   :  { %2254 = vmatprep.subr.bf16.mxu1 %v3505_v58  ;;  %v3600_v58 = vld [vmem:[#allocation5 + $0x4e4] ss:$8 sps:$4 sm:$0xff]  }
  0xbb   :  { %2204 = vmatpush2.bf16.msra.mxu0 %v3500_v59  ;;  %v3595_v59 = vld [vmem:[#allocation5 + $0x5f0] ss:$8 sps:$4 sm:$0xff]  }
  0xbc   :  { %2205 = vmatprep.subr.bf16.mxu0 %v3508_v60  ;;  %2255 = vmatpush2.bf16.msra.mxu1 %v3503_v61  ;;  %v3603_v60 = vld [vmem:[#allocation5 + $0x5e4] ss:$8 sps:$4 sm:$0xff]   ;;  %v3598_v61 = vld [vmem:[#allocation5 + $0x4e0] ss:$8 sps:$4 sm:$0xff]  }
  0xbd   :  { %2256 = vmatprep.subr.bf16.mxu1 %v3512_v62  ;;  %v3606_v62 = vld [vmem:[#allocation5 + $0x4d4] ss:$8 sps:$4 sm:$0xff]  }
  0xbf   :  { %2206 = vmatpush2.bf16.msra.mxu0 %v3506_v63  ;;  %v3601_v63 = vld [vmem:[#allocation5 + $0x5e0] ss:$8 sps:$4 sm:$0xff]  }
  0xc0   :  { %2207 = vmatprep.subr.bf16.mxu0 %v3516_v0  ;;  %2257 = vmatpush2.bf16.msra.mxu1 %v3510_v1  ;;  %v3609_v0 = vld [vmem:[#allocation5 + $0x5d4] ss:$8 sps:$4 sm:$0xff]   ;;  %v3604_v1 = vld [vmem:[#allocation5 + $0x4d0] ss:$8 sps:$4 sm:$0xff]  }
  0xc1   :  { %2258 = vmatprep.subr.bf16.mxu1 %v3519_v2  ;;  %v3612_v2 = vld [vmem:[#allocation5 + $0x4c4] ss:$8 sps:$4 sm:$0xff]  }
  0xc3   :  { %2208 = vmatpush2.bf16.msra.mxu0 %v3514_v3  ;;  %v3607_v3 = vld [vmem:[#allocation5 + $0x5d0] ss:$8 sps:$4 sm:$0xff]  }
  0xc4   :  { %2209 = vmatprep.subr.bf16.mxu0 %v3523_v4  ;;  %2259 = vmatpush2.bf16.msra.mxu1 %v3517_v5  ;;  %v3615_v4 = vld [vmem:[#allocation5 + $0x5c4] ss:$8 sps:$4 sm:$0xff]   ;;  %v3610_v5 = vld [vmem:[#allocation5 + $0x4c0] ss:$8 sps:$4 sm:$0xff]  }
  0xc5   :  { %2260 = vmatprep.subr.bf16.mxu1 %v3527_v6  ;;  %v3618_v6 = vld [vmem:[#allocation5 + $0x4b4] ss:$8 sps:$4 sm:$0xff]  }
  0xc7   :  { %2210 = vmatpush2.bf16.msra.mxu0 %v3521_v7  ;;  %v3613_v7 = vld [vmem:[#allocation5 + $0x5c0] ss:$8 sps:$4 sm:$0xff]  }
  0xc8   :  { %2211 = vmatprep.subr.bf16.mxu0 %v3530_v8  ;;  %2261 = vmatpush2.bf16.msra.mxu1 %v3525_v9  ;;  %v3621_v8 = vld [vmem:[#allocation5 + $0x5b4] ss:$8 sps:$4 sm:$0xff]   ;;  %v3616_v9 = vld [vmem:[#allocation5 + $0x4b0] ss:$8 sps:$4 sm:$0xff]  }
  0xc9   :  { %2262 = vmatprep.subr.bf16.mxu1 %v3533_v11  ;;  %v3619_v11 = vld [vmem:[#allocation5 + $0x5b0] ss:$8 sps:$4 sm:$0xff]  }
  0xcb   :  { %2212 = vmatpush2.bf16.msra.mxu0 %v3528_v10  ;;  %v3624_v10 = vld [vmem:[#allocation5 + $0x4a4] ss:$8 sps:$4 sm:$0xff]  }
  0xcc   :  { %2283 = vmatprep.subr.bf16.mxu0 %v3539_v13  ;;  %2263 = vmatpush2.bf16.msra.mxu1 %v3531_v12  ;;  %v3627_v12 = vld [vmem:[#allocation5 + $0x5a4] ss:$8 sps:$4 sm:$0xff]   ;;  %v3622_v13 = vld [vmem:[#allocation5 + $0x4a0] ss:$8 sps:$4 sm:$0xff]  }
  0xcd   :  { %2334 = vmatprep.subr.bf16.mxu1 %v3545_v16  ;;  %v3633_v16 = vld [vmem:[#allocation5 + $0x594] ss:$8 sps:$4 sm:$0xff]  }
  0xce   :  { %2214 = vmatmul.mubr.bf16.vlgmr.msra.gmra.mxu0 %v3534_v15  ;;  %v3625_v15 = vld [vmem:[#allocation5 + $0x5a0] ss:$8 sps:$4 sm:$0xff]  }
  0xcf   :  { %2284 = vmatpush1.bf16.msra.mxu0 %v3537_v18  ;;  %2223 = vmatprep.mubr.bf16.mxu0 %v2975_v20  ;;  %v3636_v18 = vld [vmem:[#allocation5 + $0x484] ss:$8 sps:$4 sm:$0xff]   ;;  %v3634_v20 = vld [vmem:[#allocation5 + $0x480] ss:$8 sps:$4 sm:$0xff]  }
  0xd0   :  { %2265 = vmatmul.mubr.bf16.vlgmr.msra.gmra.mxu1 %v3540_v19  ;;  %2285 = vmatprep.subr.bf16.mxu0 %v3548_v21  ;;  %v3631_v19 = vld [vmem:[#allocation5 + $0x590] ss:$8 sps:$4 sm:$0xff]   ;;  %v3639_v21 = vld [vmem:[#allocation5 + $0x584] ss:$8 sps:$4 sm:$0xff]  }
  0xd1   :  { %2335 = vmatpush1.bf16.msra.mxu1 %v3543_v22  ;;  %2274 = vmatprep.mubr.bf16.mxu1 %v2977_v23  ;;  %v3637_v22 = vld [vmem:[#allocation5 + $0x580] ss:$8 sps:$4 sm:$0xff]   ;;  %v3645_v23 = vld [vmem:[#allocation5 + $0x674] ss:$8 sps:$4 sm:$0xff]  }
  0xd2   :  { %2336 = vmatprep.subr.bf16.mxu1 %v3551_v24  ;;  %v129_v24 = vld [vmem:[#allocation3 + $0xb8] sm:$0xff] }
  0xd3   :  { %2286 = vmatpush1.bf16.msra.mxu0 %v3546_v25  ;;  %v3640_v25 = vld [vmem:[#allocation3 + $0x20] ss:$76 sps:$4 sm:$0xff]  }
  0xd4   :  { %2287 = vmatprep.subr.bf16.mxu0 %v3556_v26  ;;  %v3643_v26 = vld [vmem:[#allocation5 + $0x670] ss:$8 sps:$4 sm:$0xff]  }
  0xd5   :  { %2337 = vmatpush1.bf16.msra.mxu1 %v3549_v27  ;;  %v3651_v27 = vld [vmem:[#allocation5 + $0x774] ss:$8 sps:$4 sm:$0xff]  }
  0xd6   :  { %2224 = vmatmul.mubr.bf16.gmra.mxu0 %v2974_v28  ;;  %2338 = vmatprep.subr.bf16.mxu1 %v3561_v29  ;;  %v130_v28 = vld [vmem:[#allocation3 + $0xc0] sm:$0xff]  ;;  %v3646_v29 = vld [vmem:[#allocation3 + $0x28] ss:$76 sps:$4 sm:$0xff]  }
  0xd7   :  { %2288 = vmatpush1.bf16.msra.mxu0 %v3554_v30  ;;  %2315 = vmatprep.mubr.bf16.mxu0 %v3642_v31  ;;  %v2979_v30 = vcombine.high %v129_v24, %v129_v24  ;;  %v3654_v31 = vld [vmem:[#allocation5 + $0x664] ss:$8 sps:$4 sm:$0xff]  }
  0xd8   :  { %2275 = vmatmul.mubr.bf16.gmra.mxu1 %v2976_v32  ;;  %2289 = vmatprep.subr.bf16.mxu0 %v3564_v33  ;;  %v3649_v32 = vld [vmem:[#allocation5 + $0x770] ss:$8 sps:$4 sm:$0xff]   ;;  %v2981_v33 = vcombine.high %v130_v28, %v130_v28 }
  0xd9   :  { %2339 = vmatpush1.bf16.msra.mxu1 %v3559_v34  ;;  %2366 = vmatprep.mubr.bf16.mxu1 %v3648_v36  ;;  %v3657_v34 = vld [vmem:[#allocation5 + $0x764] ss:$8 sps:$4 sm:$0xff]   ;;  %v3662_v36 = vld [vmem:[#allocation5 + $0x654] ss:$8 sps:$4 sm:$0xff]  }
  0xda   :  { %2340 = vmatprep.subr.bf16.mxu1 %v3567_v35  ;;  %v3652_v35 = vld [vmem:[#allocation5 + $0x660] ss:$8 sps:$4 sm:$0xff]  }
  0xdb   :  { %2290 = vmatpush1.bf16.msra.mxu0 %v3562_v37  ;;  %v3655_v37 = vld [vmem:[#allocation5 + $0x760] ss:$8 sps:$4 sm:$0xff]  }
  0xdc   :  { %2291 = vmatprep.subr.bf16.mxu0 %v3570_v38  ;;  %v2978_v38 = vcombine.low %v129_v24, %v129_v24  ;;  %v431_v24 = vlaneseq }
  0xdd   :  { %2341 = vmatpush1.bf16.msra.mxu1 %v3565_v39  ;;  %v3660_v39 = vld [vmem:[#allocation5 + $0x650] ss:$8 sps:$4 sm:$0xff]  }
  0xde   :  { %2342 = vmatprep.subr.bf16.mxu1 %v3573_v40  ;;  %v3667_v40 = vld [vmem:[#allocation5 + $0x754] ss:$8 sps:$4 sm:$0xff]  }
  0xdf   :  { %2292 = vmatpush1.bf16.msra.mxu0 %v3568_v41  ;;  %v3748_v41 = vld [vmem:[#allocation3 + $0x34] ss:$76 sps:$4 sm:$0xff]  }
  0xe0   :  { %2293 = vmatprep.subr.bf16.mxu0 %v3576_v42  ;;  %v2980_v42 = vcombine.low %v130_v28, %v130_v28  ;;  %v3734_v28 = vld [vmem:[#allocation5 + $0x690] ss:$8 sps:$4 sm:$0xff]  }
  0xe1   :  { %2343 = vmatpush1.bf16.msra.mxu1 %v3571_v43  ;;  %v3670_v43 = vld [vmem:[#allocation5 + $0x644] ss:$8 sps:$4 sm:$0xff]  }
  0xe2   :  { %2344 = vmatprep.subr.bf16.mxu1 %v3579_v44  ;;  %v3665_v44 = vld [vmem:[#allocation5 + $0x750] ss:$8 sps:$4 sm:$0xff]  }
  0xe3   :  { %2294 = vmatpush1.bf16.msra.mxu0 %v3574_v45  ;;  %v3754_v45 = vld [vmem:[#allocation3 + $0x3c] ss:$76 sps:$4 sm:$0xff]  }
  0xe4   :  { %2295 = vmatprep.subr.bf16.mxu0 %v3582_v46  ;;  %v3673_v46 = vld [vmem:[#allocation5 + $0x744] ss:$8 sps:$4 sm:$0xff]  }
  0xe5   :  { %2345 = vmatpush1.bf16.msra.mxu1 %v3577_v47  ;;  %v3668_v47 = vld [vmem:[#allocation5 + $0x640] ss:$8 sps:$4 sm:$0xff]  }
  0xe6   :  { %2346 = vmatprep.subr.bf16.mxu1 %v3585_v48  ;;  %v3676_v48 = vld [vmem:[#allocation5 + $0x634] ss:$8 sps:$4 sm:$0xff]  }
  0xe7   :  { %2296 = vmatpush1.bf16.msra.mxu0 %v3580_v49  ;;  %v3671_v49 = vld [vmem:[#allocation5 + $0x740] ss:$8 sps:$4 sm:$0xff]  }
  0xe8   :  { %2297 = vmatprep.subr.bf16.mxu0 %v3588_v50  ;;  %v3679_v50 = vld [vmem:[#allocation5 + $0x734] ss:$8 sps:$4 sm:$0xff]  }
  0xe9   :  { %2347 = vmatpush1.bf16.msra.mxu1 %v3583_v51  ;;  %v3674_v51 = vld [vmem:[#allocation5 + $0x630] ss:$8 sps:$4 sm:$0xff]  }
  0xea   :  { %2348 = vmatprep.subr.bf16.mxu1 %v3591_v52  ;;  %v3682_v52 = vld [vmem:[#allocation5 + $0x624] ss:$8 sps:$4 sm:$0xff]  }
  0xeb   :  { %2298 = vmatpush1.bf16.msra.mxu0 %v3586_v53  ;;  %v3677_v53 = vld [vmem:[#allocation5 + $0x730] ss:$8 sps:$4 sm:$0xff]  }
  0xec   :  { %2299 = vmatprep.subr.bf16.mxu0 %v3594_v54  ;;  %v3685_v54 = vld [vmem:[#allocation5 + $0x724] ss:$8 sps:$4 sm:$0xff]  }
  0xed   :  { %2349 = vmatpush1.bf16.msra.mxu1 %v3589_v55  ;;  %v3680_v55 = vld [vmem:[#allocation5 + $0x620] ss:$8 sps:$4 sm:$0xff]  }
  0xee   :  { %2350 = vmatprep.subr.bf16.mxu1 %v3597_v56  ;;  %v3683_v56 = vld [vmem:[#allocation5 + $0x720] ss:$8 sps:$4 sm:$0xff]  }
  0xef   :  { %2300 = vmatpush2.bf16.msra.mxu0 %v3592_v57  ;;  %v3688_v57 = vld [vmem:[#allocation5 + $0x614] ss:$8 sps:$4 sm:$0xff]  }
  0xf0   :  { %2301 = vmatprep.subr.bf16.mxu0 %v3600_v58  ;;  %v3691_v58 = vld [vmem:[#allocation5 + $0x714] ss:$8 sps:$4 sm:$0xff]  }
  0xf1   :  { %2351 = vmatpush2.bf16.msra.mxu1 %v3595_v59  ;;  %v3686_v59 = vld [vmem:[#allocation5 + $0x610] ss:$8 sps:$4 sm:$0xff]  }
  0xf2   :  { %2352 = vmatprep.subr.bf16.mxu1 %v3603_v60  ;;  %v3694_v60 = vld [vmem:[#allocation5 + $0x604] ss:$8 sps:$4 sm:$0xff]  }
  0xf3   :  { %2302 = vmatpush2.bf16.msra.mxu0 %v3598_v61  ;;  %v3689_v61 = vld [vmem:[#allocation5 + $0x710] ss:$8 sps:$4 sm:$0xff]  }
  0xf4   :  { %2303 = vmatprep.subr.bf16.mxu0 %v3606_v62  ;;  %v3697_v62 = vld [vmem:[#allocation5 + $0x704] ss:$8 sps:$4 sm:$0xff]  }
  0xf5   :  { %2353 = vmatpush2.bf16.msra.mxu1 %v3601_v63  ;;  %v3692_v63 = vld [vmem:[#allocation5 + $0x600] ss:$8 sps:$4 sm:$0xff]  }
  0xf6   :  { %2354 = vmatprep.subr.bf16.mxu1 %v3609_v0  ;;  %v3700_v0 = vld [vmem:[#allocation5 + $0x6f4] ss:$8 sps:$4 sm:$0xff]  }
  0xf7   :  { %2304 = vmatpush2.bf16.msra.mxu0 %v3604_v1  ;;  %v3695_v1 = vld [vmem:[#allocation5 + $0x700] ss:$8 sps:$4 sm:$0xff]  }
  0xf8   :  { %2305 = vmatprep.subr.bf16.mxu0 %v3612_v2  ;;  %v3703_v2 = vld [vmem:[#allocation5 + $0x7f4] ss:$8 sps:$4 sm:$0xff]  }
  0xf9   :  { %2355 = vmatpush2.bf16.msra.mxu1 %v3607_v3  ;;  %v3698_v3 = vld [vmem:[#allocation5 + $0x6f0] ss:$8 sps:$4 sm:$0xff]  }
  0xfa   :  { %2356 = vmatprep.subr.bf16.mxu1 %v3615_v4  ;;  %v3706_v4 = vld [vmem:[#allocation5 + $0x6e4] ss:$8 sps:$4 sm:$0xff]  }
  0xfb   :  { %2306 = vmatpush2.bf16.msra.mxu0 %v3610_v5  ;;  %v3701_v5 = vld [vmem:[#allocation5 + $0x7f0] ss:$8 sps:$4 sm:$0xff]  }
  0xfc   :  { %2307 = vmatprep.subr.bf16.mxu0 %v3618_v6  ;;  %v3709_v6 = vld [vmem:[#allocation5 + $0x7e4] ss:$8 sps:$4 sm:$0xff]  }
  0xfd   :  { %2357 = vmatpush2.bf16.msra.mxu1 %v3613_v7  ;;  %v3704_v7 = vld [vmem:[#allocation5 + $0x6e0] ss:$8 sps:$4 sm:$0xff]  }
  0xfe   :  { %2358 = vmatprep.subr.bf16.mxu1 %v3621_v8  ;;  %v3712_v8 = vld [vmem:[#allocation5 + $0x6d4] ss:$8 sps:$4 sm:$0xff]  }
  0xff   :  { %2308 = vmatpush2.bf16.msra.mxu0 %v3616_v9  ;;  %v3707_v9 = vld [vmem:[#allocation5 + $0x7e0] ss:$8 sps:$4 sm:$0xff]  }
 0x100   :  { %2309 = vmatprep.subr.bf16.mxu0 %v3624_v10  ;;  %v3715_v10 = vld [vmem:[#allocation5 + $0x7d4] ss:$8 sps:$4 sm:$0xff]  }
 0x101   :  { %2359 = vmatpush2.bf16.msra.mxu1 %v3619_v11  ;;  %v3710_v11 = vld [vmem:[#allocation5 + $0x6d0] ss:$8 sps:$4 sm:$0xff]  }
 0x102   :  { %2360 = vmatprep.subr.bf16.mxu1 %v3627_v12  ;;  %v3718_v12 = vld [vmem:[#allocation5 + $0x6c4] ss:$8 sps:$4 sm:$0xff]  }
 0x103   :  { %2310 = vmatpush2.bf16.msra.mxu0 %v3622_v13  ;;  %v3713_v13 = vld [vmem:[#allocation5 + $0x7d0] ss:$8 sps:$4 sm:$0xff]  }
 0x104   :  { %2311 = vmatprep.subr.bf16.mxu0 %v3630_v14  ;;  %v3721_v14 = vld [vmem:[#allocation5 + $0x7c4] ss:$8 sps:$4 sm:$0xff]  }
 0x105   :  { %2361 = vmatpush2.bf16.msra.mxu1 %v3625_v15  ;;  %v3716_v15 = vld [vmem:[#allocation5 + $0x6c0] ss:$8 sps:$4 sm:$0xff]  }
 0x106   :  { %2362 = vmatprep.subr.bf16.mxu1 %v3633_v16  ;;  %v3724_v16 = vld [vmem:[#allocation5 + $0x6b4] ss:$8 sps:$4 sm:$0xff]  }
 0x107   :  { %2312 = vmatpush2.bf16.msra.mxu0 %v3628_v17  ;;  %v3719_v17 = vld [vmem:[#allocation5 + $0x7c0] ss:$8 sps:$4 sm:$0xff]  }
 0x108   :  { %2313 = vmatprep.subr.bf16.mxu0 %v3636_v18  ;;  %v3727_v18 = vld [vmem:[#allocation5 + $0x7b4] ss:$8 sps:$4 sm:$0xff]  }
 0x109   :  { %2363 = vmatpush2.bf16.msra.mxu1 %v3631_v19  ;;  %v3722_v19 = vld [vmem:[#allocation5 + $0x6b0] ss:$8 sps:$4 sm:$0xff]  }
 0x10a   :  { %2364 = vmatprep.subr.bf16.mxu1 %v3639_v21  ;;  %v3725_v21 = vld [vmem:[#allocation5 + $0x7b0] ss:$8 sps:$4 sm:$0xff]  }
 0x10b   :  { %2314 = vmatpush2.bf16.msra.mxu0 %v3634_v20  ;;  %v3730_v20 = vld [vmem:[#allocation5 + $0x6a4] ss:$8 sps:$4 sm:$0xff]  }
 0x10c   :  { %2385 = vmatprep.subr.bf16.mxu0 %v3645_v23  ;;  %v3728_v23 = vld [vmem:[#allocation5 + $0x6a0] ss:$8 sps:$4 sm:$0xff]  }
 0x10d   :  { %2365 = vmatpush2.bf16.msra.mxu1 %v3637_v22  ;;  %v3733_v22 = vld [vmem:[#allocation5 + $0x7a4] ss:$8 sps:$4 sm:$0xff]  }
 0x10e   :  { %2316 = vmatmul.mubr.bf16.vlgmr.msra.gmra.mxu0 %v3640_v25  ;;  %2436 = vmatprep.subr.bf16.mxu1 %v3651_v27  ;;  %v3736_v25 = vld [vmem:[#allocation5 + $0x694] ss:$8 sps:$4 sm:$0xff]  }
 0x10f   :  { %2386 = vmatpush1.bf16.msra.mxu0 %v3643_v26  ;;  %2325 = vmatprep.mubr.bf16.mxu0 %v2979_v30  ;;  %v3731_v26 = vld [vmem:[#allocation5 + $0x7a0] ss:$8 sps:$4 sm:$0xff]   ;;  %v3739_v27 = vld [vmem:[#allocation5 + $0x794] ss:$8 sps:$4 sm:$0xff]   ;;  %v3742_v30 = vld [vmem:[#allocation5 + $0x684] ss:$8 sps:$4 sm:$0xff]  }
 0x110   :  { %2367 = vmatmul.mubr.bf16.vlgmr.msra.gmra.mxu1 %v3646_v29  ;;  %2387 = vmatprep.subr.bf16.mxu0 %v3654_v31  ;;  %v432_v29 = vshrl.u32 %v431_v24, 7  ;;  %v3737_v31 = vld [vmem:[#allocation5 + $0x790] ss:$8 sps:$4 sm:$0xff]  }
 0x111   :  { %2437 = vmatpush1.bf16.msra.mxu1 %v3649_v32  ;;  %2376 = vmatprep.mubr.bf16.mxu1 %v2981_v33  ;;  %v3745_v32 = vld [vmem:[#allocation5 + $0x784] ss:$8 sps:$4 sm:$0xff]   ;;  %v3740_v33 = vld [vmem:[#allocation5 + $0x680] ss:$8 sps:$4 sm:$0xff]  }
 0x112   :  { %2438 = vmatprep.subr.bf16.mxu1 %v3657_v34  ;;  %v4080_v34 = vsub.s32 0, %v432_v29 }
 0x113   :  { %2388 = vmatpush1.bf16.msra.mxu0 %v3652_v35  ;;  %v429_v35 = vld [vmem:[#allocation7] sm:$0x3] }
 0x114   :  { %2389 = vmatprep.subr.bf16.mxu0 %v3662_v36  ;;  %v3751_v36 = vld [vmem:[#allocation5 + $0x874] ss:$8 sps:$4 sm:$0xff]  }
 0x115   :  { %2439 = vmatpush1.bf16.msra.mxu1 %v3655_v37  ;;  %v131_v37 = vld [vmem:[#allocation3 + $0xc8] sm:$0xff] }
 0x116   :  { %2326 = vmatmul.mubr.bf16.gmra.mxu0 %v2978_v38  ;;  %2440 = vmatprep.subr.bf16.mxu1 %v3667_v40  ;;  %v3743_v38 = vld [vmem:[#allocation5 + $0x780] ss:$8 sps:$4 sm:$0xff]   ;;  %v3746_v40 = vld [vmem:[#allocation3 + $0x30] ss:$76 sps:$4 sm:$0xff]  }
 0x117   :  { %2390 = vmatpush1.bf16.msra.mxu0 %v3660_v39  ;;  %2417 = vmatprep.mubr.bf16.mxu0 %v3748_v41  ;;  %v4082_v39 = vsub.s32 1, %v432_v29  ;;  %v132_v41 = vld [vmem:[#allocation3 + $0xd0] sm:$0xff] }
 0x118   :  { %2377 = vmatmul.mubr.bf16.gmra.mxu1 %v2980_v42  ;;  %2391 = vmatprep.subr.bf16.mxu0 %v3670_v43  ;;  %v3797_v42 = vld [vmem:[#allocation5 + $0x924] ss:$8 sps:$4 sm:$0xff]   ;;  %v4085_v43 = vrot.slane %v429_v35, %v4080_v34 }
 0x119   :  { %2441 = vmatpush1.bf16.msra.mxu1 %v3665_v44  ;;  %2468 = vmatprep.mubr.bf16.mxu1 %v3754_v45  ;;  %v3749_v44 = vld [vmem:[#allocation5 + $0x870] ss:$8 sps:$4 sm:$0xff]   ;;  %v2983_v45 = vcombine.high %v131_v37, %v131_v37  ;;  %v3779_v29 = vld [vmem:[#allocation5 + $0x804] ss:$8 sps:$4 sm:$0xff]  }
 0x11a   :  { %2442 = vmatprep.subr.bf16.mxu1 %v3673_v46  ;;  %v3752_v46 = vld [vmem:[#allocation3 + $0x38] ss:$76 sps:$4 sm:$0xff]  }
 0x11b   :  { %2392 = vmatpush1.bf16.msra.mxu0 %v3668_v47  ;;  %v3757_v47 = vld [vmem:[#allocation5 + $0x864] ss:$8 sps:$4 sm:$0xff]  }
 0x11c   :  { %2393 = vmatprep.subr.bf16.mxu0 %v3676_v48  ;;  %v4088_v48 = vrot.slane %v429_v35, %v4082_v39 }
 0x11d   :  { %2443 = vmatpush1.bf16.msra.mxu1 %v3671_v49  ;;  %v2985_v49 = vcombine.high %v132_v41, %v132_v41 }
 0x11e   :  { %2444 = vmatprep.subr.bf16.mxu1 %v3679_v50  ;;  %v3795_v50 = vld [vmem:[#allocation5 + $0x920] ss:$8 sps:$4 sm:$0xff]  }
 0x11f   :  { %2394 = vmatpush1.bf16.msra.mxu0 %v3674_v51 }
 0x120   :  { %2395 = vmatprep.subr.bf16.mxu0 %v3682_v52  ;;  %v3803_v52 = vld [vmem:[#allocation5 + $0x914] ss:$8 sps:$4 sm:$0xff]  }
 0x121   :  { %2445 = vmatpush1.bf16.msra.mxu1 %v3677_v53 }
 0x122   :  { %2446 = vmatprep.subr.bf16.mxu1 %v3685_v54  ;;  %v3755_v54 = vld [vmem:[#allocation5 + $0x860] ss:$8 sps:$4 sm:$0xff]  }
 0x123   :  { %2396 = vmatpush1.bf16.msra.mxu0 %v3680_v55 }
 0x124   :  { %2397 = vmatprep.subr.bf16.mxu0 %v3688_v57  ;;  %v3762_v57 = vld [vmem:[#allocation5 + $0x854] ss:$8 sps:$4 sm:$0xff]  }
 0x125   :  { %2447 = vmatpush1.bf16.msra.mxu1 %v3683_v56 }
 0x126   :  { %2448 = vmatprep.subr.bf16.mxu1 %v3691_v58 }
 0x127   :  { %2398 = vmatpush1.bf16.msra.mxu0 %v3686_v59 }
 0x128   :  { %2399 = vmatprep.subr.bf16.mxu0 %v3694_v60  ;;  %v3801_v60 = vld [vmem:[#allocation5 + $0x910] ss:$8 sps:$4 sm:$0xff]  }
 0x129   :  { %2449 = vmatpush1.bf16.msra.mxu1 %v3689_v61 }
 0x12a   :  { %2450 = vmatprep.subr.bf16.mxu1 %v3697_v62 }
 0x12b   :  { %2400 = vmatpush1.bf16.msra.mxu0 %v3692_v63  ;;  %v2982_v63 = vcombine.low %v131_v37, %v131_v37 }
 0x12c   :  { %2401 = vmatprep.subr.bf16.mxu0 %v3700_v0  ;;  %v3809_v0 = vld [vmem:[#allocation5 + $0x904] ss:$8 sps:$4 sm:$0xff]  }
 0x12d   :  { %2451 = vmatpush1.bf16.msra.mxu1 %v3695_v1 }
 0x12e   :  { %2452 = vmatprep.subr.bf16.mxu1 %v3703_v2 }
 0x12f   :  { %2402 = vmatpush2.bf16.msra.mxu0 %v3698_v3  ;;  %v3760_v3 = vld [vmem:[#allocation5 + $0x850] ss:$8 sps:$4 sm:$0xff]  }
 0x130   :  { %2403 = vmatprep.subr.bf16.mxu0 %v3706_v4  ;;  %v3816_v4 = vld [vmem:[#allocation3 + $0x44] ss:$76 sps:$4 sm:$0xff]  }
 0x131   :  { %2453 = vmatpush2.bf16.msra.mxu1 %v3701_v5 }
 0x132   :  { %2454 = vmatprep.subr.bf16.mxu1 %v3709_v6 }
 0x133   :  { %2404 = vmatpush2.bf16.msra.mxu0 %v3704_v7  ;;  %v2984_v7 = vcombine.low %v132_v41, %v132_v41  ;;  %v3780_v41 = vld [vmem:[#allocation5 + $0x8f0] ss:$8 sps:$4 sm:$0xff]  }
 0x134   :  { %2405 = vmatprep.subr.bf16.mxu0 %v3712_v8  ;;  %v3767_v8 = vld [vmem:[#allocation5 + $0x844] ss:$8 sps:$4 sm:$0xff]  }
 0x135   :  { %2455 = vmatpush2.bf16.msra.mxu1 %v3707_v9 }
 0x136   :  { %2456 = vmatprep.subr.bf16.mxu1 %v3715_v10 }
 0x137   :  { %2406 = vmatpush2.bf16.msra.mxu0 %v3710_v11  ;;  %v3807_v11 = vld [vmem:[#allocation5 + $0x900] ss:$8 sps:$4 sm:$0xff]  }
 0x138   :  { %2407 = vmatprep.subr.bf16.mxu0 %v3718_v12 }
 0x139   :  { %2457 = vmatpush2.bf16.msra.mxu1 %v3713_v13 }
 0x13a   :  { %2458 = vmatprep.subr.bf16.mxu1 %v3721_v14  ;;  %v3765_v14 = vld [vmem:[#allocation5 + $0x840] ss:$8 sps:$4 sm:$0xff]  }
 0x13b   :  { %2408 = vmatpush2.bf16.msra.mxu0 %v3716_v15  ;;  %v3770_v15 = vld [vmem:[#allocation5 + $0x834] ss:$8 sps:$4 sm:$0xff]  }
 0x13c   :  { %2409 = vmatprep.subr.bf16.mxu0 %v3724_v16  ;;  %v4018_v16 = vmov 0  }
 0x13d   :  { %2459 = vmatpush2.bf16.msra.mxu1 %v3719_v17  ;;  %v3768_v17 = vld [vmem:[#allocation5 + $0x830] ss:$8 sps:$4 sm:$0xff]  }
 0x13e   :  { %2460 = vmatprep.subr.bf16.mxu1 %v3727_v18  ;;  %v3773_v18 = vld [vmem:[#allocation5 + $0x824] ss:$8 sps:$4 sm:$0xff]  }
 0x13f   :  { %2410 = vmatpush2.bf16.msra.mxu0 %v3722_v19  ;;  %v3813_v19 = vld [vmem:[#allocation3 + $0x48] ss:$76 sps:$4 sm:$0xff]  }
 0x140   :  { %2411 = vmatprep.subr.bf16.mxu0 %v3730_v20 }
 0x141   :  { %2461 = vmatpush2.bf16.msra.mxu1 %v3725_v21  ;;  %v3771_v21 = vld [vmem:[#allocation5 + $0x820] ss:$8 sps:$4 sm:$0xff]  }
 0x142   :  { %2462 = vmatprep.subr.bf16.mxu1 %v3733_v22  ;;  %v3776_v22 = vld [vmem:[#allocation5 + $0x814] ss:$8 sps:$4 sm:$0xff]  }
 0x143   :  { %2412 = vmatpush2.bf16.msra.mxu0 %v3728_v23 }
 0x144   :  { %2413 = vmatprep.subr.bf16.mxu0 %v3736_v25 }
 0x145   :  { %2463 = vmatpush2.bf16.msra.mxu1 %v3731_v26 }
 0x146   :  { %2464 = vmatprep.subr.bf16.mxu1 %v3739_v27  ;;  %v3774_v27 = vld [vmem:[#allocation5 + $0x810] ss:$8 sps:$4 sm:$0xff]  }
 0x147   :  { %2414 = vmatpush2.bf16.msra.mxu0 %v3734_v28 }
 0x148   :  { %2415 = vmatprep.subr.bf16.mxu0 %v3742_v30 }
 0x149   :  { %2465 = vmatpush2.bf16.msra.mxu1 %v3737_v31 }
 0x14a   :  { %2466 = vmatprep.subr.bf16.mxu1 %v3745_v32  ;;  %v3819_v32 = vld [vmem:[#allocation3 + $0xe0] ss:$0 sps:$4 sm:$0xff]  }
 0x14b   :  { %2416 = vmatpush2.bf16.msra.mxu0 %v3740_v33 }
 0x14c   :  { %2487 = vmatprep.subr.bf16.mxu0 %v3751_v36  ;;  %v3777_v36 = vld [vmem:[#allocation5 + $0x800] ss:$8 sps:$4 sm:$0xff]  }
 0x14d   :  { %2467 = vmatpush2.bf16.msra.mxu1 %v3743_v38  ;;  %v3782_v38 = vld [vmem:[#allocation5 + $0x8f4] ss:$8 sps:$4 sm:$0xff]  }
 0x14e   :  { %v2113_v51 = vpop.f32.mrf.mxu0  ;;  %2418 = vmatmul.mubr.bf16.vlgmr.msra.gmra.mxu0 %v3746_v40  ;;  %2548 = vmatprep.subr.bf16.mxu1 %v3797_v42  ;;  %v3785_v42 = vld [vmem:[#allocation5 + $0x8e4] ss:$8 sps:$4 sm:$0xff]  }
 0x14f   :  { %v2114_v53 = vadd.f32 %v2113_v51, %v4085_v43  ;;  %2488 = vmatpush1.bf16.msra.mxu0 %v3749_v44  ;;  %2427 = vmatprep.mubr.bf16.mxu0 %v2983_v45  ;;  %v2164_v56 = vpop.f32.mrf.mxu1  ;;  %v3788_v44 = vld [vmem:[#allocation5 + $0x8d4] ss:$8 sps:$4 sm:$0xff]   ;;  %v3786_v45 = vld [vmem:[#allocation5 + $0x8d0] ss:$8 sps:$4 sm:$0xff]   ;;  %v3798_v51 = vld [vmem:[#allocation5 + $0x8a0] ss:$8 sps:$4 sm:$0xff]  }
 0x150   :  { %v2115_v55 = vpop.f32.mrf.mxu0  ;;  %2469 = vmatmul.mubr.bf16.vlgmr.msra.gmra.mxu1 %v3752_v46  ;;  %2489 = vmatprep.subr.bf16.mxu0 %v3757_v47  ;;  %v3791_v46 = vld [vmem:[#allocation5 + $0x8c4] ss:$8 sps:$4 sm:$0xff]   ;;  %v3789_v47 = vld [vmem:[#allocation5 + $0x8c0] ss:$8 sps:$4 sm:$0xff]  }
 0x151   :  { %v2116_v58 = vadd.f32 %v2115_v55, %v4088_v48  ;;  %v4092_v59 = vadd.f32 %v2164_v56, %v2114_v53  ;;  %2478 = vmatprep.mubr.bf16.mxu1 %v2985_v49  ;;  %2549 = vmatpush1.bf16.msra.mxu1 %v3795_v50  ;;  %v2166_v62 = vpop.f32.mrf.mxu1  ;;  %v3792_v49 = vld [vmem:[#allocation5 + $0x8b0] ss:$8 sps:$4 sm:$0xff]   ;;  %v3800_v50 = vld [vmem:[#allocation5 + $0x8a4] ss:$8 sps:$4 sm:$0xff]   ;;  %v3810_v55 = vld [vmem:[#allocation5 + $0x880] ss:$8 sps:$4 sm:$0xff]  }
 0x152   :  { %v2117_v61 = vpop.f32.mrf.mxu0  ;;  %2550 = vmatprep.subr.bf16.mxu1 %v3803_v52  ;;  %v3806_v52 = vld [vmem:[#allocation5 + $0x894] ss:$8 sps:$4 sm:$0xff]   ;;  %v3804_v53 = vld [vmem:[#allocation5 + $0x890] ss:$8 sps:$4 sm:$0xff]  }
 0x153   :  { %v2118_v1 = vadd.f32 %v2117_v61, %v4085_v43  ;;  %v4095_v2 = vadd.f32 %v2166_v62, %v2116_v58  ;;  %2490 = vmatpush1.bf16.msra.mxu0 %v3755_v54  ;;  %v2168_v6 = vpop.f32.mrf.mxu1  ;;  %v3812_v54 = vld [vmem:[#allocation5 + $0x884] ss:$8 sps:$4 sm:$0xff]   ;;  %v133_v56 = vld [vmem:[#allocation3 + $0xd8] sm:$0xff] }
 0x154   :  { %v2119_v5 = vpop.f32.mrf.mxu0  ;;  %2491 = vmatprep.subr.bf16.mxu0 %v3762_v57  ;;  %v3814_v57 = vld [vmem:[#allocation3 + $0x40] ss:$76 sps:$4 sm:$0xff]   ;;  %v2987_v58 = vcombine.high %v133_v56, %v133_v56 }
 0x155   :  { %v2120_v9 = vadd.f32 %v2119_v5, %v4088_v48  ;;  %v4098_v10 = vadd.f32 %v2168_v6, %v2118_v1  ;;  %2551 = vmatpush1.bf16.msra.mxu1 %v3801_v60  ;;  %v2170_v12 = vpop.f32.mrf.mxu1  ;;  %v2986_v5 = vcombine.low %v133_v56, %v133_v56 }
 0x156   :  { %2428 = vmatmul.mubr.bf16.gmra.mxu0 %v2982_v63  ;;  %2552 = vmatprep.subr.bf16.mxu1 %v3809_v0  ;;  %v2123_v20 = vpop.f32.mrf.mxu0 }
 0x157   :  { %v4100_v13 = vadd.f32 %v2170_v12, %v2120_v9  ;;  %2492 = vmatpush1.bf16.msra.mxu0 %v3760_v3  ;;  %2519 = vmatprep.mubr.bf16.mxu0 %v3816_v4  ;;  %v2124_v23 = vadd.f32 %v2123_v20, %v4085_v43  ;;  %v2174_v28 = vpop.f32.mrf.mxu1  ;;  %v3783_v43 = vld [vmem:[#allocation5 + $0x8e0] ss:$8 sps:$4 sm:$0xff]  }
 0x158   :  { %2479 = vmatmul.mubr.bf16.gmra.mxu1 %v2984_v7  ;;  %2493 = vmatprep.subr.bf16.mxu0 %v3767_v8  ;;  %v2125_v24 = vpop.f32.mrf.mxu0 }
 0x159   :  { %2553 = vmatpush1.bf16.msra.mxu1 %v3807_v11  ;;  %2570 = vmatprep.mubr.bf16.mxu1 %v4018_v16  ;;  %v2126_v25 = vadd.f32 %v2125_v24, %v4088_v48  ;;  %v4105_v31 = vadd.f32 %v2174_v28, %v2124_v23  ;;  %v2176_v33 = vpop.f32.mrf.mxu1  ;;  %v3794_v48 = vld [vmem:[#allocation5 + $0x8b4] ss:$8 sps:$4 sm:$0xff]   ;;  %v3828_v28 = vld [vmem:[#allocation8 + $0x54] ss:$8 sps:$4 sm:$0xff]  }
 0x15a   :  { %v2127_v26 = vpop.f32.mrf.mxu0 }
 0x15b   :  { %2494 = vmatpush1.bf16.msra.mxu0 %v3765_v14  ;;  %v4107_v35 = vadd.f32 %v2176_v33, %v2126_v25  ;;  %v2178_v37 = vpop.f32.mrf.mxu1  ;;  %v3825_v25 = vld [vmem:[#allocation8 + $0x64] ss:$8 sps:$4 sm:$0xff]   ;;  %v3832_v33 = vld [vmem:[#allocation8 + $0x30] ss:$8 sps:$4 sm:$0xff]  }
 0x15c   :  { %2495 = vmatprep.subr.bf16.mxu0 %v3770_v15  ;;  %v2128_v30 = vpop.f32.mrf.mxu0  ;;  %v3840_v37 = vld [vmem:[#allocation8 + $0x14] ss:$8 sps:$4 sm:$0xff]  }
 0x15d   :  { %v2179_v40 = vpop.f32.mrf.mxu1  ;;  %v3831_v30 = vld [vmem:[#allocation8 + $0x44] ss:$8 sps:$4 sm:$0xff]  }
 0x15e   :  { %v3843_v40 = vld [vmem:[#allocation8 + $0x4] ss:$8 sps:$4 sm:$0xff]  }
 0x15f   :  { %2496 = vmatpush1.bf16.msra.mxu0 %v3768_v17 }
 0x160   :  { %2497 = vmatprep.subr.bf16.mxu0 %v3773_v18  ;;  %3283 = vmatmul.mubr.msk.bf16.vlgmr.msra.gmra.mxu1 %vm2072_vm0, %v3813_v19 }
 0x161   :  { %2580 = vmatprep.mubr.bf16.mxu1 %v4018_v16 }
 0x163   :  { %2498 = vmatpush1.bf16.msra.mxu0 %v3771_v21 }
 0x164   :  { %2499 = vmatprep.subr.bf16.mxu0 %v3776_v22  ;;  %v3822_v22 = vld [vmem:[#allocation8 + $0x74] ss:$8 sps:$4 sm:$0xff]  }
 0x165   :  { %2815 = vmatprep.subr.bf16.mxu1 %v3822_v22 }
 0x167   :  { %2500 = vmatpush1.bf16.msra.mxu0 %v3774_v27  ;;  %v3823_v27 = vld [vmem:[#allocation8 + $0x60] ss:$8 sps:$4 sm:$0xff]  }
 0x168   :  { %2501 = vmatprep.subr.bf16.mxu0 %v3779_v29  ;;  %3284 = vmatmul.mubr.msk.bf16.gmra.mxu1 %vm2072_vm0, %v3819_v32  ;;  %v3826_v29 = vld [vmem:[#allocation8 + $0x50] ss:$8 sps:$4 sm:$0xff]   ;;  %v3834_v32 = vld [vmem:[#allocation8 + $0x34] ss:$8 sps:$4 sm:$0xff]  }
 0x16b   :  { %2502 = vmatpush1.bf16.msra.mxu0 %v3777_v36  ;;  %v3835_v36 = vld [vmem:[#allocation8 + $0x20] ss:$8 sps:$4 sm:$0xff]  }
 0x16c   :  { %2503 = vmatprep.subr.bf16.mxu0 %v3782_v38  ;;  %v3838_v38 = vld [vmem:[#allocation8 + $0x10] ss:$8 sps:$4 sm:$0xff]  }
 0x16f   :  { %2504 = vmatpush2.bf16.msra.mxu0 %v3780_v41  ;;  %v3841_v41 = vld [vmem:[#allocation8] ss:$8 sps:$4 sm:$0xff]  }
 0x170   :  { %2505 = vmatprep.subr.bf16.mxu0 %v3785_v42  ;;  %v3846_v42 = vld [vmem:[#allocation8 + $0xf4] ss:$8 sps:$4 sm:$0xff]  }
 0x173   :  { %2506 = vmatpush2.bf16.msra.mxu0 %v3783_v43  ;;  %v3844_v43 = vld [vmem:[#allocation8 + $0xf0] ss:$8 sps:$4 sm:$0xff]  }
 0x174   :  { %2507 = vmatprep.subr.bf16.mxu0 %v3788_v44  ;;  %v3849_v44 = vld [vmem:[#allocation8 + $0xe4] ss:$8 sps:$4 sm:$0xff]  }
 0x177   :  { %2508 = vmatpush2.bf16.msra.mxu0 %v3786_v45  ;;  %v3847_v45 = vld [vmem:[#allocation8 + $0xe0] ss:$8 sps:$4 sm:$0xff]  }
 0x178   :  { %2509 = vmatprep.subr.bf16.mxu0 %v3791_v46  ;;  %v3852_v46 = vld [vmem:[#allocation8 + $0xd4] ss:$8 sps:$4 sm:$0xff]  }
 0x17b   :  { %2510 = vmatpush2.bf16.msra.mxu0 %v3789_v47  ;;  %v3850_v47 = vld [vmem:[#allocation8 + $0xd0] ss:$8 sps:$4 sm:$0xff]  }
 0x17c   :  { %2511 = vmatprep.subr.bf16.mxu0 %v3794_v48  ;;  %v3855_v48 = vld [vmem:[#allocation8 + $0xc4] ss:$8 sps:$4 sm:$0xff]  }
 0x17f   :  { %2512 = vmatpush2.bf16.msra.mxu0 %v3792_v49  ;;  %v3853_v49 = vld [vmem:[#allocation8 + $0xc0] ss:$8 sps:$4 sm:$0xff]  }
 0x180   :  { %2513 = vmatprep.subr.bf16.mxu0 %v3800_v50  ;;  %v3858_v50 = vld [vmem:[#allocation8 + $0xb4] ss:$8 sps:$4 sm:$0xff]  }
 0x183   :  { %2514 = vmatpush2.bf16.msra.mxu0 %v3798_v51 }
 0x184   :  { %2515 = vmatprep.subr.bf16.mxu0 %v3806_v52  ;;  %v3856_v52 = vld [vmem:[#allocation8 + $0xb0] ss:$8 sps:$4 sm:$0xff]  }
 0x187   :  { %2516 = vmatpush2.bf16.msra.mxu0 %v3804_v53 }
 0x188   :  { %2517 = vmatprep.subr.bf16.mxu0 %v3812_v54 }
 0x18b   :  { %2518 = vmatpush2.bf16.msra.mxu0 %v3810_v55 }
 0x18e   :  { %v2215_v60 = vpop.f32.mrf.mxu0  ;;  %2520 = vmatmul.mubr.bf16.vlgmr.msra.gmra.mxu0 %v3814_v57 }
 0x18f   :  { %v2216_v61 = vadd.f32 %v2215_v60, %v4092_v59  ;;  %2529 = vmatprep.mubr.bf16.mxu0 %v2987_v58  ;;  %v3861_v58 = vld [vmem:[#allocation8 + $0xa4] ss:$8 sps:$4 sm:$0xff]  }
 0x190   :  { %v2217_v62 = vpop.f32.mrf.mxu0  ;;  %v2266_v63 = vpop.f32.mrf.mxu1 }
 0x191   :  { %v2218_v0 = vadd.f32 %v2217_v62, %v4095_v2  ;;  %v4112_v1 = vadd.f32 %v2266_v63, %v2216_v61  ;;  %v3859_v62 = vld [vmem:[#allocation8 + $0xa0] ss:$8 sps:$4 sm:$0xff]  }
 0x192   :  { %v2219_v3 = vpop.f32.mrf.mxu0  ;;  %v2268_v4 = vpop.f32.mrf.mxu1 }
 0x193   :  { %v2220_v6 = vadd.f32 %v2219_v3, %v4098_v10  ;;  %v4115_v7 = vadd.f32 %v2268_v4, %v2218_v0 }
 0x194   :  { %v2221_v8 = vpop.f32.mrf.mxu0  ;;  %v2270_v9 = vpop.f32.mrf.mxu1 }
 0x195   :  { %v2222_v11 = vadd.f32 %v2221_v8, %v4100_v13  ;;  %v4118_v12 = vadd.f32 %v2270_v9, %v2220_v6  ;;  %v3820_v13 = vld [vmem:[#allocation8 + $0x70] ss:$8 sps:$4 sm:$0xff]   ;;  %v3864_v9 = vld [vmem:[#allocation8 + $0x94] ss:$8 sps:$4 sm:$0xff]  }
 0x196   :  { %v2225_v59 = vpop.f32.mrf.mxu0  ;;  %v2272_v14 = vpop.f32.mrf.mxu1  ;;  %2530 = vmatmul.mubr.bf16.gmra.mxu0 %v2986_v5  ;;  %2816 = vmatpush1.bf16.msra.mxu1 %v3820_v13 }
 0x197   :  { %v2226_v2 = vadd.f32 %v2225_v59, %v4105_v31  ;;  %v4121_v15 = vadd.f32 %v2272_v14, %v2222_v11  ;;  %2817 = vmatprep.subr.bf16.mxu1 %v3825_v25  ;;  %v3829_v31 = vld [vmem:[#allocation8 + $0x40] ss:$8 sps:$4 sm:$0xff]   ;;  %v3862_v59 = vld [vmem:[#allocation8 + $0x90] ss:$8 sps:$4 sm:$0xff]  }
 0x198   :  { %v2227_v16 = vpop.f32.mrf.mxu0  ;;  %v2276_v17 = vpop.f32.mrf.mxu1 }
 0x199   :  { %v2228_v18 = vadd.f32 %v2227_v16, %v4107_v35  ;;  %v4124_v10 = vadd.f32 %v2276_v17, %v2226_v2  ;;  %v3837_v35 = vld [vmem:[#allocation8 + $0x24] ss:$8 sps:$4 sm:$0xff]  }
 0x19a   :  { %v2278_v19 = vpop.f32.mrf.mxu1  ;;  %v2229_v20 = vpop.f32.mrf.mxu0  ;;  %2818 = vmatpush1.bf16.msra.mxu1 %v3823_v27 }
 0x19b   :  { %v4126_v21 = vadd.f32 %v2278_v19, %v2228_v18  ;;  %2819 = vmatprep.subr.bf16.mxu1 %v3828_v28  ;;  %v3867_v19 = vld [vmem:[#allocation8 + $0x84] ss:$8 sps:$4 sm:$0xff]  }
 0x19c   :  { %v2230_v23 = vpop.f32.mrf.mxu0  ;;  %v2280_v24 = vpop.f32.mrf.mxu1 }
 0x19e   :  { %v2281_v26 = vpop.f32.mrf.mxu1  ;;  %2820 = vmatpush1.bf16.msra.mxu1 %v3826_v29 }
 0x19f   :  { %2821 = vmatprep.subr.bf16.mxu1 %v3831_v30 }
 0x1a2   :  { %2822 = vmatpush1.bf16.msra.mxu1 %v3829_v31 }
 0x1a3   :  { %2823 = vmatprep.subr.bf16.mxu1 %v3834_v32 }
 0x1a6   :  { %2824 = vmatpush1.bf16.msra.mxu1 %v3832_v33 }
 0x1a7   :  { %2825 = vmatprep.subr.bf16.mxu1 %v3837_v35 }
 0x1aa   :  { %2826 = vmatpush1.bf16.msra.mxu1 %v3835_v36 }
 0x1ab   :  { %2827 = vmatprep.subr.bf16.mxu1 %v3840_v37 }
 0x1ae   :  { %2828 = vmatpush1.bf16.msra.mxu1 %v3838_v38 }
 0x1af   :  { %2829 = vmatprep.subr.bf16.mxu1 %v3843_v40 }
 0x1b2   :  { %2830 = vmatpush1.bf16.msra.mxu1 %v3841_v41 }
 0x1b3   :  { %2831 = vmatprep.subr.bf16.mxu1 %v3846_v42 }
 0x1b6   :  { %2832 = vmatpush2.bf16.msra.mxu1 %v3844_v43 }
 0x1b7   :  { %2833 = vmatprep.subr.bf16.mxu1 %v3849_v44 }
 0x1ba   :  { %2834 = vmatpush2.bf16.msra.mxu1 %v3847_v45 }
 0x1bb   :  { %2835 = vmatprep.subr.bf16.mxu1 %v3852_v46 }
 0x1be   :  { %2836 = vmatpush2.bf16.msra.mxu1 %v3850_v47 }
 0x1bf   :  { %2837 = vmatprep.subr.bf16.mxu1 %v3855_v48 }
 0x1c2   :  { %2838 = vmatpush2.bf16.msra.mxu1 %v3853_v49 }
 0x1c3   :  { %2839 = vmatprep.subr.bf16.mxu1 %v3858_v50 }
 0x1c6   :  { %2840 = vmatpush2.bf16.msra.mxu1 %v3856_v52 }
 0x1c7   :  { %2841 = vmatprep.subr.bf16.mxu1 %v3861_v58 }
 0x1ca   :  { %2842 = vmatpush2.bf16.msra.mxu1 %v3859_v62 }
 0x1cb   :  { %2843 = vmatprep.subr.bf16.mxu1 %v3864_v9 }
 0x1ce   :  { %v2317_v51 = vpop.f32.mrf.mxu0  ;;  %2844 = vmatpush2.bf16.msra.mxu1 %v3862_v59 }
 0x1cf   :  { %v2318_v53 = vadd.f32 %v2317_v51, %v4112_v1  ;;  %2845 = vmatprep.subr.bf16.mxu1 %v3867_v19 }
 0x1d0   :  { %v2319_v54 = vpop.f32.mrf.mxu0  ;;  %v2368_v55 = vpop.f32.mrf.mxu1 }
 0x1d1   :  { %v2320_v56 = vadd.f32 %v2319_v54, %v4115_v7  ;;  %v2369_v57 = vadd.f32 %v2368_v55, %v2318_v53 }
 0x1d2   :  { %v2321_v60 = vpop.f32.mrf.mxu0  ;;  %v2370_v61 = vpop.f32.mrf.mxu1 }
 0x1d3   :  { %v2322_v63 = vadd.f32 %v2321_v60, %v4118_v12  ;;  %v2371_v0 = vadd.f32 %v2370_v61, %v2320_v56 }
 0x1d4   :  { %v2323_v3 = vpop.f32.mrf.mxu0  ;;  %v2372_v4 = vpop.f32.mrf.mxu1 }
 0x1d5   :  { %v2324_v1 = vadd.f32 %v2323_v3, %v4121_v15  ;;  %v2373_v5 = vadd.f32 %v2372_v4, %v2322_v63  ;;  %v3865_v15 = vld [vmem:[#allocation8 + $0x80] ss:$8 sps:$4 sm:$0xff]  }
 0x1d6   :  { %v2327_v6 = vpop.f32.mrf.mxu0  ;;  %v2374_v8 = vpop.f32.mrf.mxu1  ;;  %2846 = vmatpush2.bf16.msra.mxu1 %v3865_v15 }
 0x1d7   :  { %v2328_v7 = vadd.f32 %v2327_v6, %v4124_v10  ;;  %v2375_v11 = vadd.f32 %v2374_v8, %v2324_v1 }
 0x1d8   :  { %v2329_v14 = vpop.f32.mrf.mxu0  ;;  %v2378_v2 = vpop.f32.mrf.mxu1 }
 0x1d9   :  { %v2330_v12 = vadd.f32 %v2329_v14, %v4126_v21  ;;  %v2379_v16 = vadd.f32 %v2378_v2, %v2328_v7 }
 0x1da   :  { %v2380_v17 = vpop.f32.mrf.mxu1  ;;  %v2331_v18 = vpop.f32.mrf.mxu0 }
 0x1db   :  { %v2381_v20 = vadd.f32 %v2380_v17, %v2330_v12 }
 0x1dc   :  { %v2332_v13 = vpop.f32.mrf.mxu0  ;;  %v2382_v22 = vpop.f32.mrf.mxu1 }
 0x1de   :  { %v2383_v23 = vpop.f32.mrf.mxu1 }
 0x20e   :  { %v2419_v10 = vpop.f32.mrf.mxu0 }
 0x20f   :  { %v2420_v24 = vadd.f32 %v2419_v10, %v2369_v57 }
 0x210   :  { %v2421_v25 = vpop.f32.mrf.mxu0  ;;  %v2470_v26 = vpop.f32.mrf.mxu1 }
 0x211   :  { %v2422_v27 = vadd.f32 %v2421_v25, %v2371_v0  ;;  %v2471_v28 = vadd.f32 %v2470_v26, %v2420_v24 }
 0x212   :  { %v2423_v29 = vpop.f32.mrf.mxu0  ;;  %v2472_v21 = vpop.f32.mrf.mxu1 }
 0x213   :  { %v2424_v30 = vadd.f32 %v2423_v29, %v2373_v5  ;;  %v2473_v31 = vadd.f32 %v2472_v21, %v2422_v27 }
 0x214   :  { %v2425_v32 = vpop.f32.mrf.mxu0  ;;  %v2474_v33 = vpop.f32.mrf.mxu1 }
 0x215   :  { %v2475_v35 = vadd.f32 %v2474_v33, %v2424_v30  ;;  %v2426_v58 = vadd.f32 %v2425_v32, %v2375_v11  ;;  %v2643_v32 = vld [vmem:[#allocation10] sm:$0x3] }
 0x216   :  { %v2429_v36 = vpop.f32.mrf.mxu0  ;;  %v2476_v37 = vpop.f32.mrf.mxu1  ;;  %v2648_v33 = vrot.slane %v2643_v32, %v4080_v34 }
 0x217   :  { %v2430_v38 = vadd.f32 %v2429_v36, %v2379_v16  ;;  %v2477_v4 = vadd.f32 %v2476_v37, %v2426_v58 }
 0x218   :  { %v2431_v40 = vpop.f32.mrf.mxu0  ;;  %v2480_v41 = vpop.f32.mrf.mxu1 }
 0x219   :  { %v2481_v42 = vadd.f32 %v2480_v41, %v2430_v38  ;;  %v2432_v0 = vadd.f32 %v2431_v40, %v2381_v20  ;;  %v2884_v38 = vld [vmem:[#allocation11] sm:$0x3] }
 0x21a   :  { %v2482_v43 = vpop.f32.mrf.mxu1  ;;  %v2433_v44 = vpop.f32.mrf.mxu0 }
 0x21b   :  { %v2483_v59 = vadd.f32 %v2482_v43, %v2432_v0  ;;  %v2889_v44 = vrot.slane %v2884_v38, %v4080_v34 }
 0x21c   :  { %v2434_v45 = vpop.f32.mrf.mxu0  ;;  %v2484_v46 = vpop.f32.mrf.mxu1 }
 0x21d   :  { %v2893_v45 = vrot.slane %v2884_v38, %v4082_v39 }
 0x21e   :  { %v2485_v47 = vpop.f32.mrf.mxu1 }
 0x220   :  { %v2572_v48 = vpop.f32.mrf.mxu1 }
 0x222   :  { %v2574_v49 = vpop.f32.mrf.mxu1 }
 0x224   :  { %v2576_v50 = vpop.f32.mrf.mxu1 }
 0x226   :  { %v2578_v51 = vpop.f32.mrf.mxu1 }
 0x228   :  { %v2582_v52 = vpop.f32.mrf.mxu1 }
 0x22a   :  { %v2584_v53 = vpop.f32.mrf.mxu1 }
 0x22c   :  { %v2586_v54 = vpop.f32.mrf.mxu1 }
 0x22e   :  { %v2587_v55 = vpop.f32.mrf.mxu1 }
 0x24e   :  { %v2521_v56 = vpop.f32.mrf.mxu0 }
 0x24f   :  { %v2522_v57 = vadd.f32 %v2521_v56, %v2471_v28 }
 0x250   :  { %v2523_v60 = vpop.f32.mrf.mxu0 }
 0x251   :  { %v2573_v61 = vadd.f32 %v2572_v48, %v2522_v57  ;;  %v2524_v62 = vadd.f32 %v2523_v60, %v2473_v31 }
 0x252   :  { %v2525_v63 = vpop.f32.mrf.mxu0 }
 0x253   :  { %v2526_v3 = vadd.f32 %v2525_v63, %v2475_v35  ;;  %v2575_v1 = vadd.f32 %v2574_v49, %v2524_v62  ;;  %v2595_v6 = vmul.f32 0.02, %v2573_v61  ;;  %vm2589_vm1 = vcmp.gt.f32.partialorder %v2573_v61, 0.0 }
 0x254   :  { %v2527_v5 = vpop.f32.mrf.mxu0  ;;  %v2652_v35 = vrot.slane %v2643_v32, %v4082_v39 }
 0x255   :  { %v2577_v8 = vadd.f32 %v2576_v50, %v2526_v3  ;;  %v2528_v9 = vadd.f32 %v2527_v5, %v2477_v4  ;;  %v2596_v12 = vmul.f32 0.02, %v2575_v1  ;;  %v2601_v17 = vsel %vm2589_vm1, %v2573_v61, %v2595_v6 }
 0x256   :  { %v2531_v7 = vpop.f32.mrf.mxu0  ;;  %vm2590_vm3 = vcmp.gt.f32.partialorder %v2575_v1, 0.0 }
 0x257   :  { %vm2591_vm2 = vcmp.gt.f32.partialorder %v2577_v8, 0.0  ;;  %v2597_v14 = vmul.f32 0.02, %v2577_v8  ;;  %v2532_v2 = vadd.f32 %v2531_v7, %v2481_v42  ;;  %v2579_v11 = vadd.f32 %v2578_v51, %v2528_v9 }
 0x258   :  { %v2533_v16 = vpop.f32.mrf.mxu0  ;;  %v2602_v24 = vsel %vm2590_vm3, %v2575_v1, %v2596_v12 }
 0x259   :  { %v2603_v18 = vsel %vm2591_vm2, %v2577_v8, %v2597_v14  ;;  %v2534_v19 = vadd.f32 %v2533_v16, %v2483_v59  ;;  %vm2592_vm4 = vcmp.gt.f32.partialorder %v2579_v11, 0.0  ;;  %v2598_v15 = vmul.f32 0.02, %v2579_v11  ;;  %v3317_v14 = vld [vmem:[#allocation2] ss:$0 sm:$0xff] }
 0x25a   :  { %v2607_v20 = vpack.c.bf16 %v2603_v18, %v2601_v17  ;;  %v2535_v13 = vpop.f32.mrf.mxu0  ;;  %v2583_v22 = vadd.f32 %v2582_v52, %v2532_v2 }
 0x25b   :  { %v2585_v23 = vadd.f32 %v2584_v53, %v2534_v19  ;;  %v2604_v25 = vsel %vm2592_vm4, %v2579_v11, %v2598_v15 }
 0x25c   :  { %v2536_v10 = vpop.f32.mrf.mxu0  ;;  %v2608_v27 = vpack.c.bf16 %v2604_v25, %v2602_v24  ;;  %v2599_v28 = vmul.f32 0.02, %v2583_v22  ;;  %vm2593_vm6 = vcmp.gt.f32.partialorder %v2583_v22, 0.0 }
 0x25d   :  { %vm2594_vm5 = vcmp.gt.f32.partialorder %v2585_v23, 0.0  ;;  %v2600_v26 = vmul.f32 0.02, %v2585_v23 }
 0x25e   :  { %2847 = vmatprep.mubr.bf16.mxu1 %v2608_v27  ;;  %v2605_v30 = vsel %vm2593_vm6, %v2583_v22, %v2599_v28 }
 0x25f   :  { %v2606_v29 = vsel %vm2594_vm5, %v2585_v23, %v2600_v26  ;;  %2848 = vmatmul.mubr.bf16.vlgmr.msra.gmra.mxu1 %v2607_v20  ;;  %v2609_v31 = vpack.c.bf16 %v2605_v30, %v2605_v30 }
 0x260   :  { %v2610_v21 = vpack.c.bf16 %v2606_v29, %v2606_v29 }
 0x262   :  { %2857 = vmatprep.mubr.bf16.mxu1 %v2610_v21 }
 0x267   :  { %2858 = vmatmul.mubr.bf16.gmra.mxu1 %v2609_v31 }
 0x31f   :  { %v2849_v36 = vpop.f32.mrf.mxu1 }
 0x320   :  { %v2850_v37 = vadd.f32 %v2849_v36, %v2648_v33 }
 0x321   :  { %v2851_v40 = vpop.f32.mrf.mxu1 }
 0x322   :  { %vm2866_vm7 = vcmp.gt.f32.partialorder %v2850_v37, 0.0  ;;  %v2872_v41 = vmul.f32 0.02, %v2850_v37  ;;  %v2852_v42 = vadd.f32 %v2851_v40, %v2652_v35 }
 0x323   :  { %v2853_v43 = vpop.f32.mrf.mxu1 }
 0x324   :  { %vm2867_vm8 = vcmp.gt.f32.partialorder %v2852_v42, 0.0  ;;  %v2873_v46 = vmul.f32 0.02, %v2852_v42  ;;  %v2854_v47 = vadd.f32 %v2853_v43, %v2648_v33  ;;  %v2878_v48 = vsel %vm2866_vm7, %v2850_v37, %v2872_v41 }
 0x325   :  { %v2855_v49 = vpop.f32.mrf.mxu1  ;;  %v2896_v54 = vmul.f32 %v2889_v44, %v2878_v48 }
 0x326   :  { %vm2868_vm9 = vcmp.gt.f32.partialorder %v2854_v47, 0.0  ;;  %v2874_v50 = vmul.f32 0.02, %v2854_v47  ;;  %v2856_v51 = vadd.f32 %v2855_v49, %v2652_v35  ;;  %v2879_v52 = vsel %vm2867_vm8, %v2852_v42, %v2873_v46 }
 0x327   :  { %v2859_v53 = vpop.f32.mrf.mxu1  ;;  %v2897_v55 = vmul.f32 %v2893_v45, %v2879_v52 }
 0x328   :  { %vm2869_vm10 = vcmp.gt.f32.partialorder %v2856_v51, 0.0  ;;  %v2875_v56 = vmul.f32 0.02, %v2856_v51  ;;  %v2860_v57 = vadd.f32 %v2859_v53, %v2648_v33  ;;  %v2880_v58 = vsel %vm2868_vm9, %v2854_v47, %v2874_v50 }
 0x329   :  { %v2861_v60 = vpop.f32.mrf.mxu1  ;;  %v2902_v34 = vadd.f32 %v2897_v55, %v2896_v54  ;;  %v2898_v0 = vmul.f32 %v2889_v44, %v2880_v58 }
 0x32a   :  { %vm2870_vm11 = vcmp.gt.f32.partialorder %v2860_v57, 0.0  ;;  %v2876_v39 = vmul.f32 0.02, %v2860_v57  ;;  %v2862_v61 = vadd.f32 %v2861_v60, %v2652_v35  ;;  %v2881_v62 = vsel %vm2869_vm10, %v2856_v51, %v2875_v56 }
 0x32b   :  { %v2863_v63 = vpop.f32.mrf.mxu1  ;;  %2903 = vadd.xlane.f32.xlu0 %v2902_v34  ;;  %v2899_v3 = vmul.f32 %v2893_v45, %v2881_v62 }
 0x32c   :  { %vm2871_vm12 = vcmp.gt.f32.partialorder %v2862_v61, 0.0  ;;  %v2877_v4 = vmul.f32 0.02, %v2862_v61  ;;  %v2882_v1 = vsel %vm2870_vm11, %v2860_v57, %v2876_v39 }
 0x32d   :  { %v2864_v5 = vpop.f32.mrf.mxu1  ;;  %v2905_v6 = vadd.f32 %v2899_v3, %v2898_v0  ;;  %v2900_v9 = vmul.f32 %v2889_v44, %v2882_v1 }
 0x32e   :  { %v2883_v8 = vsel %vm2871_vm12, %v2862_v61, %v2877_v4 }
 0x32f   :  { %2906 = vadd.xlane.f32.xlu0 %v2905_v6  ;;  %v2901_v7 = vmul.f32 %v2893_v45, %v2883_v8 }
 0x331   :  { %v2908_v59 = vadd.f32 %v2901_v7, %v2900_v9 }
 0x333   :  { %2909 = vadd.xlane.f32.xlu1 %v2908_v59 }
 0x3b4   :  { %v2904_v2 = vpop.xlane.xlu0 %2903 }
 0x3b5   :  { %v2918_v12 = vadd.f32 %v3317_v14, %v2904_v2 }
 0x3b7   :  { %v3318_v11 = vmul.f32 -1.442695, %v2918_v12 }
 0x3b8   :  { %v2907_v16 = vpop.xlane.xlu0 %2906 }
 0x3b9   :  { %3868 = vpow2.f32 %v3318_v11  ;;  %v2919_v17 = vadd.f32 %v3317_v14, %v2907_v16 }
 0x3bb   :  { %v3319_v18 = vmul.f32 -1.442695, %v2919_v17 }
 0x3bc   :  { %v2910_v19 = vpop.xlane.xlu1 %2909 }
 0x3bd   :  { %3870 = vpow2.f32 %v3319_v18  ;;  %v2920_v20 = vadd.f32 %v3317_v14, %v2910_v19 }
 0x3bf   :  { %v3320_v15 = vmul.f32 -1.442695, %v2920_v20 }
 0x3c1   :  { %3872 = vpow2.f32 %v3320_v15 }
 0x3c6   :  { %v3869_v13 = vpop.eup %3868 }
 0x3c7   :  { %v2930_v22 = vadd.f32 1.0, %v3869_v13 }
 0x3c9   :  { %3874 = vrcp.f32 %v2930_v22 }
 0x3ca   :  { %v3871_v23 = vpop.eup %3870 }
 0x3cb   :  { %v2931_v10 = vadd.f32 1.0, %v3871_v23 }
 0x3cd   :  { %3876 = vrcp.f32 %v2931_v10 }
 0x3ce   :  { %v3873_v24 = vpop.eup %3872 }
 0x3cf   :  { %v2932_v25 = vadd.f32 1.0, %v3873_v24 }
 0x3d1   :  { %3878 = vrcp.f32 %v2932_v25 }
 0x3d6   :  { %v3875_v26 = vpop.eup %3874 }
 0x3d7   :  { %2940 = vst.msk [vmem:[%s4154_s7] sm:$0xff] %vm2939_vm13, %v3875_v26 }
 0x3da   :  { %v3877_v27 = vpop.eup %3876 }
 0x3db   :  { %2941 = vst.msk [vmem:[%s4154_s7 + $0x8] sm:$0xff] %vm2939_vm13, %v3877_v27 }
 0x3de   :  { %v3879_v28 = vpop.eup %3878 }
 0x3df   :  { %2942 = vst.msk [vmem:[%s4154_s7 + $0x10] sm:$0xff] %vm2939_vm13, %v3879_v28 }
 0x3e0   :  { %2947 = vsyncpa [#allocation4], 1 }
 0x3e1   :  { %2948 = vsyncpa [#allocation6], 1 }
 0x3e2   :  { %2949 = vsyncpa [#allocation9], 1 }
 0x3e3   :  { %2950 = vsyncpa [#allocation12], 1 }

// kernel: tpu_custom_call.1
= control target key start
LH: loop header
LB: loop body
LE: loop exit
PB: predicated region body
PF: predicated region fallthrough
CT: control target
= control target key end

     0   :  { %s4147_s0 = inlined_call_operand.hbm [shape: bf16[20,2352], index: 0, kind: input, shape index: {}]   ;;  %s4148_s1 = inlined_call_operand.hbm [shape: bf16[2352,256], index: 1, kind: input, shape index: {}]   ;;  %s4149_s2 = inlined_call_operand.hbm [shape: f32[1,256], index: 2, kind: input, shape index: {}]   ;;  %s4150_s3 = inlined_call_operand.hbm [shape: bf16[256,256], index: 3, kind: input, shape index: {}]   ;;  %s4151_s4 = inlined_call_operand.hbm [shape: f32[1,256], index: 4, kind: input, shape index: {}]   ;;  %s4152_s5 = inlined_call_operand.hbm [shape: f32[1,256], index: 5, kind: input, shape index: {}]   ;;  %s4153_s6 = inlined_call_operand.<no memory space> [shape: f32[1,1], index: 6, kind: input, shape index: {}]   ;;  %s4154_s7 = inlined_call_operand.vmem [shape: f32[20,1], index: 7, kind: output, shape index: {}]  }
   0x1   :  { %v12_v0 = vstv %s4153_s6 }
   0x2   :  { %13 = vst [vmem:[#allocation2] sm:$0x1] %v12_v0 }
   0x3   :  { %14 = vsyncpa [#allocation4], 0 }
   0x4   :  { %15 = vsyncpa [#allocation6], 0 }
   0x5   :  { %16 = vsyncpa [#allocation9], 0 }
   0x6   :  { %17 = vsyncpa [#allocation12], 0  ;;  %s4008_s26 = smov [#allocation5]  }
   0x7   :  { %s35_s27 = sshll.u32 %s4008_s26, 4  ;;  %s36_s27 = int_to_ptr.vmem [resolvable:$true] %s35_s27 }
   0x8   :  { %s3888_s28 = scalar_lea.vmem %s36_s27, 37632  ;;  %p3893_p1 = scmp.lt.s32.totalorder %s36_s27, %s36_s27 }
   0x9   :  { %p3889_p0 = scmp.ne.s32.totalorder %s36_s27, %s3888_s28  ;;  %p3894_p2 = scmp.lt.s32.totalorder %s3888_s28, %s3888_s28 }
   0xb   :  { %p3895_p3 = por %p3894_p2, %p3893_p1 }
   0xd   :  { %p3896_p4 = pnand %p3895_p3, %p3889_p0 }
   0xf   :  { %3899 = shalt.err (!%p3896_p4)
}
  0x10   :  { %s4009_s29 = smov 128   ;;  %s4010_s30 = smov 8  }
  0x11   :  { %41 = dma.hbm_to_vmem [thread:$0]  %s4148_s1, 37632, %s36_s27, [#allocation6], %s4009_s29, %s4009_s29, %s4010_s30  }
  0x12   :  { %s4011_s6 = smov [#allocation8]   ;;  %s4012_s11 = smov [#allocation3]  }
  0x13   :  { %s57_s10 = sshll.u32 %s4011_s6, 4  ;;  %s23_s12 = sshll.u32 %s4012_s11, 4  ;;  %s58_s10 = int_to_ptr.vmem [resolvable:$true] %s57_s10  ;;  %s24_s12 = int_to_ptr.vmem [resolvable:$true] %s23_s12 }
  0x14   :  { %s3908_s13 = scalar_lea.vmem %s58_s10, 4096  ;;  %p3913_p6 = scmp.lt.s32.totalorder %s58_s10, %s58_s10 }
  0x15   :  { %p3909_p5 = scmp.ne.s32.totalorder %s58_s10, %s3908_s13  ;;  %p3914_p7 = scmp.lt.s32.totalorder %s3908_s13, %s3908_s13 }
  0x17   :  { %p3915_p8 = por %p3914_p7, %p3913_p6 }
  0x19   :  { %p3916_p9 = pnand %p3915_p8, %p3909_p5 }
  0x1b   :  { %3919 = shalt.err (!%p3916_p9)
}
  0x1c   :  { %63 = dma.hbm_to_vmem [thread:$0]  %s4150_s3, 4096, %s58_s10, [#allocation9], %s4009_s29, %s4009_s29, %s4010_s30  }
  0x1d   :  { %s3928_s16 = scalar_lea.vmem %s24_s12, 3648  ;;  %p3933_p11 = scmp.lt.s32.totalorder %s24_s12, %s24_s12 }
  0x1e   :  { %p3929_p10 = scmp.ne.s32.totalorder %s24_s12, %s3928_s16  ;;  %p3934_p12 = scmp.lt.s32.totalorder %s3928_s16, %s3928_s16 }
  0x20   :  { %p3935_p13 = por %p3934_p12, %p3933_p11 }
  0x22   :  { %p3936_p0 = pnand %p3935_p13, %p3929_p10 }
  0x24   :  { %3939 = shalt.err (!%p3936_p0)
}
  0x25   :  { %s4013_s1 = smov 1216   ;;  %s4014_s17 = smov 76  }
  0x26   :  { %29 = dma.hbm_to_vmem [thread:$0]  %s4147_s0, 3648, %s24_s12, [#allocation4], %s4013_s1, %s4013_s1, %s4014_s17  }
  0x27   :  { %s4015_s20 = smov [#allocation7]   ;;  %s4016_s22 = smov [#allocation10]  }
  0x28   :  { %s48_s21 = sshll.u32 %s4015_s20, 4  ;;  %s70_s23 = sshll.u32 %s4016_s22, 4  ;;  %s49_s21 = int_to_ptr.vmem [resolvable:$true] %s48_s21  ;;  %s71_s23 = int_to_ptr.vmem [resolvable:$true] %s70_s23 }
  0x29   :  { %s3948_s3 = scalar_lea.vmem %s49_s21, 32  ;;  %p3953_p2 = scmp.lt.s32.totalorder %s49_s21, %s49_s21 }
  0x2a   :  { %p3949_p1 = scmp.ne.s32.totalorder %s49_s21, %s3948_s3  ;;  %p3954_p3 = scmp.lt.s32.totalorder %s3948_s3, %s3948_s3 }
  0x2c   :  { %p3955_p4 = por %p3954_p3, %p3953_p2 }
  0x2e   :  { %p3956_p5 = pnand %p3955_p4, %p3949_p1 }
  0x30   :  { %3959 = shalt.err (!%p3956_p5)
}
  0x31   :  { %51 = dma.hbm_to_vmem [thread:$0]  %s4149_s2, 32, %s49_s21, [#allocation6]  }
  0x32   :  { %s3968_s26 = scalar_lea.vmem %s71_s23, 32  ;;  %p3973_p7 = scmp.lt.s32.totalorder %s71_s23, %s71_s23 }
  0x33   :  { %p3969_p6 = scmp.ne.s32.totalorder %s71_s23, %s3968_s26  ;;  %p3974_p8 = scmp.lt.s32.totalorder %s3968_s26, %s3968_s26 }
  0x35   :  { %p3975_p9 = por %p3974_p8, %p3973_p7 }
  0x37   :  { %p3976_p10 = pnand %p3975_p9, %p3969_p6 }
  0x39   :  { %3979 = shalt.err (!%p3976_p10)
}
  0x3a   :  { %73 = dma.hbm_to_vmem [thread:$0]  %s4151_s4, 32, %s71_s23, [#allocation9]  }
  0x3b   :  { %s4017_s28 = smov [#allocation11]  }
  0x3c   :  { %s80_s29 = sshll.u32 %s4017_s28, 4  ;;  %s81_s29 = int_to_ptr.vmem [resolvable:$true] %s80_s29 }
  0x3d   :  { %s3988_s30 = scalar_lea.vmem %s81_s29, 32  ;;  %p3993_p12 = scmp.lt.s32.totalorder %s81_s29, %s81_s29 }
  0x3e   :  { %p3989_p11 = scmp.ne.s32.totalorder %s81_s29, %s3988_s30  ;;  %p3994_p13 = scmp.lt.s32.totalorder %s3988_s30, %s3988_s30 }
  0x40   :  { %p3995_p0 = por %p3994_p13, %p3993_p12 }
  0x42   :  { %p3996_p1 = pnand %p3995_p0, %p3989_p11 }
  0x44   :  { %3999 = shalt.err (!%p3996_p1)
}
  0x45   :  { %83 = dma.hbm_to_vmem [thread:$0]  %s4152_s5, 32, %s81_s29, [#allocation12]  }
  0x46   :  { %4000 = dma.done.wait [#allocation4], 3648  }
  0x47   :  { %4001 = vsyncadd [#allocation4], 4294963648 }
  0x48   :  { %4002 = dma.done.wait [#allocation6], 37664  }
  0x49   :  { %4003 = vsyncadd [#allocation6], 4294929632 }
  0x4a   :  { %4004 = dma.done.wait [#allocation9], 4128  }
  0x4b   :  { %4005 = vsyncadd [#allocation9], 4294963168 }
  0x4c   :  { %4006 = dma.done.wait [#allocation12], 32  }
  0x4d   :  { %4007 = vsyncadd [#allocation12], 4294967264  ;;  %v3332_v1 = vld [vmem:[#allocation5 + $0x74] ss:$8 sps:$4 sm:$0xff]   ;;  %v3334_v2 = vld [vmem:[#allocation5 + $0x70] ss:$8 sps:$4 sm:$0xff]  }
  0x4e   :  { %2079 = vmatprep.subr.bf16.mxu0 %v3332_v1  ;;  %v3335_v3 = vld [vmem:[#allocation5 + $0x174] ss:$8 sps:$4 sm:$0xff]   ;;  %v3337_v4 = vld [vmem:[#allocation5 + $0x170] ss:$8 sps:$4 sm:$0xff]   ;;  %v3338_v5 = vld [vmem:[#allocation5 + $0x64] ss:$8 sps:$4 sm:$0xff]  }
  0x4f   :  { %2080 = vmatpush1.bf16.msra.mxu0 %v3334_v2  ;;  %v3340_v6 = vld [vmem:[#allocation5 + $0x60] ss:$8 sps:$4 sm:$0xff]   ;;  %2130 = vmatprep.subr.bf16.mxu1 %v3335_v3  ;;  %v3341_v7 = vld [vmem:[#allocation5 + $0x164] ss:$8 sps:$4 sm:$0xff]   ;;  %v3344_v9 = vld [vmem:[#allocation5 + $0x54] ss:$8 sps:$4 sm:$0xff]  }
  0x50   :  { %2131 = vmatpush1.bf16.msra.mxu1 %v3337_v4  ;;  %2081 = vmatprep.subr.bf16.mxu0 %v3338_v5  ;;  %v3343_v8 = vld [vmem:[#allocation5 + $0x160] ss:$8 sps:$4 sm:$0xff]   ;;  %v3346_v10 = vld [vmem:[#allocation5 + $0x50] ss:$8 sps:$4 sm:$0xff]   ;;  %v3347_v11 = vld [vmem:[#allocation5 + $0x154] ss:$8 sps:$4 sm:$0xff]  }
  0x51   :  { %2132 = vmatprep.subr.bf16.mxu1 %v3341_v7  ;;  %v3350_v12 = vld [vmem:[#allocation5 + $0x44] ss:$8 sps:$4 sm:$0xff]   ;;  %v3349_v13 = vld [vmem:[#allocation5 + $0x150] ss:$8 sps:$4 sm:$0xff]   ;;  %v3352_v15 = vld [vmem:[#allocation5 + $0x40] ss:$8 sps:$4 sm:$0xff]  }
  0x52   :  { %v3353_v14 = vld [vmem:[#allocation5 + $0x144] ss:$8 sps:$4 sm:$0xff]   ;;  %v3356_v16 = vld [vmem:[#allocation5 + $0x34] ss:$8 sps:$4 sm:$0xff]   ;;  %v3355_v17 = vld [vmem:[#allocation5 + $0x140] ss:$8 sps:$4 sm:$0xff]  }
  0x53   :  { %2082 = vmatpush1.bf16.msra.mxu0 %v3340_v6  ;;  %v3359_v18 = vld [vmem:[#allocation5 + $0x134] ss:$8 sps:$4 sm:$0xff]   ;;  %v3358_v19 = vld [vmem:[#allocation5 + $0x30] ss:$8 sps:$4 sm:$0xff]   ;;  %v3362_v20 = vld [vmem:[#allocation5 + $0x24] ss:$8 sps:$4 sm:$0xff]  }
  0x54   :  { %2083 = vmatprep.subr.bf16.mxu0 %v3344_v9  ;;  %2133 = vmatpush1.bf16.msra.mxu1 %v3343_v8  ;;  %v3361_v21 = vld [vmem:[#allocation5 + $0x130] ss:$8 sps:$4 sm:$0xff]   ;;  %v3365_v22 = vld [vmem:[#allocation5 + $0x124] ss:$8 sps:$4 sm:$0xff]   ;;  %v3364_v23 = vld [vmem:[#allocation5 + $0x20] ss:$8 sps:$4 sm:$0xff]  }
  0x55   :  { %2134 = vmatprep.subr.bf16.mxu1 %v3347_v11  ;;  %v3368_v24 = vld [vmem:[#allocation5 + $0x14] ss:$8 sps:$4 sm:$0xff]   ;;  %v3367_v25 = vld [vmem:[#allocation5 + $0x120] ss:$8 sps:$4 sm:$0xff]   ;;  %v3370_v27 = vld [vmem:[#allocation5 + $0x10] ss:$8 sps:$4 sm:$0xff]  }
  0x56   :  { %v3371_v26 = vld [vmem:[#allocation5 + $0x114] ss:$8 sps:$4 sm:$0xff]   ;;  %v3374_v28 = vld [vmem:[#allocation5 + $0x4] ss:$8 sps:$4 sm:$0xff]   ;;  %v3373_v29 = vld [vmem:[#allocation5 + $0x110] ss:$8 sps:$4 sm:$0xff]  }
  0x57   :  { %2084 = vmatpush1.bf16.msra.mxu0 %v3346_v10  ;;  %v3377_v30 = vld [vmem:[#allocation5 + $0x104] ss:$8 sps:$4 sm:$0xff]   ;;  %v3376_v31 = vld [vmem:[#allocation5] ss:$8 sps:$4 sm:$0xff]   ;;  %v3380_v32 = vld [vmem:[#allocation5 + $0xf4] ss:$8 sps:$4 sm:$0xff]  }
  0x58   :  { %2085 = vmatprep.subr.bf16.mxu0 %v3350_v12  ;;  %2135 = vmatpush1.bf16.msra.mxu1 %v3349_v13  ;;  %v3379_v33 = vld [vmem:[#allocation5 + $0x100] ss:$8 sps:$4 sm:$0xff]   ;;  %v3383_v34 = vld [vmem:[#allocation5 + $0x1f4] ss:$8 sps:$4 sm:$0xff]   ;;  %v3382_v35 = vld [vmem:[#allocation5 + $0xf0] ss:$8 sps:$4 sm:$0xff]  }
  0x59   :  { %2136 = vmatprep.subr.bf16.mxu1 %v3353_v14  ;;  %v3386_v36 = vld [vmem:[#allocation5 + $0xe4] ss:$8 sps:$4 sm:$0xff]   ;;  %v3385_v37 = vld [vmem:[#allocation5 + $0x1f0] ss:$8 sps:$4 sm:$0xff]   ;;  %v3388_v39 = vld [vmem:[#allocation5 + $0xe0] ss:$8 sps:$4 sm:$0xff]  }
  0x5a   :  { %v3389_v38 = vld [vmem:[#allocation5 + $0x1e4] ss:$8 sps:$4 sm:$0xff]   ;;  %v3392_v40 = vld [vmem:[#allocation5 + $0xd4] ss:$8 sps:$4 sm:$0xff]   ;;  %v3391_v41 = vld [vmem:[#allocation5 + $0x1e0] ss:$8 sps:$4 sm:$0xff]  }
  0x5b   :  { %2086 = vmatpush1.bf16.msra.mxu0 %v3352_v15  ;;  %v3395_v42 = vld [vmem:[#allocation5 + $0x1d4] ss:$8 sps:$4 sm:$0xff]   ;;  %v3394_v43 = vld [vmem:[#allocation5 + $0xd0] ss:$8 sps:$4 sm:$0xff]   ;;  %v3398_v44 = vld [vmem:[#allocation5 + $0xc4] ss:$8 sps:$4 sm:$0xff]  }
  0x5c   :  { %2087 = vmatprep.subr.bf16.mxu0 %v3356_v16  ;;  %2137 = vmatpush1.bf16.msra.mxu1 %v3355_v17  ;;  %v3397_v45 = vld [vmem:[#allocation5 + $0x1d0] ss:$8 sps:$4 sm:$0xff]   ;;  %v3401_v46 = vld [vmem:[#allocation5 + $0x1c4] ss:$8 sps:$4 sm:$0xff]   ;;  %v3400_v47 = vld [vmem:[#allocation5 + $0xc0] ss:$8 sps:$4 sm:$0xff]  }
  0x5d   :  { %2138 = vmatprep.subr.bf16.mxu1 %v3359_v18  ;;  %v3429_v48 = vld [vmem:[#allocation3 + $0x4] ss:$76 sps:$4 sm:$0xff]   ;;  %v3404_v49 = vld [vmem:[#allocation5 + $0xb4] ss:$8 sps:$4 sm:$0xff]   ;;  %v3406_v53 = vld [vmem:[#allocation5 + $0xb0] ss:$8 sps:$4 sm:$0xff]  }
  0x5e   :  { %v3403_v50 = vld [vmem:[#allocation5 + $0x1c0] ss:$8 sps:$4 sm:$0xff]   ;;  %2111 = vmatprep.mubr.bf16.mxu0 %v3429_v48  ;;  %v3407_v51 = vld [vmem:[#allocation5 + $0x1b4] ss:$8 sps:$4 sm:$0xff]   ;;  %v3410_v54 = vld [vmem:[#allocation5 + $0xa4] ss:$8 sps:$4 sm:$0xff]  }
  0x5f   :  { %2088 = vmatpush1.bf16.msra.mxu0 %v3358_v19  ;;  %v3436_v52 = vld [vmem:[#allocation3 + $0xc] ss:$76 sps:$4 sm:$0xff]   ;;  %v3409_v55 = vld [vmem:[#allocation5 + $0x1b0] ss:$8 sps:$4 sm:$0xff]   ;;  %v3413_v56 = vld [vmem:[#allocation5 + $0x1a4] ss:$8 sps:$4 sm:$0xff]  }
  0x60   :  { %2089 = vmatprep.subr.bf16.mxu0 %v3362_v20  ;;  %2139 = vmatpush1.bf16.msra.mxu1 %v3361_v21  ;;  %v3412_v57 = vld [vmem:[#allocation5 + $0xa0] ss:$8 sps:$4 sm:$0xff]   ;;  %v3416_v58 = vld [vmem:[#allocation5 + $0x94] ss:$8 sps:$4 sm:$0xff]   ;;  %v3418_v61 = vld [vmem:[#allocation5 + $0x90] ss:$8 sps:$4 sm:$0xff]  }
  0x61   :  { %2140 = vmatprep.subr.bf16.mxu1 %v3365_v22  ;;  %2162 = vmatprep.mubr.bf16.mxu1 %v3436_v52  ;;  %v3415_v59 = vld [vmem:[#allocation5 + $0x1a0] ss:$8 sps:$4 sm:$0xff]   ;;  %v3419_v60 = vld [vmem:[#allocation5 + $0x194] ss:$8 sps:$4 sm:$0xff]   ;;  %v3422_v62 = vld [vmem:[#allocation5 + $0x84] ss:$8 sps:$4 sm:$0xff]  }
  0x62   :  { %v3421_v63 = vld [vmem:[#allocation5 + $0x190] ss:$8 sps:$4 sm:$0xff]   ;;  %v3425_v0 = vld [vmem:[#allocation5 + $0x184] ss:$8 sps:$4 sm:$0xff]   ;;  %v3424_v1 = vld [vmem:[#allocation5 + $0x80] ss:$8 sps:$4 sm:$0xff]  }
  0x63   :  { %2090 = vmatpush1.bf16.msra.mxu0 %v3364_v23  ;;  %v3433_v2 = vld [vmem:[#allocation5 + $0x274] ss:$8 sps:$4 sm:$0xff]   ;;  %v3430_v3 = vld [vmem:[#allocation5 + $0x180] ss:$8 sps:$4 sm:$0xff]   ;;  %v3431_v6 = vld [vmem:[#allocation5 + $0x270] ss:$8 sps:$4 sm:$0xff]  }
  0x64   :  { %2091 = vmatprep.subr.bf16.mxu0 %v3368_v24  ;;  %2141 = vmatpush1.bf16.msra.mxu1 %v3367_v25  ;;  %v3427_v4 = vld [vmem:[#allocation3] ss:$76 sps:$4 sm:$0xff]   ;;  %v3434_v7 = vld [vmem:[#allocation3 + $0x8] ss:$76 sps:$4 sm:$0xff]   ;;  %v125_v23 = vld [vmem:[#allocation3 + $0x98] sm:$0xff]  ;;  %vm2072_vm0 = vcmask 392192  }
  0x65   :  { %2142 = vmatprep.subr.bf16.mxu1 %v3371_v26  ;;  %v3439_v5 = vld [vmem:[#allocation5 + $0x374] ss:$8 sps:$4 sm:$0xff]   ;;  %v3442_v8 = vld [vmem:[#allocation5 + $0x264] ss:$8 sps:$4 sm:$0xff]   ;;  %v3437_v9 = vld [vmem:[#allocation5 + $0x370] ss:$8 sps:$4 sm:$0xff]   ;;  %v2971_v25 = vcombine.high %v125_v23, %v125_v23  ;;  %v2970_v26 = vcombine.low %v125_v23, %v125_v23 }
  0x66   :  { %v3445_v10 = vld [vmem:[#allocation5 + $0x364] ss:$8 sps:$4 sm:$0xff]   ;;  %v3440_v11 = vld [vmem:[#allocation5 + $0x260] ss:$8 sps:$4 sm:$0xff]   ;;  %v3448_v12 = vld [vmem:[#allocation5 + $0x254] ss:$8 sps:$4 sm:$0xff]  }
  0x67   :  { %2092 = vmatpush1.bf16.msra.mxu0 %v3370_v27  ;;  %v3443_v13 = vld [vmem:[#allocation5 + $0x360] ss:$8 sps:$4 sm:$0xff]   ;;  %v3451_v14 = vld [vmem:[#allocation5 + $0x354] ss:$8 sps:$4 sm:$0xff]   ;;  %v3446_v15 = vld [vmem:[#allocation5 + $0x250] ss:$8 sps:$4 sm:$0xff]  }
  0x68   :  { %2093 = vmatprep.subr.bf16.mxu0 %v3374_v28  ;;  %2143 = vmatpush1.bf16.msra.mxu1 %v3373_v29  ;;  %v3454_v16 = vld [vmem:[#allocation5 + $0x244] ss:$8 sps:$4 sm:$0xff]   ;;  %v3449_v17 = vld [vmem:[#allocation5 + $0x350] ss:$8 sps:$4 sm:$0xff]   ;;  %v3452_v19 = vld [vmem:[#allocation5 + $0x240] ss:$8 sps:$4 sm:$0xff]  }
  0x69   :  { %2144 = vmatprep.subr.bf16.mxu1 %v3377_v30  ;;  %v3457_v18 = vld [vmem:[#allocation5 + $0x344] ss:$8 sps:$4 sm:$0xff]   ;;  %v3460_v20 = vld [vmem:[#allocation5 + $0x234] ss:$8 sps:$4 sm:$0xff]   ;;  %v3455_v21 = vld [vmem:[#allocation5 + $0x340] ss:$8 sps:$4 sm:$0xff]  }
  0x6a   :  { %v3463_v22 = vld [vmem:[#allocation5 + $0x334] ss:$8 sps:$4 sm:$0xff]   ;;  %v3458_v24 = vld [vmem:[#allocation5 + $0x230] ss:$8 sps:$4 sm:$0xff]   ;;  %v3466_v27 = vld [vmem:[#allocation5 + $0x224] ss:$8 sps:$4 sm:$0xff]  }
  0x6b   :  { %2094 = vmatpush1.bf16.msra.mxu0 %v3376_v31  ;;  %v3461_v28 = vld [vmem:[#allocation5 + $0x330] ss:$8 sps:$4 sm:$0xff]   ;;  %v3464_v29 = vld [vmem:[#allocation5 + $0x220] ss:$8 sps:$4 sm:$0xff]   ;;  %v3469_v30 = vld [vmem:[#allocation5 + $0x324] ss:$8 sps:$4 sm:$0xff]  }
  0x6c   :  { %2095 = vmatprep.subr.bf16.mxu0 %v3380_v32  ;;  %2145 = vmatpush1.bf16.msra.mxu1 %v3379_v33  ;;  %v126_v31 = vld [vmem:[#allocation3 + $0xa0] sm:$0xff]  ;;  %v3490_v48 = vld [vmem:[#allocation5 + $0x2e4] ss:$8 sps:$4 sm:$0xff]   ;;  %vm2939_vm13 = vcmask 7168  }
  0x6d   :  { %2146 = vmatprep.subr.bf16.mxu1 %v3383_v34  ;;  %v3472_v32 = vld [vmem:[#allocation5 + $0x214] ss:$8 sps:$4 sm:$0xff]   ;;  %v2973_v33 = vcombine.high %v126_v31, %v126_v31  ;;  %v2972_v34 = vcombine.low %v126_v31, %v126_v31  ;;  %v3642_v31 = vld [vmem:[#allocation3 + $0x24] ss:$76 sps:$4 sm:$0xff]  }
  0x6e   :  { %v3496_v52 = vld [vmem:[#allocation5 + $0x2d4] ss:$8 sps:$4 sm:$0xff]  }
  0x6f   :  { %2096 = vmatpush2.bf16.msra.mxu0 %v3382_v35  ;;  %v3467_v35 = vld [vmem:[#allocation5 + $0x320] ss:$8 sps:$4 sm:$0xff]  }
  0x70   :  { %2097 = vmatprep.subr.bf16.mxu0 %v3386_v36  ;;  %2147 = vmatpush2.bf16.msra.mxu1 %v3385_v37  ;;  %v3475_v36 = vld [vmem:[#allocation5 + $0x314] ss:$8 sps:$4 sm:$0xff]   ;;  %v3470_v37 = vld [vmem:[#allocation5 + $0x210] ss:$8 sps:$4 sm:$0xff]  }
  0x71   :  { %2148 = vmatprep.subr.bf16.mxu1 %v3389_v38  ;;  %v3478_v38 = vld [vmem:[#allocation5 + $0x204] ss:$8 sps:$4 sm:$0xff]  }
  0x73   :  { %2098 = vmatpush2.bf16.msra.mxu0 %v3388_v39  ;;  %v3473_v39 = vld [vmem:[#allocation5 + $0x310] ss:$8 sps:$4 sm:$0xff]  }
  0x74   :  { %2099 = vmatprep.subr.bf16.mxu0 %v3392_v40  ;;  %2149 = vmatpush2.bf16.msra.mxu1 %v3391_v41  ;;  %v3536_v40 = vld [vmem:[#allocation3 + $0x14] ss:$76 sps:$4 sm:$0xff]   ;;  %v3481_v41 = vld [vmem:[#allocation5 + $0x304] ss:$8 sps:$4 sm:$0xff]  }
  0x75   :  { %2150 = vmatprep.subr.bf16.mxu1 %v3395_v42  ;;  %v3476_v42 = vld [vmem:[#allocation5 + $0x200] ss:$8 sps:$4 sm:$0xff]  }
  0x77   :  { %2100 = vmatpush2.bf16.msra.mxu0 %v3394_v43  ;;  %v3484_v43 = vld [vmem:[#allocation5 + $0x2f4] ss:$8 sps:$4 sm:$0xff]  }
  0x78   :  { %2101 = vmatprep.subr.bf16.mxu0 %v3398_v44  ;;  %2151 = vmatpush2.bf16.msra.mxu1 %v3397_v45  ;;  %v3542_v44 = vld [vmem:[#allocation3 + $0x1c] ss:$76 sps:$4 sm:$0xff]   ;;  %v3479_v45 = vld [vmem:[#allocation5 + $0x300] ss:$8 sps:$4 sm:$0xff]  }
  0x79   :  { %2152 = vmatprep.subr.bf16.mxu1 %v3401_v46  ;;  %v3487_v46 = vld [vmem:[#allocation5 + $0x3f4] ss:$8 sps:$4 sm:$0xff]  }
  0x7b   :  { %2102 = vmatpush2.bf16.msra.mxu0 %v3400_v47  ;;  %v3482_v47 = vld [vmem:[#allocation5 + $0x2f0] ss:$8 sps:$4 sm:$0xff]  }
  0x7c   :  { %2103 = vmatprep.subr.bf16.mxu0 %v3404_v49  ;;  %2153 = vmatpush2.bf16.msra.mxu1 %v3403_v50  ;;  %v3485_v49 = vld [vmem:[#allocation5 + $0x3f0] ss:$8 sps:$4 sm:$0xff]   ;;  %v3493_v50 = vld [vmem:[#allocation5 + $0x3e4] ss:$8 sps:$4 sm:$0xff]  }
  0x7d   :  { %2154 = vmatprep.subr.bf16.mxu1 %v3407_v51  ;;  %v3488_v51 = vld [vmem:[#allocation5 + $0x2e0] ss:$8 sps:$4 sm:$0xff]  }
  0x7f   :  { %2104 = vmatpush2.bf16.msra.mxu0 %v3406_v53  ;;  %v3491_v53 = vld [vmem:[#allocation5 + $0x3e0] ss:$8 sps:$4 sm:$0xff]  }
  0x80   :  { %2105 = vmatprep.subr.bf16.mxu0 %v3410_v54  ;;  %2155 = vmatpush2.bf16.msra.mxu1 %v3409_v55  ;;  %v3499_v54 = vld [vmem:[#allocation5 + $0x3d4] ss:$8 sps:$4 sm:$0xff]   ;;  %v3494_v55 = vld [vmem:[#allocation5 + $0x2d0] ss:$8 sps:$4 sm:$0xff]  }
  0x81   :  { %2156 = vmatprep.subr.bf16.mxu1 %v3413_v56  ;;  %v3502_v56 = vld [vmem:[#allocation5 + $0x2c4] ss:$8 sps:$4 sm:$0xff]  }
  0x83   :  { %2106 = vmatpush2.bf16.msra.mxu0 %v3412_v57  ;;  %v3497_v57 = vld [vmem:[#allocation5 + $0x3d0] ss:$8 sps:$4 sm:$0xff]  }
  0x84   :  { %2107 = vmatprep.subr.bf16.mxu0 %v3416_v58  ;;  %2157 = vmatpush2.bf16.msra.mxu1 %v3415_v59  ;;  %v3505_v58 = vld [vmem:[#allocation5 + $0x3c4] ss:$8 sps:$4 sm:$0xff]   ;;  %v3500_v59 = vld [vmem:[#allocation5 + $0x2c0] ss:$8 sps:$4 sm:$0xff]  }
  0x85   :  { %2158 = vmatprep.subr.bf16.mxu1 %v3419_v60  ;;  %v3508_v60 = vld [vmem:[#allocation5 + $0x2b4] ss:$8 sps:$4 sm:$0xff]  }
  0x87   :  { %2108 = vmatpush2.bf16.msra.mxu0 %v3418_v61  ;;  %v3503_v61 = vld [vmem:[#allocation5 + $0x3c0] ss:$8 sps:$4 sm:$0xff]  }
  0x88   :  { %2109 = vmatprep.subr.bf16.mxu0 %v3422_v62  ;;  %2159 = vmatpush2.bf16.msra.mxu1 %v3421_v63  ;;  %v3512_v62 = vld [vmem:[#allocation5 + $0x3b4] ss:$8 sps:$4 sm:$0xff]   ;;  %v3506_v63 = vld [vmem:[#allocation5 + $0x2b0] ss:$8 sps:$4 sm:$0xff]  }
  0x89   :  { %2160 = vmatprep.subr.bf16.mxu1 %v3425_v0  ;;  %v3516_v0 = vld [vmem:[#allocation5 + $0x2a4] ss:$8 sps:$4 sm:$0xff]  }
  0x8b   :  { %2110 = vmatpush2.bf16.msra.mxu0 %v3424_v1  ;;  %v3510_v1 = vld [vmem:[#allocation5 + $0x3b0] ss:$8 sps:$4 sm:$0xff]  }
  0x8c   :  { %2181 = vmatprep.subr.bf16.mxu0 %v3433_v2  ;;  %2161 = vmatpush2.bf16.msra.mxu1 %v3430_v3  ;;  %v3519_v2 = vld [vmem:[#allocation5 + $0x3a4] ss:$8 sps:$4 sm:$0xff]   ;;  %v3514_v3 = vld [vmem:[#allocation5 + $0x2a0] ss:$8 sps:$4 sm:$0xff]  }
  0x8d   :  { %2232 = vmatprep.subr.bf16.mxu1 %v3439_v5  ;;  %v3517_v5 = vld [vmem:[#allocation5 + $0x3a0] ss:$8 sps:$4 sm:$0xff]  }
  0x8e   :  { %2112 = vmatmul.mubr.bf16.vlgmr.msra.gmra.mxu0 %v3427_v4  ;;  %v3523_v4 = vld [vmem:[#allocation5 + $0x294] ss:$8 sps:$4 sm:$0xff]  }
  0x8f   :  { %2182 = vmatpush1.bf16.msra.mxu0 %v3431_v6  ;;  %2163 = vmatmul.mubr.bf16.vlgmr.msra.gmra.mxu1 %v3434_v7  ;;  %v3527_v6 = vld [vmem:[#allocation5 + $0x394] ss:$8 sps:$4 sm:$0xff]   ;;  %v3521_v7 = vld [vmem:[#allocation5 + $0x290] ss:$8 sps:$4 sm:$0xff]  }
  0x90   :  { %2183 = vmatprep.subr.bf16.mxu0 %v3442_v8  ;;  %2233 = vmatpush1.bf16.msra.mxu1 %v3437_v9  ;;  %v3530_v8 = vld [vmem:[#allocation5 + $0x284] ss:$8 sps:$4 sm:$0xff]   ;;  %v3525_v9 = vld [vmem:[#allocation5 + $0x390] ss:$8 sps:$4 sm:$0xff]  }
  0x91   :  { %2234 = vmatprep.subr.bf16.mxu1 %v3445_v10  ;;  %2121 = vmatprep.mubr.bf16.mxu0 %v2971_v25  ;;  %v3528_v10 = vld [vmem:[#allocation5 + $0x280] ss:$8 sps:$4 sm:$0xff]  }
  0x92   :  { %2172 = vmatprep.mubr.bf16.mxu1 %v2973_v33  ;;  %v3546_v25 = vld [vmem:[#allocation5 + $0x460] ss:$8 sps:$4 sm:$0xff]   ;;  %v3564_v33 = vld [vmem:[#allocation5 + $0x444] ss:$8 sps:$4 sm:$0xff]  }
  0x93   :  { %2184 = vmatpush1.bf16.msra.mxu0 %v3440_v11  ;;  %v3533_v11 = vld [vmem:[#allocation5 + $0x384] ss:$8 sps:$4 sm:$0xff]  }
  0x94   :  { %2185 = vmatprep.subr.bf16.mxu0 %v3448_v12  ;;  %2235 = vmatpush1.bf16.msra.mxu1 %v3443_v13  ;;  %v3531_v12 = vld [vmem:[#allocation5 + $0x380] ss:$8 sps:$4 sm:$0xff]   ;;  %v3539_v13 = vld [vmem:[#allocation5 + $0x474] ss:$8 sps:$4 sm:$0xff]  }
  0x95   :  { %2236 = vmatprep.subr.bf16.mxu1 %v3451_v14  ;;  %v127_v14 = vld [vmem:[#allocation3 + $0xa8] sm:$0xff] }
  0x96   :  { %2122 = vmatmul.mubr.bf16.gmra.mxu0 %v2970_v26  ;;  %v3556_v26 = vld [vmem:[#allocation5 + $0x454] ss:$8 sps:$4 sm:$0xff]  }
  0x97   :  { %2186 = vmatpush1.bf16.msra.mxu0 %v3446_v15  ;;  %2173 = vmatmul.mubr.bf16.gmra.mxu1 %v2972_v34  ;;  %v3534_v15 = vld [vmem:[#allocation3 + $0x10] ss:$76 sps:$4 sm:$0xff]  }
  0x98   :  { %2187 = vmatprep.subr.bf16.mxu0 %v3454_v16  ;;  %2237 = vmatpush1.bf16.msra.mxu1 %v3449_v17  ;;  %v3545_v16 = vld [vmem:[#allocation5 + $0x574] ss:$8 sps:$4 sm:$0xff]   ;;  %v128_v17 = vld [vmem:[#allocation3 + $0xb0] sm:$0xff] }
  0x99   :  { %2238 = vmatprep.subr.bf16.mxu1 %v3457_v18  ;;  %2213 = vmatprep.mubr.bf16.mxu0 %v3536_v40  ;;  %v3537_v18 = vld [vmem:[#allocation5 + $0x470] ss:$8 sps:$4 sm:$0xff]   ;;  %v2977_v23 = vcombine.high %v128_v17, %v128_v17  ;;  %v3573_v40 = vld [vmem:[#allocation5 + $0x534] ss:$8 sps:$4 sm:$0xff]  }
  0x9a   :  { %2264 = vmatprep.mubr.bf16.mxu1 %v3542_v44  ;;  %v3559_v34 = vld [vmem:[#allocation5 + $0x550] ss:$8 sps:$4 sm:$0xff]   ;;  %v3579_v44 = vld [vmem:[#allocation5 + $0x524] ss:$8 sps:$4 sm:$0xff]  }
  0x9b   :  { %2188 = vmatpush1.bf16.msra.mxu0 %v3452_v19  ;;  %v3540_v19 = vld [vmem:[#allocation3 + $0x18] ss:$76 sps:$4 sm:$0xff]  }
  0x9c   :  { %2189 = vmatprep.subr.bf16.mxu0 %v3460_v20  ;;  %2239 = vmatpush1.bf16.msra.mxu1 %v3455_v21  ;;  %v2975_v20 = vcombine.high %v127_v14, %v127_v14  ;;  %v3548_v21 = vld [vmem:[#allocation5 + $0x464] ss:$8 sps:$4 sm:$0xff]  }
  0x9d   :  { %2240 = vmatprep.subr.bf16.mxu1 %v3463_v22  ;;  %v3543_v22 = vld [vmem:[#allocation5 + $0x570] ss:$8 sps:$4 sm:$0xff]  }
  0x9f   :  { %2190 = vmatpush1.bf16.msra.mxu0 %v3458_v24  ;;  %v3551_v24 = vld [vmem:[#allocation5 + $0x564] ss:$8 sps:$4 sm:$0xff]  }
  0xa0   :  { %2191 = vmatprep.subr.bf16.mxu0 %v3466_v27  ;;  %2241 = vmatpush1.bf16.msra.mxu1 %v3461_v28  ;;  %v3549_v27 = vld [vmem:[#allocation5 + $0x560] ss:$8 sps:$4 sm:$0xff]   ;;  %v2974_v28 = vcombine.low %v127_v14, %v127_v14  ;;  %v3630_v14 = vld [vmem:[#allocation5 + $0x494] ss:$8 sps:$4 sm:$0xff]  }
  0xa1   :  { %2242 = vmatprep.subr.bf16.mxu1 %v3469_v30  ;;  %v3554_v30 = vld [vmem:[#allocation5 + $0x450] ss:$8 sps:$4 sm:$0xff]  }
  0xa3   :  { %2192 = vmatpush1.bf16.msra.mxu0 %v3464_v29  ;;  %v3561_v29 = vld [vmem:[#allocation5 + $0x554] ss:$8 sps:$4 sm:$0xff]  }
  0xa4   :  { %2193 = vmatprep.subr.bf16.mxu0 %v3472_v32  ;;  %2243 = vmatpush1.bf16.msra.mxu1 %v3467_v35  ;;  %v2976_v32 = vcombine.low %v128_v17, %v128_v17  ;;  %v3567_v35 = vld [vmem:[#allocation5 + $0x544] ss:$8 sps:$4 sm:$0xff]   ;;  %v3628_v17 = vld [vmem:[#allocation5 + $0x490] ss:$8 sps:$4 sm:$0xff]  }
  0xa5   :  { %2244 = vmatprep.subr.bf16.mxu1 %v3475_v36  ;;  %v3648_v36 = vld [vmem:[#allocation3 + $0x2c] ss:$76 sps:$4 sm:$0xff]  }
  0xa7   :  { %2194 = vmatpush1.bf16.msra.mxu0 %v3470_v37  ;;  %v3562_v37 = vld [vmem:[#allocation5 + $0x440] ss:$8 sps:$4 sm:$0xff]  }
  0xa8   :  { %2195 = vmatprep.subr.bf16.mxu0 %v3478_v38  ;;  %2245 = vmatpush1.bf16.msra.mxu1 %v3473_v39  ;;  %v3570_v38 = vld [vmem:[#allocation5 + $0x434] ss:$8 sps:$4 sm:$0xff]   ;;  %v3565_v39 = vld [vmem:[#allocation5 + $0x540] ss:$8 sps:$4 sm:$0xff]  }
  0xa9   :  { %2246 = vmatprep.subr.bf16.mxu1 %v3481_v41  ;;  %v3568_v41 = vld [vmem:[#allocation5 + $0x430] ss:$8 sps:$4 sm:$0xff]  }
  0xab   :  { %2196 = vmatpush1.bf16.msra.mxu0 %v3476_v42  ;;  %v3576_v42 = vld [vmem:[#allocation5 + $0x424] ss:$8 sps:$4 sm:$0xff]  }
  0xac   :  { %2197 = vmatprep.subr.bf16.mxu0 %v3484_v43  ;;  %2247 = vmatpush1.bf16.msra.mxu1 %v3479_v45  ;;  %v3571_v43 = vld [vmem:[#allocation5 + $0x530] ss:$8 sps:$4 sm:$0xff]   ;;  %v3574_v45 = vld [vmem:[#allocation5 + $0x420] ss:$8 sps:$4 sm:$0xff]  }
  0xad   :  { %2248 = vmatprep.subr.bf16.mxu1 %v3487_v46  ;;  %v3582_v46 = vld [vmem:[#allocation5 + $0x414] ss:$8 sps:$4 sm:$0xff]  }
  0xaf   :  { %2198 = vmatpush2.bf16.msra.mxu0 %v3482_v47  ;;  %v3577_v47 = vld [vmem:[#allocation5 + $0x520] ss:$8 sps:$4 sm:$0xff]  }
  0xb0   :  { %2199 = vmatprep.subr.bf16.mxu0 %v3490_v48  ;;  %2249 = vmatpush2.bf16.msra.mxu1 %v3485_v49  ;;  %v3585_v48 = vld [vmem:[#allocation5 + $0x514] ss:$8 sps:$4 sm:$0xff]   ;;  %v3580_v49 = vld [vmem:[#allocation5 + $0x410] ss:$8 sps:$4 sm:$0xff]  }
  0xb1   :  { %2250 = vmatprep.subr.bf16.mxu1 %v3493_v50  ;;  %v3588_v50 = vld [vmem:[#allocation5 + $0x404] ss:$8 sps:$4 sm:$0xff]  }
  0xb3   :  { %2200 = vmatpush2.bf16.msra.mxu0 %v3488_v51  ;;  %v3583_v51 = vld [vmem:[#allocation5 + $0x510] ss:$8 sps:$4 sm:$0xff]  }
  0xb4   :  { %2201 = vmatprep.subr.bf16.mxu0 %v3496_v52  ;;  %2251 = vmatpush2.bf16.msra.mxu1 %v3491_v53  ;;  %v3591_v52 = vld [vmem:[#allocation5 + $0x504] ss:$8 sps:$4 sm:$0xff]   ;;  %v3586_v53 = vld [vmem:[#allocation5 + $0x400] ss:$8 sps:$4 sm:$0xff]  }
  0xb5   :  { %2252 = vmatprep.subr.bf16.mxu1 %v3499_v54  ;;  %v3594_v54 = vld [vmem:[#allocation5 + $0x4f4] ss:$8 sps:$4 sm:$0xff]  }
  0xb7   :  { %2202 = vmatpush2.bf16.msra.mxu0 %v3494_v55  ;;  %v3589_v55 = vld [vmem:[#allocation5 + $0x500] ss:$8 sps:$4 sm:$0xff]  }
  0xb8   :  { %2203 = vmatprep.subr.bf16.mxu0 %v3502_v56  ;;  %2253 = vmatpush2.bf16.msra.mxu1 %v3497_v57  ;;  %v3597_v56 = vld [vmem:[#allocation5 + $0x5f4] ss:$8 sps:$4 sm:$0xff]   ;;  %v3592_v57 = vld [vmem:[#allocation5 + $0x4f0] ss:$8 sps:$4 sm:$0xff]  }
  0xb9   :  { %2254 = vmatprep.subr.bf16.mxu1 %v3505_v58  ;;  %v3600_v58 = vld [vmem:[#allocation5 + $0x4e4] ss:$8 sps:$4 sm:$0xff]  }
  0xbb   :  { %2204 = vmatpush2.bf16.msra.mxu0 %v3500_v59  ;;  %v3595_v59 = vld [vmem:[#allocation5 + $0x5f0] ss:$8 sps:$4 sm:$0xff]  }
  0xbc   :  { %2205 = vmatprep.subr.bf16.mxu0 %v3508_v60  ;;  %2255 = vmatpush2.bf16.msra.mxu1 %v3503_v61  ;;  %v3603_v60 = vld [vmem:[#allocation5 + $0x5e4] ss:$8 sps:$4 sm:$0xff]   ;;  %v3598_v61 = vld [vmem:[#allocation5 + $0x4e0] ss:$8 sps:$4 sm:$0xff]  }
  0xbd   :  { %2256 = vmatprep.subr.bf16.mxu1 %v3512_v62  ;;  %v3606_v62 = vld [vmem:[#allocation5 + $0x4d4] ss:$8 sps:$4 sm:$0xff]  }
  0xbf   :  { %2206 = vmatpush2.bf16.msra.mxu0 %v3506_v63  ;;  %v3601_v63 = vld [vmem:[#allocation5 + $0x5e0] ss:$8 sps:$4 sm:$0xff]  }
  0xc0   :  { %2207 = vmatprep.subr.bf16.mxu0 %v3516_v0  ;;  %2257 = vmatpush2.bf16.msra.mxu1 %v3510_v1  ;;  %v3609_v0 = vld [vmem:[#allocation5 + $0x5d4] ss:$8 sps:$4 sm:$0xff]   ;;  %v3604_v1 = vld [vmem:[#allocation5 + $0x4d0] ss:$8 sps:$4 sm:$0xff]  }
  0xc1   :  { %2258 = vmatprep.subr.bf16.mxu1 %v3519_v2  ;;  %v3612_v2 = vld [vmem:[#allocation5 + $0x4c4] ss:$8 sps:$4 sm:$0xff]  }
  0xc3   :  { %2208 = vmatpush2.bf16.msra.mxu0 %v3514_v3  ;;  %v3607_v3 = vld [vmem:[#allocation5 + $0x5d0] ss:$8 sps:$4 sm:$0xff]  }
  0xc4   :  { %2209 = vmatprep.subr.bf16.mxu0 %v3523_v4  ;;  %2259 = vmatpush2.bf16.msra.mxu1 %v3517_v5  ;;  %v3615_v4 = vld [vmem:[#allocation5 + $0x5c4] ss:$8 sps:$4 sm:$0xff]   ;;  %v3610_v5 = vld [vmem:[#allocation5 + $0x4c0] ss:$8 sps:$4 sm:$0xff]  }
  0xc5   :  { %2260 = vmatprep.subr.bf16.mxu1 %v3527_v6  ;;  %v3618_v6 = vld [vmem:[#allocation5 + $0x4b4] ss:$8 sps:$4 sm:$0xff]  }
  0xc7   :  { %2210 = vmatpush2.bf16.msra.mxu0 %v3521_v7  ;;  %v3613_v7 = vld [vmem:[#allocation5 + $0x5c0] ss:$8 sps:$4 sm:$0xff]  }
  0xc8   :  { %2211 = vmatprep.subr.bf16.mxu0 %v3530_v8  ;;  %2261 = vmatpush2.bf16.msra.mxu1 %v3525_v9  ;;  %v3621_v8 = vld [vmem:[#allocation5 + $0x5b4] ss:$8 sps:$4 sm:$0xff]   ;;  %v3616_v9 = vld [vmem:[#allocation5 + $0x4b0] ss:$8 sps:$4 sm:$0xff]  }
  0xc9   :  { %2262 = vmatprep.subr.bf16.mxu1 %v3533_v11  ;;  %v3619_v11 = vld [vmem:[#allocation5 + $0x5b0] ss:$8 sps:$4 sm:$0xff]  }
  0xcb   :  { %2212 = vmatpush2.bf16.msra.mxu0 %v3528_v10  ;;  %v3624_v10 = vld [vmem:[#allocation5 + $0x4a4] ss:$8 sps:$4 sm:$0xff]  }
  0xcc   :  { %2283 = vmatprep.subr.bf16.mxu0 %v3539_v13  ;;  %2263 = vmatpush2.bf16.msra.mxu1 %v3531_v12  ;;  %v3627_v12 = vld [vmem:[#allocation5 + $0x5a4] ss:$8 sps:$4 sm:$0xff]   ;;  %v3622_v13 = vld [vmem:[#allocation5 + $0x4a0] ss:$8 sps:$4 sm:$0xff]  }
  0xcd   :  { %2334 = vmatprep.subr.bf16.mxu1 %v3545_v16  ;;  %v3633_v16 = vld [vmem:[#allocation5 + $0x594] ss:$8 sps:$4 sm:$0xff]  }
  0xce   :  { %2214 = vmatmul.mubr.bf16.vlgmr.msra.gmra.mxu0 %v3534_v15  ;;  %v3625_v15 = vld [vmem:[#allocation5 + $0x5a0] ss:$8 sps:$4 sm:$0xff]  }
  0xcf   :  { %2284 = vmatpush1.bf16.msra.mxu0 %v3537_v18  ;;  %2223 = vmatprep.mubr.bf16.mxu0 %v2975_v20  ;;  %v3636_v18 = vld [vmem:[#allocation5 + $0x484] ss:$8 sps:$4 sm:$0xff]   ;;  %v3634_v20 = vld [vmem:[#allocation5 + $0x480] ss:$8 sps:$4 sm:$0xff]  }
  0xd0   :  { %2265 = vmatmul.mubr.bf16.vlgmr.msra.gmra.mxu1 %v3540_v19  ;;  %2285 = vmatprep.subr.bf16.mxu0 %v3548_v21  ;;  %v3631_v19 = vld [vmem:[#allocation5 + $0x590] ss:$8 sps:$4 sm:$0xff]   ;;  %v3639_v21 = vld [vmem:[#allocation5 + $0x584] ss:$8 sps:$4 sm:$0xff]  }
  0xd1   :  { %2335 = vmatpush1.bf16.msra.mxu1 %v3543_v22  ;;  %2274 = vmatprep.mubr.bf16.mxu1 %v2977_v23  ;;  %v3637_v22 = vld [vmem:[#allocation5 + $0x580] ss:$8 sps:$4 sm:$0xff]   ;;  %v3645_v23 = vld [vmem:[#allocation5 + $0x674] ss:$8 sps:$4 sm:$0xff]  }
  0xd2   :  { %2336 = vmatprep.subr.bf16.mxu1 %v3551_v24  ;;  %v129_v24 = vld [vmem:[#allocation3 + $0xb8] sm:$0xff] }
  0xd3   :  { %2286 = vmatpush1.bf16.msra.mxu0 %v3546_v25  ;;  %v3640_v25 = vld [vmem:[#allocation3 + $0x20] ss:$76 sps:$4 sm:$0xff]  }
  0xd4   :  { %2287 = vmatprep.subr.bf16.mxu0 %v3556_v26  ;;  %v3643_v26 = vld [vmem:[#allocation5 + $0x670] ss:$8 sps:$4 sm:$0xff]  }
  0xd5   :  { %2337 = vmatpush1.bf16.msra.mxu1 %v3549_v27  ;;  %v3651_v27 = vld [vmem:[#allocation5 + $0x774] ss:$8 sps:$4 sm:$0xff]  }
  0xd6   :  { %2224 = vmatmul.mubr.bf16.gmra.mxu0 %v2974_v28  ;;  %2338 = vmatprep.subr.bf16.mxu1 %v3561_v29  ;;  %v130_v28 = vld [vmem:[#allocation3 + $0xc0] sm:$0xff]  ;;  %v3646_v29 = vld [vmem:[#allocation3 + $0x28] ss:$76 sps:$4 sm:$0xff]  }
  0xd7   :  { %2288 = vmatpush1.bf16.msra.mxu0 %v3554_v30  ;;  %2315 = vmatprep.mubr.bf16.mxu0 %v3642_v31  ;;  %v2979_v30 = vcombine.high %v129_v24, %v129_v24  ;;  %v3654_v31 = vld [vmem:[#allocation5 + $0x664] ss:$8 sps:$4 sm:$0xff]  }
  0xd8   :  { %2275 = vmatmul.mubr.bf16.gmra.mxu1 %v2976_v32  ;;  %2289 = vmatprep.subr.bf16.mxu0 %v3564_v33  ;;  %v3649_v32 = vld [vmem:[#allocation5 + $0x770] ss:$8 sps:$4 sm:$0xff]   ;;  %v2981_v33 = vcombine.high %v130_v28, %v130_v28 }
  0xd9   :  { %2339 = vmatpush1.bf16.msra.mxu1 %v3559_v34  ;;  %2366 = vmatprep.mubr.bf16.mxu1 %v3648_v36  ;;  %v3657_v34 = vld [vmem:[#allocation5 + $0x764] ss:$8 sps:$4 sm:$0xff]   ;;  %v3662_v36 = vld [vmem:[#allocation5 + $0x654] ss:$8 sps:$4 sm:$0xff]  }
  0xda   :  { %2340 = vmatprep.subr.bf16.mxu1 %v3567_v35  ;;  %v3652_v35 = vld [vmem:[#allocation5 + $0x660] ss:$8 sps:$4 sm:$0xff]  }
  0xdb   :  { %2290 = vmatpush1.bf16.msra.mxu0 %v3562_v37  ;;  %v3655_v37 = vld [vmem:[#allocation5 + $0x760] ss:$8 sps:$4 sm:$0xff]  }
  0xdc   :  { %2291 = vmatprep.subr.bf16.mxu0 %v3570_v38  ;;  %v2978_v38 = vcombine.low %v129_v24, %v129_v24  ;;  %v431_v24 = vlaneseq }
  0xdd   :  { %2341 = vmatpush1.bf16.msra.mxu1 %v3565_v39  ;;  %v3660_v39 = vld [vmem:[#allocation5 + $0x650] ss:$8 sps:$4 sm:$0xff]  }
  0xde   :  { %2342 = vmatprep.subr.bf16.mxu1 %v3573_v40  ;;  %v3667_v40 = vld [vmem:[#allocation5 + $0x754] ss:$8 sps:$4 sm:$0xff]  }
  0xdf   :  { %2292 = vmatpush1.bf16.msra.mxu0 %v3568_v41  ;;  %v3748_v41 = vld [vmem:[#allocation3 + $0x34] ss:$76 sps:$4 sm:$0xff]  }
  0xe0   :  { %2293 = vmatprep.subr.bf16.mxu0 %v3576_v42  ;;  %v2980_v42 = vcombine.low %v130_v28, %v130_v28  ;;  %v3734_v28 = vld [vmem:[#allocation5 + $0x690] ss:$8 sps:$4 sm:$0xff]  }
  0xe1   :  { %2343 = vmatpush1.bf16.msra.mxu1 %v3571_v43  ;;  %v3670_v43 = vld [vmem:[#allocation5 + $0x644] ss:$8 sps:$4 sm:$0xff]  }
  0xe2   :  { %2344 = vmatprep.subr.bf16.mxu1 %v3579_v44  ;;  %v3665_v44 = vld [vmem:[#allocation5 + $0x750] ss:$8 sps:$4 sm:$0xff]  }
  0xe3   :  { %2294 = vmatpush1.bf16.msra.mxu0 %v3574_v45  ;;  %v3754_v45 = vld [vmem:[#allocation3 + $0x3c] ss:$76 sps:$4 sm:$0xff]  }
  0xe4   :  { %2295 = vmatprep.subr.bf16.mxu0 %v3582_v46  ;;  %v3673_v46 = vld [vmem:[#allocation5 + $0x744] ss:$8 sps:$4 sm:$0xff]  }
  0xe5   :  { %2345 = vmatpush1.bf16.msra.mxu1 %v3577_v47  ;;  %v3668_v47 = vld [vmem:[#allocation5 + $0x640] ss:$8 sps:$4 sm:$0xff]  }
  0xe6   :  { %2346 = vmatprep.subr.bf16.mxu1 %v3585_v48  ;;  %v3676_v48 = vld [vmem:[#allocation5 + $0x634] ss:$8 sps:$4 sm:$0xff]  }
  0xe7   :  { %2296 = vmatpush1.bf16.msra.mxu0 %v3580_v49  ;;  %v3671_v49 = vld [vmem:[#allocation5 + $0x740] ss:$8 sps:$4 sm:$0xff]  }
  0xe8   :  { %2297 = vmatprep.subr.bf16.mxu0 %v3588_v50  ;;  %v3679_v50 = vld [vmem:[#allocation5 + $0x734] ss:$8 sps:$4 sm:$0xff]  }
  0xe9   :  { %2347 = vmatpush1.bf16.msra.mxu1 %v3583_v51  ;;  %v3674_v51 = vld [vmem:[#allocation5 + $0x630] ss:$8 sps:$4 sm:$0xff]  }
  0xea   :  { %2348 = vmatprep.subr.bf16.mxu1 %v3591_v52  ;;  %v3682_v52 = vld [vmem:[#allocation5 + $0x624] ss:$8 sps:$4 sm:$0xff]  }
  0xeb   :  { %2298 = vmatpush1.bf16.msra.mxu0 %v3586_v53  ;;  %v3677_v53 = vld [vmem:[#allocation5 + $0x730] ss:$8 sps:$4 sm:$0xff]  }
  0xec   :  { %2299 = vmatprep.subr.bf16.mxu0 %v3594_v54  ;;  %v3685_v54 = vld [vmem:[#allocation5 + $0x724] ss:$8 sps:$4 sm:$0xff]  }
  0xed   :  { %2349 = vmatpush1.bf16.msra.mxu1 %v3589_v55  ;;  %v3680_v55 = vld [vmem:[#allocation5 + $0x620] ss:$8 sps:$4 sm:$0xff]  }
  0xee   :  { %2350 = vmatprep.subr.bf16.mxu1 %v3597_v56  ;;  %v3683_v56 = vld [vmem:[#allocation5 + $0x720] ss:$8 sps:$4 sm:$0xff]  }
  0xef   :  { %2300 = vmatpush2.bf16.msra.mxu0 %v3592_v57  ;;  %v3688_v57 = vld [vmem:[#allocation5 + $0x614] ss:$8 sps:$4 sm:$0xff]  }
  0xf0   :  { %2301 = vmatprep.subr.bf16.mxu0 %v3600_v58  ;;  %v3691_v58 = vld [vmem:[#allocation5 + $0x714] ss:$8 sps:$4 sm:$0xff]  }
  0xf1   :  { %2351 = vmatpush2.bf16.msra.mxu1 %v3595_v59  ;;  %v3686_v59 = vld [vmem:[#allocation5 + $0x610] ss:$8 sps:$4 sm:$0xff]  }
  0xf2   :  { %2352 = vmatprep.subr.bf16.mxu1 %v3603_v60  ;;  %v3694_v60 = vld [vmem:[#allocation5 + $0x604] ss:$8 sps:$4 sm:$0xff]  }
  0xf3   :  { %2302 = vmatpush2.bf16.msra.mxu0 %v3598_v61  ;;  %v3689_v61 = vld [vmem:[#allocation5 + $0x710] ss:$8 sps:$4 sm:$0xff]  }
  0xf4   :  { %2303 = vmatprep.subr.bf16.mxu0 %v3606_v62  ;;  %v3697_v62 = vld [vmem:[#allocation5 + $0x704] ss:$8 sps:$4 sm:$0xff]  }
  0xf5   :  { %2353 = vmatpush2.bf16.msra.mxu1 %v3601_v63  ;;  %v3692_v63 = vld [vmem:[#allocation5 + $0x600] ss:$8 sps:$4 sm:$0xff]  }
  0xf6   :  { %2354 = vmatprep.subr.bf16.mxu1 %v3609_v0  ;;  %v3700_v0 = vld [vmem:[#allocation5 + $0x6f4] ss:$8 sps:$4 sm:$0xff]  }
  0xf7   :  { %2304 = vmatpush2.bf16.msra.mxu0 %v3604_v1  ;;  %v3695_v1 = vld [vmem:[#allocation5 + $0x700] ss:$8 sps:$4 sm:$0xff]  }
  0xf8   :  { %2305 = vmatprep.subr.bf16.mxu0 %v3612_v2  ;;  %v3703_v2 = vld [vmem:[#allocation5 + $0x7f4] ss:$8 sps:$4 sm:$0xff]  }
  0xf9   :  { %2355 = vmatpush2.bf16.msra.mxu1 %v3607_v3  ;;  %v3698_v3 = vld [vmem:[#allocation5 + $0x6f0] ss:$8 sps:$4 sm:$0xff]  }
  0xfa   :  { %2356 = vmatprep.subr.bf16.mxu1 %v3615_v4  ;;  %v3706_v4 = vld [vmem:[#allocation5 + $0x6e4] ss:$8 sps:$4 sm:$0xff]  }
  0xfb   :  { %2306 = vmatpush2.bf16.msra.mxu0 %v3610_v5  ;;  %v3701_v5 = vld [vmem:[#allocation5 + $0x7f0] ss:$8 sps:$4 sm:$0xff]  }
  0xfc   :  { %2307 = vmatprep.subr.bf16.mxu0 %v3618_v6  ;;  %v3709_v6 = vld [vmem:[#allocation5 + $0x7e4] ss:$8 sps:$4 sm:$0xff]  }
  0xfd   :  { %2357 = vmatpush2.bf16.msra.mxu1 %v3613_v7  ;;  %v3704_v7 = vld [vmem:[#allocation5 + $0x6e0] ss:$8 sps:$4 sm:$0xff]  }
  0xfe   :  { %2358 = vmatprep.subr.bf16.mxu1 %v3621_v8  ;;  %v3712_v8 = vld [vmem:[#allocation5 + $0x6d4] ss:$8 sps:$4 sm:$0xff]  }
  0xff   :  { %2308 = vmatpush2.bf16.msra.mxu0 %v3616_v9  ;;  %v3707_v9 = vld [vmem:[#allocation5 + $0x7e0] ss:$8 sps:$4 sm:$0xff]  }
 0x100   :  { %2309 = vmatprep.subr.bf16.mxu0 %v3624_v10  ;;  %v3715_v10 = vld [vmem:[#allocation5 + $0x7d4] ss:$8 sps:$4 sm:$0xff]  }
 0x101   :  { %2359 = vmatpush2.bf16.msra.mxu1 %v3619_v11  ;;  %v3710_v11 = vld [vmem:[#allocation5 + $0x6d0] ss:$8 sps:$4 sm:$0xff]  }
 0x102   :  { %2360 = vmatprep.subr.bf16.mxu1 %v3627_v12  ;;  %v3718_v12 = vld [vmem:[#allocation5 + $0x6c4] ss:$8 sps:$4 sm:$0xff]  }
 0x103   :  { %2310 = vmatpush2.bf16.msra.mxu0 %v3622_v13  ;;  %v3713_v13 = vld [vmem:[#allocation5 + $0x7d0] ss:$8 sps:$4 sm:$0xff]  }
 0x104   :  { %2311 = vmatprep.subr.bf16.mxu0 %v3630_v14  ;;  %v3721_v14 = vld [vmem:[#allocation5 + $0x7c4] ss:$8 sps:$4 sm:$0xff]  }
 0x105   :  { %2361 = vmatpush2.bf16.msra.mxu1 %v3625_v15  ;;  %v3716_v15 = vld [vmem:[#allocation5 + $0x6c0] ss:$8 sps:$4 sm:$0xff]  }
 0x106   :  { %2362 = vmatprep.subr.bf16.mxu1 %v3633_v16  ;;  %v3724_v16 = vld [vmem:[#allocation5 + $0x6b4] ss:$8 sps:$4 sm:$0xff]  }
 0x107   :  { %2312 = vmatpush2.bf16.msra.mxu0 %v3628_v17  ;;  %v3719_v17 = vld [vmem:[#allocation5 + $0x7c0] ss:$8 sps:$4 sm:$0xff]  }
 0x108   :  { %2313 = vmatprep.subr.bf16.mxu0 %v3636_v18  ;;  %v3727_v18 = vld [vmem:[#allocation5 + $0x7b4] ss:$8 sps:$4 sm:$0xff]  }
 0x109   :  { %2363 = vmatpush2.bf16.msra.mxu1 %v3631_v19  ;;  %v3722_v19 = vld [vmem:[#allocation5 + $0x6b0] ss:$8 sps:$4 sm:$0xff]  }
 0x10a   :  { %2364 = vmatprep.subr.bf16.mxu1 %v3639_v21  ;;  %v3725_v21 = vld [vmem:[#allocation5 + $0x7b0] ss:$8 sps:$4 sm:$0xff]  }
 0x10b   :  { %2314 = vmatpush2.bf16.msra.mxu0 %v3634_v20  ;;  %v3730_v20 = vld [vmem:[#allocation5 + $0x6a4] ss:$8 sps:$4 sm:$0xff]  }
 0x10c   :  { %2385 = vmatprep.subr.bf16.mxu0 %v3645_v23  ;;  %v3728_v23 = vld [vmem:[#allocation5 + $0x6a0] ss:$8 sps:$4 sm:$0xff]  }
 0x10d   :  { %2365 = vmatpush2.bf16.msra.mxu1 %v3637_v22  ;;  %v3733_v22 = vld [vmem:[#allocation5 + $0x7a4] ss:$8 sps:$4 sm:$0xff]  }
 0x10e   :  { %2316 = vmatmul.mubr.bf16.vlgmr.msra.gmra.mxu0 %v3640_v25  ;;  %2436 = vmatprep.subr.bf16.mxu1 %v3651_v27  ;;  %v3736_v25 = vld [vmem:[#allocation5 + $0x694] ss:$8 sps:$4 sm:$0xff]  }
 0x10f   :  { %2386 = vmatpush1.bf16.msra.mxu0 %v3643_v26  ;;  %2325 = vmatprep.mubr.bf16.mxu0 %v2979_v30  ;;  %v3731_v26 = vld [vmem:[#allocation5 + $0x7a0] ss:$8 sps:$4 sm:$0xff]   ;;  %v3739_v27 = vld [vmem:[#allocation5 + $0x794] ss:$8 sps:$4 sm:$0xff]   ;;  %v3742_v30 = vld [vmem:[#allocation5 + $0x684] ss:$8 sps:$4 sm:$0xff]  }
 0x110   :  { %2367 = vmatmul.mubr.bf16.vlgmr.msra.gmra.mxu1 %v3646_v29  ;;  %2387 = vmatprep.subr.bf16.mxu0 %v3654_v31  ;;  %v432_v29 = vshrl.u32 %v431_v24, 7  ;;  %v3737_v31 = vld [vmem:[#allocation5 + $0x790] ss:$8 sps:$4 sm:$0xff]  }
 0x111   :  { %2437 = vmatpush1.bf16.msra.mxu1 %v3649_v32  ;;  %2376 = vmatprep.mubr.bf16.mxu1 %v2981_v33  ;;  %v3745_v32 = vld [vmem:[#allocation5 + $0x784] ss:$8 sps:$4 sm:$0xff]   ;;  %v3740_v33 = vld [vmem:[#allocation5 + $0x680] ss:$8 sps:$4 sm:$0xff]  }
 0x112   :  { %2438 = vmatprep.subr.bf16.mxu1 %v3657_v34  ;;  %v4080_v34 = vsub.s32 0, %v432_v29 }
 0x113   :  { %2388 = vmatpush1.bf16.msra.mxu0 %v3652_v35  ;;  %v429_v35 = vld [vmem:[#allocation7] sm:$0x3] }
 0x114   :  { %2389 = vmatprep.subr.bf16.mxu0 %v3662_v36  ;;  %v3751_v36 = vld [vmem:[#allocation5 + $0x874] ss:$8 sps:$4 sm:$0xff]  }
 0x115   :  { %2439 = vmatpush1.bf16.msra.mxu1 %v3655_v37  ;;  %v131_v37 = vld [vmem:[#allocation3 + $0xc8] sm:$0xff] }
 0x116   :  { %2326 = vmatmul.mubr.bf16.gmra.mxu0 %v2978_v38  ;;  %2440 = vmatprep.subr.bf16.mxu1 %v3667_v40  ;;  %v3743_v38 = vld [vmem:[#allocation5 + $0x780] ss:$8 sps:$4 sm:$0xff]   ;;  %v3746_v40 = vld [vmem:[#allocation3 + $0x30] ss:$76 sps:$4 sm:$0xff]  }
 0x117   :  { %2390 = vmatpush1.bf16.msra.mxu0 %v3660_v39  ;;  %2417 = vmatprep.mubr.bf16.mxu0 %v3748_v41  ;;  %v4082_v39 = vsub.s32 1, %v432_v29  ;;  %v132_v41 = vld [vmem:[#allocation3 + $0xd0] sm:$0xff] }
 0x118   :  { %2377 = vmatmul.mubr.bf16.gmra.mxu1 %v2980_v42  ;;  %2391 = vmatprep.subr.bf16.mxu0 %v3670_v43  ;;  %v3797_v42 = vld [vmem:[#allocation5 + $0x924] ss:$8 sps:$4 sm:$0xff]   ;;  %v4085_v43 = vrot.slane %v429_v35, %v4080_v34 }
 0x119   :  { %2441 = vmatpush1.bf16.msra.mxu1 %v3665_v44  ;;  %2468 = vmatprep.mubr.bf16.mxu1 %v3754_v45  ;;  %v3749_v44 = vld [vmem:[#allocation5 + $0x870] ss:$8 sps:$4 sm:$0xff]   ;;  %v2983_v45 = vcombine.high %v131_v37, %v131_v37  ;;  %v3779_v29 = vld [vmem:[#allocation5 + $0x804] ss:$8 sps:$4 sm:$0xff]  }
 0x11a   :  { %2442 = vmatprep.subr.bf16.mxu1 %v3673_v46  ;;  %v3752_v46 = vld [vmem:[#allocation3 + $0x38] ss:$76 sps:$4 sm:$0xff]  }
 0x11b   :  { %2392 = vmatpush1.bf16.msra.mxu0 %v3668_v47  ;;  %v3757_v47 = vld [vmem:[#allocation5 + $0x864] ss:$8 sps:$4 sm:$0xff]  }
 0x11c   :  { %2393 = vmatprep.subr.bf16.mxu0 %v3676_v48  ;;  %v4088_v48 = vrot.slane %v429_v35, %v4082_v39 }
 0x11d   :  { %2443 = vmatpush1.bf16.msra.mxu1 %v3671_v49  ;;  %v2985_v49 = vcombine.high %v132_v41, %v132_v41 }
 0x11e   :  { %2444 = vmatprep.subr.bf16.mxu1 %v3679_v50  ;;  %v3795_v50 = vld [vmem:[#allocation5 + $0x920] ss:$8 sps:$4 sm:$0xff]  }
 0x11f   :  { %2394 = vmatpush1.bf16.msra.mxu0 %v3674_v51 }
 0x120   :  { %2395 = vmatprep.subr.bf16.mxu0 %v3682_v52  ;;  %v3803_v52 = vld [vmem:[#allocation5 + $0x914] ss:$8 sps:$4 sm:$0xff]  }
 0x121   :  { %2445 = vmatpush1.bf16.msra.mxu1 %v3677_v53 }
 0x122   :  { %2446 = vmatprep.subr.bf16.mxu1 %v3685_v54  ;;  %v3755_v54 = vld [vmem:[#allocation5 + $0x860] ss:$8 sps:$4 sm:$0xff]  }
 0x123   :  { %2396 = vmatpush1.bf16.msra.mxu0 %v3680_v55 }
 0x124   :  { %2397 = vmatprep.subr.bf16.mxu0 %v3688_v57  ;;  %v3762_v57 = vld [vmem:[#allocation5 + $0x854] ss:$8 sps:$4 sm:$0xff]  }
 0x125   :  { %2447 = vmatpush1.bf16.msra.mxu1 %v3683_v56 }
 0x126   :  { %2448 = vmatprep.subr.bf16.mxu1 %v3691_v58 }
 0x127   :  { %2398 = vmatpush1.bf16.msra.mxu0 %v3686_v59 }
 0x128   :  { %2399 = vmatprep.subr.bf16.mxu0 %v3694_v60  ;;  %v3801_v60 = vld [vmem:[#allocation5 + $0x910] ss:$8 sps:$4 sm:$0xff]  }
 0x129   :  { %2449 = vmatpush1.bf16.msra.mxu1 %v3689_v61 }
 0x12a   :  { %2450 = vmatprep.subr.bf16.mxu1 %v3697_v62 }
 0x12b   :  { %2400 = vmatpush1.bf16.msra.mxu0 %v3692_v63  ;;  %v2982_v63 = vcombine.low %v131_v37, %v131_v37 }
 0x12c   :  { %2401 = vmatprep.subr.bf16.mxu0 %v3700_v0  ;;  %v3809_v0 = vld [vmem:[#allocation5 + $0x904] ss:$8 sps:$4 sm:$0xff]  }
 0x12d   :  { %2451 = vmatpush1.bf16.msra.mxu1 %v3695_v1 }
 0x12e   :  { %2452 = vmatprep.subr.bf16.mxu1 %v3703_v2 }
 0x12f   :  { %2402 = vmatpush2.bf16.msra.mxu0 %v3698_v3  ;;  %v3760_v3 = vld [vmem:[#allocation5 + $0x850] ss:$8 sps:$4 sm:$0xff]  }
 0x130   :  { %2403 = vmatprep.subr.bf16.mxu0 %v3706_v4  ;;  %v3816_v4 = vld [vmem:[#allocation3 + $0x44] ss:$76 sps:$4 sm:$0xff]  }
 0x131   :  { %2453 = vmatpush2.bf16.msra.mxu1 %v3701_v5 }
 0x132   :  { %2454 = vmatprep.subr.bf16.mxu1 %v3709_v6 }
 0x133   :  { %2404 = vmatpush2.bf16.msra.mxu0 %v3704_v7  ;;  %v2984_v7 = vcombine.low %v132_v41, %v132_v41  ;;  %v3780_v41 = vld [vmem:[#allocation5 + $0x8f0] ss:$8 sps:$4 sm:$0xff]  }
 0x134   :  { %2405 = vmatprep.subr.bf16.mxu0 %v3712_v8  ;;  %v3767_v8 = vld [vmem:[#allocation5 + $0x844] ss:$8 sps:$4 sm:$0xff]  }
 0x135   :  { %2455 = vmatpush2.bf16.msra.mxu1 %v3707_v9 }
 0x136   :  { %2456 = vmatprep.subr.bf16.mxu1 %v3715_v10 }
 0x137   :  { %2406 = vmatpush2.bf16.msra.mxu0 %v3710_v11  ;;  %v3807_v11 = vld [vmem:[#allocation5 + $0x900] ss:$8 sps:$4 sm:$0xff]  }
 0x138   :  { %2407 = vmatprep.subr.bf16.mxu0 %v3718_v12 }
 0x139   :  { %2457 = vmatpush2.bf16.msra.mxu1 %v3713_v13 }
 0x13a   :  { %2458 = vmatprep.subr.bf16.mxu1 %v3721_v14  ;;  %v3765_v14 = vld [vmem:[#allocation5 + $0x840] ss:$8 sps:$4 sm:$0xff]  }
 0x13b   :  { %2408 = vmatpush2.bf16.msra.mxu0 %v3716_v15  ;;  %v3770_v15 = vld [vmem:[#allocation5 + $0x834] ss:$8 sps:$4 sm:$0xff]  }
 0x13c   :  { %2409 = vmatprep.subr.bf16.mxu0 %v3724_v16  ;;  %v4018_v16 = vmov 0  }
 0x13d   :  { %2459 = vmatpush2.bf16.msra.mxu1 %v3719_v17  ;;  %v3768_v17 = vld [vmem:[#allocation5 + $0x830] ss:$8 sps:$4 sm:$0xff]  }
 0x13e   :  { %2460 = vmatprep.subr.bf16.mxu1 %v3727_v18  ;;  %v3773_v18 = vld [vmem:[#allocation5 + $0x824] ss:$8 sps:$4 sm:$0xff]  }
 0x13f   :  { %2410 = vmatpush2.bf16.msra.mxu0 %v3722_v19  ;;  %v3813_v19 = vld [vmem:[#allocation3 + $0x48] ss:$76 sps:$4 sm:$0xff]  }
 0x140   :  { %2411 = vmatprep.subr.bf16.mxu0 %v3730_v20 }
 0x141   :  { %2461 = vmatpush2.bf16.msra.mxu1 %v3725_v21  ;;  %v3771_v21 = vld [vmem:[#allocation5 + $0x820] ss:$8 sps:$4 sm:$0xff]  }
 0x142   :  { %2462 = vmatprep.subr.bf16.mxu1 %v3733_v22  ;;  %v3776_v22 = vld [vmem:[#allocation5 + $0x814] ss:$8 sps:$4 sm:$0xff]  }
 0x143   :  { %2412 = vmatpush2.bf16.msra.mxu0 %v3728_v23 }
 0x144   :  { %2413 = vmatprep.subr.bf16.mxu0 %v3736_v25 }
 0x145   :  { %2463 = vmatpush2.bf16.msra.mxu1 %v3731_v26 }
 0x146   :  { %2464 = vmatprep.subr.bf16.mxu1 %v3739_v27  ;;  %v3774_v27 = vld [vmem:[#allocation5 + $0x810] ss:$8 sps:$4 sm:$0xff]  }
 0x147   :  { %2414 = vmatpush2.bf16.msra.mxu0 %v3734_v28 }
 0x148   :  { %2415 = vmatprep.subr.bf16.mxu0 %v3742_v30 }
 0x149   :  { %2465 = vmatpush2.bf16.msra.mxu1 %v3737_v31 }
 0x14a   :  { %2466 = vmatprep.subr.bf16.mxu1 %v3745_v32  ;;  %v3819_v32 = vld [vmem:[#allocation3 + $0xe0] ss:$0 sps:$4 sm:$0xff]  }
 0x14b   :  { %2416 = vmatpush2.bf16.msra.mxu0 %v3740_v33 }
 0x14c   :  { %2487 = vmatprep.subr.bf16.mxu0 %v3751_v36  ;;  %v3777_v36 = vld [vmem:[#allocation5 + $0x800] ss:$8 sps:$4 sm:$0xff]  }
 0x14d   :  { %2467 = vmatpush2.bf16.msra.mxu1 %v3743_v38  ;;  %v3782_v38 = vld [vmem:[#allocation5 + $0x8f4] ss:$8 sps:$4 sm:$0xff]  }
 0x14e   :  { %v2113_v51 = vpop.f32.mrf.mxu0  ;;  %2418 = vmatmul.mubr.bf16.vlgmr.msra.gmra.mxu0 %v3746_v40  ;;  %2548 = vmatprep.subr.bf16.mxu1 %v3797_v42  ;;  %v3785_v42 = vld [vmem:[#allocation5 + $0x8e4] ss:$8 sps:$4 sm:$0xff]  }
 0x14f   :  { %v2114_v53 = vadd.f32 %v2113_v51, %v4085_v43  ;;  %2488 = vmatpush1.bf16.msra.mxu0 %v3749_v44  ;;  %2427 = vmatprep.mubr.bf16.mxu0 %v2983_v45  ;;  %v2164_v56 = vpop.f32.mrf.mxu1  ;;  %v3788_v44 = vld [vmem:[#allocation5 + $0x8d4] ss:$8 sps:$4 sm:$0xff]   ;;  %v3786_v45 = vld [vmem:[#allocation5 + $0x8d0] ss:$8 sps:$4 sm:$0xff]   ;;  %v3798_v51 = vld [vmem:[#allocation5 + $0x8a0] ss:$8 sps:$4 sm:$0xff]  }
 0x150   :  { %v2115_v55 = vpop.f32.mrf.mxu0  ;;  %2469 = vmatmul.mubr.bf16.vlgmr.msra.gmra.mxu1 %v3752_v46  ;;  %2489 = vmatprep.subr.bf16.mxu0 %v3757_v47  ;;  %v3791_v46 = vld [vmem:[#allocation5 + $0x8c4] ss:$8 sps:$4 sm:$0xff]   ;;  %v3789_v47 = vld [vmem:[#allocation5 + $0x8c0] ss:$8 sps:$4 sm:$0xff]  }
 0x151   :  { %v2116_v58 = vadd.f32 %v2115_v55, %v4088_v48  ;;  %v4092_v59 = vadd.f32 %v2164_v56, %v2114_v53  ;;  %2478 = vmatprep.mubr.bf16.mxu1 %v2985_v49  ;;  %2549 = vmatpush1.bf16.msra.mxu1 %v3795_v50  ;;  %v2166_v62 = vpop.f32.mrf.mxu1  ;;  %v3792_v49 = vld [vmem:[#allocation5 + $0x8b0] ss:$8 sps:$4 sm:$0xff]   ;;  %v3800_v50 = vld [vmem:[#allocation5 + $0x8a4] ss:$8 sps:$4 sm:$0xff]   ;;  %v3810_v55 = vld [vmem:[#allocation5 + $0x880] ss:$8 sps:$4 sm:$0xff]  }
 0x152   :  { %v2117_v61 = vpop.f32.mrf.mxu0  ;;  %2550 = vmatprep.subr.bf16.mxu1 %v3803_v52  ;;  %v3806_v52 = vld [vmem:[#allocation5 + $0x894] ss:$8 sps:$4 sm:$0xff]   ;;  %v3804_v53 = vld [vmem:[#allocation5 + $0x890] ss:$8 sps:$4 sm:$0xff]  }
 0x153   :  { %v2118_v1 = vadd.f32 %v2117_v61, %v4085_v43  ;;  %v4095_v2 = vadd.f32 %v2166_v62, %v2116_v58  ;;  %2490 = vmatpush1.bf16.msra.mxu0 %v3755_v54  ;;  %v2168_v6 = vpop.f32.mrf.mxu1  ;;  %v3812_v54 = vld [vmem:[#allocation5 + $0x884] ss:$8 sps:$4 sm:$0xff]   ;;  %v133_v56 = vld [vmem:[#allocation3 + $0xd8] sm:$0xff] }
 0x154   :  { %v2119_v5 = vpop.f32.mrf.mxu0  ;;  %2491 = vmatprep.subr.bf16.mxu0 %v3762_v57  ;;  %v3814_v57 = vld [vmem:[#allocation3 + $0x40] ss:$76 sps:$4 sm:$0xff]   ;;  %v2987_v58 = vcombine.high %v133_v56, %v133_v56 }
 0x155   :  { %v2120_v9 = vadd.f32 %v2119_v5, %v4088_v48  ;;  %v4098_v10 = vadd.f32 %v2168_v6, %v2118_v1  ;;  %2551 = vmatpush1.bf16.msra.mxu1 %v3801_v60  ;;  %v2170_v12 = vpop.f32.mrf.mxu1  ;;  %v2986_v5 = vcombine.low %v133_v56, %v133_v56 }
 0x156   :  { %2428 = vmatmul.mubr.bf16.gmra.mxu0 %v2982_v63  ;;  %2552 = vmatprep.subr.bf16.mxu1 %v3809_v0  ;;  %v2123_v20 = vpop.f32.mrf.mxu0 }
 0x157   :  { %v4100_v13 = vadd.f32 %v2170_v12, %v2120_v9  ;;  %2492 = vmatpush1.bf16.msra.mxu0 %v3760_v3  ;;  %2519 = vmatprep.mubr.bf16.mxu0 %v3816_v4  ;;  %v2124_v23 = vadd.f32 %v2123_v20, %v4085_v43  ;;  %v2174_v28 = vpop.f32.mrf.mxu1  ;;  %v3783_v43 = vld [vmem:[#allocation5 + $0x8e0] ss:$8 sps:$4 sm:$0xff]  }
 0x158   :  { %2479 = vmatmul.mubr.bf16.gmra.mxu1 %v2984_v7  ;;  %2493 = vmatprep.subr.bf16.mxu0 %v3767_v8  ;;  %v2125_v24 = vpop.f32.mrf.mxu0 }
 0x159   :  { %2553 = vmatpush1.bf16.msra.mxu1 %v3807_v11  ;;  %2570 = vmatprep.mubr.bf16.mxu1 %v4018_v16  ;;  %v2126_v25 = vadd.f32 %v2125_v24, %v4088_v48  ;;  %v4105_v31 = vadd.f32 %v2174_v28, %v2124_v23  ;;  %v2176_v33 = vpop.f32.mrf.mxu1  ;;  %v3794_v48 = vld [vmem:[#allocation5 + $0x8b4] ss:$8 sps:$4 sm:$0xff]   ;;  %v3828_v28 = vld [vmem:[#allocation8 + $0x54] ss:$8 sps:$4 sm:$0xff]  }
 0x15a   :  { %v2127_v26 = vpop.f32.mrf.mxu0 }
 0x15b   :  { %2494 = vmatpush1.bf16.msra.mxu0 %v3765_v14  ;;  %v4107_v35 = vadd.f32 %v2176_v33, %v2126_v25  ;;  %v2178_v37 = vpop.f32.mrf.mxu1  ;;  %v3825_v25 = vld [vmem:[#allocation8 + $0x64] ss:$8 sps:$4 sm:$0xff]   ;;  %v3832_v33 = vld [vmem:[#allocation8 + $0x30] ss:$8 sps:$4 sm:$0xff]  }
 0x15c   :  { %2495 = vmatprep.subr.bf16.mxu0 %v3770_v15  ;;  %v2128_v30 = vpop.f32.mrf.mxu0  ;;  %v3840_v37 = vld [vmem:[#allocation8 + $0x14] ss:$8 sps:$4 sm:$0xff]  }
 0x15d   :  { %v2179_v40 = vpop.f32.mrf.mxu1  ;;  %v3831_v30 = vld [vmem:[#allocation8 + $0x44] ss:$8 sps:$4 sm:$0xff]  }
 0x15e   :  { %v3843_v40 = vld [vmem:[#allocation8 + $0x4] ss:$8 sps:$4 sm:$0xff]  }
 0x15f   :  { %2496 = vmatpush1.bf16.msra.mxu0 %v3768_v17 }
 0x160   :  { %2497 = vmatprep.subr.bf16.mxu0 %v3773_v18  ;;  %3283 = vmatmul.mubr.msk.bf16.vlgmr.msra.gmra.mxu1 %vm2072_vm0, %v3813_v19 }
 0x161   :  { %2580 = vmatprep.mubr.bf16.mxu1 %v4018_v16 }
 0x163   :  { %2498 = vmatpush1.bf16.msra.mxu0 %v3771_v21 }
 0x164   :  { %2499 = vmatprep.subr.bf16.mxu0 %v3776_v22  ;;  %v3822_v22 = vld [vmem:[#allocation8 + $0x74] ss:$8 sps:$4 sm:$0xff]  }
 0x165   :  { %2815 = vmatprep.subr.bf16.mxu1 %v3822_v22 }
 0x167   :  { %2500 = vmatpush1.bf16.msra.mxu0 %v3774_v27  ;;  %v3823_v27 = vld [vmem:[#allocation8 + $0x60] ss:$8 sps:$4 sm:$0xff]  }
 0x168   :  { %2501 = vmatprep.subr.bf16.mxu0 %v3779_v29  ;;  %3284 = vmatmul.mubr.msk.bf16.gmra.mxu1 %vm2072_vm0, %v3819_v32  ;;  %v3826_v29 = vld [vmem:[#allocation8 + $0x50] ss:$8 sps:$4 sm:$0xff]   ;;  %v3834_v32 = vld [vmem:[#allocation8 + $0x34] ss:$8 sps:$4 sm:$0xff]  }
 0x16b   :  { %2502 = vmatpush1.bf16.msra.mxu0 %v3777_v36  ;;  %v3835_v36 = vld [vmem:[#allocation8 + $0x20] ss:$8 sps:$4 sm:$0xff]  }
 0x16c   :  { %2503 = vmatprep.subr.bf16.mxu0 %v3782_v38  ;;  %v3838_v38 = vld [vmem:[#allocation8 + $0x10] ss:$8 sps:$4 sm:$0xff]  }
 0x16f   :  { %2504 = vmatpush2.bf16.msra.mxu0 %v3780_v41  ;;  %v3841_v41 = vld [vmem:[#allocation8] ss:$8 sps:$4 sm:$0xff]  }
 0x170   :  { %2505 = vmatprep.subr.bf16.mxu0 %v3785_v42  ;;  %v3846_v42 = vld [vmem:[#allocation8 + $0xf4] ss:$8 sps:$4 sm:$0xff]  }
 0x173   :  { %2506 = vmatpush2.bf16.msra.mxu0 %v3783_v43  ;;  %v3844_v43 = vld [vmem:[#allocation8 + $0xf0] ss:$8 sps:$4 sm:$0xff]  }
 0x174   :  { %2507 = vmatprep.subr.bf16.mxu0 %v3788_v44  ;;  %v3849_v44 = vld [vmem:[#allocation8 + $0xe4] ss:$8 sps:$4 sm:$0xff]  }
 0x177   :  { %2508 = vmatpush2.bf16.msra.mxu0 %v3786_v45  ;;  %v3847_v45 = vld [vmem:[#allocation8 + $0xe0] ss:$8 sps:$4 sm:$0xff]  }
 0x178   :  { %2509 = vmatprep.subr.bf16.mxu0 %v3791_v46  ;;  %v3852_v46 = vld [vmem:[#allocation8 + $0xd4] ss:$8 sps:$4 sm:$0xff]  }
 0x17b   :  { %2510 = vmatpush2.bf16.msra.mxu0 %v3789_v47  ;;  %v3850_v47 = vld [vmem:[#allocation8 + $0xd0] ss:$8 sps:$4 sm:$0xff]  }
 0x17c   :  { %2511 = vmatprep.subr.bf16.mxu0 %v3794_v48  ;;  %v3855_v48 = vld [vmem:[#allocation8 + $0xc4] ss:$8 sps:$4 sm:$0xff]  }
 0x17f   :  { %2512 = vmatpush2.bf16.msra.mxu0 %v3792_v49  ;;  %v3853_v49 = vld [vmem:[#allocation8 + $0xc0] ss:$8 sps:$4 sm:$0xff]  }
 0x180   :  { %2513 = vmatprep.subr.bf16.mxu0 %v3800_v50  ;;  %v3858_v50 = vld [vmem:[#allocation8 + $0xb4] ss:$8 sps:$4 sm:$0xff]  }
 0x183   :  { %2514 = vmatpush2.bf16.msra.mxu0 %v3798_v51 }
 0x184   :  { %2515 = vmatprep.subr.bf16.mxu0 %v3806_v52  ;;  %v3856_v52 = vld [vmem:[#allocation8 + $0xb0] ss:$8 sps:$4 sm:$0xff]  }
 0x187   :  { %2516 = vmatpush2.bf16.msra.mxu0 %v3804_v53 }
 0x188   :  { %2517 = vmatprep.subr.bf16.mxu0 %v3812_v54 }
 0x18b   :  { %2518 = vmatpush2.bf16.msra.mxu0 %v3810_v55 }
 0x18e   :  { %v2215_v60 = vpop.f32.mrf.mxu0  ;;  %2520 = vmatmul.mubr.bf16.vlgmr.msra.gmra.mxu0 %v3814_v57 }
 0x18f   :  { %v2216_v61 = vadd.f32 %v2215_v60, %v4092_v59  ;;  %2529 = vmatprep.mubr.bf16.mxu0 %v2987_v58  ;;  %v3861_v58 = vld [vmem:[#allocation8 + $0xa4] ss:$8 sps:$4 sm:$0xff]  }
 0x190   :  { %v2217_v62 = vpop.f32.mrf.mxu0  ;;  %v2266_v63 = vpop.f32.mrf.mxu1 }
 0x191   :  { %v2218_v0 = vadd.f32 %v2217_v62, %v4095_v2  ;;  %v4112_v1 = vadd.f32 %v2266_v63, %v2216_v61  ;;  %v3859_v62 = vld [vmem:[#allocation8 + $0xa0] ss:$8 sps:$4 sm:$0xff]  }
 0x192   :  { %v2219_v3 = vpop.f32.mrf.mxu0  ;;  %v2268_v4 = vpop.f32.mrf.mxu1 }
 0x193   :  { %v2220_v6 = vadd.f32 %v2219_v3, %v4098_v10  ;;  %v4115_v7 = vadd.f32 %v2268_v4, %v2218_v0 }
 0x194   :  { %v2221_v8 = vpop.f32.mrf.mxu0  ;;  %v2270_v9 = vpop.f32.mrf.mxu1 }
 0x195   :  { %v2222_v11 = vadd.f32 %v2221_v8, %v4100_v13  ;;  %v4118_v12 = vadd.f32 %v2270_v9, %v2220_v6  ;;  %v3820_v13 = vld [vmem:[#allocation8 + $0x70] ss:$8 sps:$4 sm:$0xff]   ;;  %v3864_v9 = vld [vmem:[#allocation8 + $0x94] ss:$8 sps:$4 sm:$0xff]  }
 0x196   :  { %v2225_v59 = vpop.f32.mrf.mxu0  ;;  %v2272_v14 = vpop.f32.mrf.mxu1  ;;  %2530 = vmatmul.mubr.bf16.gmra.mxu0 %v2986_v5  ;;  %2816 = vmatpush1.bf16.msra.mxu1 %v3820_v13 }
 0x197   :  { %v2226_v2 = vadd.f32 %v2225_v59, %v4105_v31  ;;  %v4121_v15 = vadd.f32 %v2272_v14, %v2222_v11  ;;  %2817 = vmatprep.subr.bf16.mxu1 %v3825_v25  ;;  %v3829_v31 = vld [vmem:[#allocation8 + $0x40] ss:$8 sps:$4 sm:$0xff]   ;;  %v3862_v59 = vld [vmem:[#allocation8 + $0x90] ss:$8 sps:$4 sm:$0xff]  }
 0x198   :  { %v2227_v16 = vpop.f32.mrf.mxu0  ;;  %v2276_v17 = vpop.f32.mrf.mxu1 }
 0x199   :  { %v2228_v18 = vadd.f32 %v2227_v16, %v4107_v35  ;;  %v4124_v10 = vadd.f32 %v2276_v17, %v2226_v2  ;;  %v3837_v35 = vld [vmem:[#allocation8 + $0x24] ss:$8 sps:$4 sm:$0xff]  }
 0x19a   :  { %v2278_v19 = vpop.f32.mrf.mxu1  ;;  %v2229_v20 = vpop.f32.mrf.mxu0  ;;  %2818 = vmatpush1.bf16.msra.mxu1 %v3823_v27 }
 0x19b   :  { %v4126_v21 = vadd.f32 %v2278_v19, %v2228_v18  ;;  %2819 = vmatprep.subr.bf16.mxu1 %v3828_v28  ;;  %v3867_v19 = vld [vmem:[#allocation8 + $0x84] ss:$8 sps:$4 sm:$0xff]  }
 0x19c   :  { %v2230_v23 = vpop.f32.mrf.mxu0  ;;  %v2280_v24 = vpop.f32.mrf.mxu1 }
 0x19e   :  { %v2281_v26 = vpop.f32.mrf.mxu1  ;;  %2820 = vmatpush1.bf16.msra.mxu1 %v3826_v29 }
 0x19f   :  { %2821 = vmatprep.subr.bf16.mxu1 %v3831_v30 }
 0x1a2   :  { %2822 = vmatpush1.bf16.msra.mxu1 %v3829_v31 }
 0x1a3   :  { %2823 = vmatprep.subr.bf16.mxu1 %v3834_v32 }
 0x1a6   :  { %2824 = vmatpush1.bf16.msra.mxu1 %v3832_v33 }
 0x1a7   :  { %2825 = vmatprep.subr.bf16.mxu1 %v3837_v35 }
 0x1aa   :  { %2826 = vmatpush1.bf16.msra.mxu1 %v3835_v36 }
 0x1ab   :  { %2827 = vmatprep.subr.bf16.mxu1 %v3840_v37 }
 0x1ae   :  { %2828 = vmatpush1.bf16.msra.mxu1 %v3838_v38 }
 0x1af   :  { %2829 = vmatprep.subr.bf16.mxu1 %v3843_v40 }
 0x1b2   :  { %2830 = vmatpush1.bf16.msra.mxu1 %v3841_v41 }
 0x1b3   :  { %2831 = vmatprep.subr.bf16.mxu1 %v3846_v42 }
 0x1b6   :  { %2832 = vmatpush2.bf16.msra.mxu1 %v3844_v43 }
 0x1b7   :  { %2833 = vmatprep.subr.bf16.mxu1 %v3849_v44 }
 0x1ba   :  { %2834 = vmatpush2.bf16.msra.mxu1 %v3847_v45 }
 0x1bb   :  { %2835 = vmatprep.subr.bf16.mxu1 %v3852_v46 }
 0x1be   :  { %2836 = vmatpush2.bf16.msra.mxu1 %v3850_v47 }
 0x1bf   :  { %2837 = vmatprep.subr.bf16.mxu1 %v3855_v48 }
 0x1c2   :  { %2838 = vmatpush2.bf16.msra.mxu1 %v3853_v49 }
 0x1c3   :  { %2839 = vmatprep.subr.bf16.mxu1 %v3858_v50 }
 0x1c6   :  { %2840 = vmatpush2.bf16.msra.mxu1 %v3856_v52 }
 0x1c7   :  { %2841 = vmatprep.subr.bf16.mxu1 %v3861_v58 }
 0x1ca   :  { %2842 = vmatpush2.bf16.msra.mxu1 %v3859_v62 }
 0x1cb   :  { %2843 = vmatprep.subr.bf16.mxu1 %v3864_v9 }
 0x1ce   :  { %v2317_v51 = vpop.f32.mrf.mxu0  ;;  %2844 = vmatpush2.bf16.msra.mxu1 %v3862_v59 }
 0x1cf   :  { %v2318_v53 = vadd.f32 %v2317_v51, %v4112_v1  ;;  %2845 = vmatprep.subr.bf16.mxu1 %v3867_v19 }
 0x1d0   :  { %v2319_v54 = vpop.f32.mrf.mxu0  ;;  %v2368_v55 = vpop.f32.mrf.mxu1 }
 0x1d1   :  { %v2320_v56 = vadd.f32 %v2319_v54, %v4115_v7  ;;  %v2369_v57 = vadd.f32 %v2368_v55, %v2318_v53 }
 0x1d2   :  { %v2321_v60 = vpop.f32.mrf.mxu0  ;;  %v2370_v61 = vpop.f32.mrf.mxu1 }
 0x1d3   :  { %v2322_v63 = vadd.f32 %v2321_v60, %v4118_v12  ;;  %v2371_v0 = vadd.f32 %v2370_v61, %v2320_v56 }
 0x1d4   :  { %v2323_v3 = vpop.f32.mrf.mxu0  ;;  %v2372_v4 = vpop.f32.mrf.mxu1 }
 0x1d5   :  { %v2324_v1 = vadd.f32 %v2323_v3, %v4121_v15  ;;  %v2373_v5 = vadd.f32 %v2372_v4, %v2322_v63  ;;  %v3865_v15 = vld [vmem:[#allocation8 + $0x80] ss:$8 sps:$4 sm:$0xff]  }
 0x1d6   :  { %v2327_v6 = vpop.f32.mrf.mxu0  ;;  %v2374_v8 = vpop.f32.mrf.mxu1  ;;  %2846 = vmatpush2.bf16.msra.mxu1 %v3865_v15 }
 0x1d7   :  { %v2328_v7 = vadd.f32 %v2327_v6, %v4124_v10  ;;  %v2375_v11 = vadd.f32 %v2374_v8, %v2324_v1 }
 0x1d8   :  { %v2329_v14 = vpop.f32.mrf.mxu0  ;;  %v2378_v2 = vpop.f32.mrf.mxu1 }
 0x1d9   :  { %v2330_v12 = vadd.f32 %v2329_v14, %v4126_v21  ;;  %v2379_v16 = vadd.f32 %v2378_v2, %v2328_v7 }
 0x1da   :  { %v2380_v17 = vpop.f32.mrf.mxu1  ;;  %v2331_v18 = vpop.f32.mrf.mxu0 }
 0x1db   :  { %v2381_v20 = vadd.f32 %v2380_v17, %v2330_v12 }
 0x1dc   :  { %v2332_v13 = vpop.f32.mrf.mxu0  ;;  %v2382_v22 = vpop.f32.mrf.mxu1 }
 0x1de   :  { %v2383_v23 = vpop.f32.mrf.mxu1 }
 0x20e   :  { %v2419_v10 = vpop.f32.mrf.mxu0 }
 0x20f   :  { %v2420_v24 = vadd.f32 %v2419_v10, %v2369_v57 }
 0x210   :  { %v2421_v25 = vpop.f32.mrf.mxu0  ;;  %v2470_v26 = vpop.f32.mrf.mxu1 }
 0x211   :  { %v2422_v27 = vadd.f32 %v2421_v25, %v2371_v0  ;;  %v2471_v28 = vadd.f32 %v2470_v26, %v2420_v24 }
 0x212   :  { %v2423_v29 = vpop.f32.mrf.mxu0  ;;  %v2472_v21 = vpop.f32.mrf.mxu1 }
 0x213   :  { %v2424_v30 = vadd.f32 %v2423_v29, %v2373_v5  ;;  %v2473_v31 = vadd.f32 %v2472_v21, %v2422_v27 }
 0x214   :  { %v2425_v32 = vpop.f32.mrf.mxu0  ;;  %v2474_v33 = vpop.f32.mrf.mxu1 }
 0x215   :  { %v2475_v35 = vadd.f32 %v2474_v33, %v2424_v30  ;;  %v2426_v58 = vadd.f32 %v2425_v32, %v2375_v11  ;;  %v2643_v32 = vld [vmem:[#allocation10] sm:$0x3] }
 0x216   :  { %v2429_v36 = vpop.f32.mrf.mxu0  ;;  %v2476_v37 = vpop.f32.mrf.mxu1  ;;  %v2648_v33 = vrot.slane %v2643_v32, %v4080_v34 }
 0x217   :  { %v2430_v38 = vadd.f32 %v2429_v36, %v2379_v16  ;;  %v2477_v4 = vadd.f32 %v2476_v37, %v2426_v58 }
 0x218   :  { %v2431_v40 = vpop.f32.mrf.mxu0  ;;  %v2480_v41 = vpop.f32.mrf.mxu1 }
 0x219   :  { %v2481_v42 = vadd.f32 %v2480_v41, %v2430_v38  ;;  %v2432_v0 = vadd.f32 %v2431_v40, %v2381_v20  ;;  %v2884_v38 = vld [vmem:[#allocation11] sm:$0x3] }
 0x21a   :  { %v2482_v43 = vpop.f32.mrf.mxu1  ;;  %v2433_v44 = vpop.f32.mrf.mxu0 }
 0x21b   :  { %v2483_v59 = vadd.f32 %v2482_v43, %v2432_v0  ;;  %v2889_v44 = vrot.slane %v2884_v38, %v4080_v34 }
 0x21c   :  { %v2434_v45 = vpop.f32.mrf.mxu0  ;;  %v2484_v46 = vpop.f32.mrf.mxu1 }
 0x21d   :  { %v2893_v45 = vrot.slane %v2884_v38, %v4082_v39 }
 0x21e   :  { %v2485_v47 = vpop.f32.mrf.mxu1 }
 0x220   :  { %v2572_v48 = vpop.f32.mrf.mxu1 }
 0x222   :  { %v2574_v49 = vpop.f32.mrf.mxu1 }
 0x224   :  { %v2576_v50 = vpop.f32.mrf.mxu1 }
 0x226   :  { %v2578_v51 = vpop.f32.mrf.mxu1 }
 0x228   :  { %v2582_v52 = vpop.f32.mrf.mxu1 }
 0x22a   :  { %v2584_v53 = vpop.f32.mrf.mxu1 }
 0x22c   :  { %v2586_v54 = vpop.f32.mrf.mxu1 }
 0x22e   :  { %v2587_v55 = vpop.f32.mrf.mxu1 }
 0x24e   :  { %v2521_v56 = vpop.f32.mrf.mxu0 }
 0x24f   :  { %v2522_v57 = vadd.f32 %v2521_v56, %v2471_v28 }
 0x250   :  { %v2523_v60 = vpop.f32.mrf.mxu0 }
 0x251   :  { %v2573_v61 = vadd.f32 %v2572_v48, %v2522_v57  ;;  %v2524_v62 = vadd.f32 %v2523_v60, %v2473_v31 }
 0x252   :  { %v2525_v63 = vpop.f32.mrf.mxu0 }
 0x253   :  { %v2526_v3 = vadd.f32 %v2525_v63, %v2475_v35  ;;  %v2575_v1 = vadd.f32 %v2574_v49, %v2524_v62  ;;  %v2595_v6 = vmul.f32 0.02, %v2573_v61  ;;  %vm2589_vm1 = vcmp.gt.f32.partialorder %v2573_v61, 0.0 }
 0x254   :  { %v2527_v5 = vpop.f32.mrf.mxu0  ;;  %v2652_v35 = vrot.slane %v2643_v32, %v4082_v39 }
 0x255   :  { %v2577_v8 = vadd.f32 %v2576_v50, %v2526_v3  ;;  %v2528_v9 = vadd.f32 %v2527_v5, %v2477_v4  ;;  %v2596_v12 = vmul.f32 0.02, %v2575_v1  ;;  %v2601_v17 = vsel %vm2589_vm1, %v2573_v61, %v2595_v6 }
 0x256   :  { %v2531_v7 = vpop.f32.mrf.mxu0  ;;  %vm2590_vm3 = vcmp.gt.f32.partialorder %v2575_v1, 0.0 }
 0x257   :  { %vm2591_vm2 = vcmp.gt.f32.partialorder %v2577_v8, 0.0  ;;  %v2597_v14 = vmul.f32 0.02, %v2577_v8  ;;  %v2532_v2 = vadd.f32 %v2531_v7, %v2481_v42  ;;  %v2579_v11 = vadd.f32 %v2578_v51, %v2528_v9 }
 0x258   :  { %v2533_v16 = vpop.f32.mrf.mxu0  ;;  %v2602_v24 = vsel %vm2590_vm3, %v2575_v1, %v2596_v12 }
 0x259   :  { %v2603_v18 = vsel %vm2591_vm2, %v2577_v8, %v2597_v14  ;;  %v2534_v19 = vadd.f32 %v2533_v16, %v2483_v59  ;;  %vm2592_vm4 = vcmp.gt.f32.partialorder %v2579_v11, 0.0  ;;  %v2598_v15 = vmul.f32 0.02, %v2579_v11  ;;  %v3317_v14 = vld [vmem:[#allocation2] ss:$0 sm:$0xff] }
 0x25a   :  { %v2607_v20 = vpack.c.bf16 %v2603_v18, %v2601_v17  ;;  %v2535_v13 = vpop.f32.mrf.mxu0  ;;  %v2583_v22 = vadd.f32 %v2582_v52, %v2532_v2 }
 0x25b   :  { %v2585_v23 = vadd.f32 %v2584_v53, %v2534_v19  ;;  %v2604_v25 = vsel %vm2592_vm4, %v2579_v11, %v2598_v15 }
 0x25c   :  { %v2536_v10 = vpop.f32.mrf.mxu0  ;;  %v2608_v27 = vpack.c.bf16 %v2604_v25, %v2602_v24  ;;  %v2599_v28 = vmul.f32 0.02, %v2583_v22  ;;  %vm2593_vm6 = vcmp.gt.f32.partialorder %v2583_v22, 0.0 }
 0x25d   :  { %vm2594_vm5 = vcmp.gt.f32.partialorder %v2585_v23, 0.0  ;;  %v2600_v26 = vmul.f32 0.02, %v2585_v23 }
 0x25e   :  { %2847 = vmatprep.mubr.bf16.mxu1 %v2608_v27  ;;  %v2605_v30 = vsel %vm2593_vm6, %v2583_v22, %v2599_v28 }
 0x25f   :  { %v2606_v29 = vsel %vm2594_vm5, %v2585_v23, %v2600_v26  ;;  %2848 = vmatmul.mubr.bf16.vlgmr.msra.gmra.mxu1 %v2607_v20  ;;  %v2609_v31 = vpack.c.bf16 %v2605_v30, %v2605_v30 }
 0x260   :  { %v2610_v21 = vpack.c.bf16 %v2606_v29, %v2606_v29 }
 0x262   :  { %2857 = vmatprep.mubr.bf16.mxu1 %v2610_v21 }
 0x267   :  { %2858 = vmatmul.mubr.bf16.gmra.mxu1 %v2609_v31 }
 0x31f   :  { %v2849_v36 = vpop.f32.mrf.mxu1 }
 0x320   :  { %v2850_v37 = vadd.f32 %v2849_v36, %v2648_v33 }
 0x321   :  { %v2851_v40 = vpop.f32.mrf.mxu1 }
 0x322   :  { %vm2866_vm7 = vcmp.gt.f32.partialorder %v2850_v37, 0.0  ;;  %v2872_v41 = vmul.f32 0.02, %v2850_v37  ;;  %v2852_v42 = vadd.f32 %v2851_v40, %v2652_v35 }
 0x323   :  { %v2853_v43 = vpop.f32.mrf.mxu1 }
 0x324   :  { %vm2867_vm8 = vcmp.gt.f32.partialorder %v2852_v42, 0.0  ;;  %v2873_v46 = vmul.f32 0.02, %v2852_v42  ;;  %v2854_v47 = vadd.f32 %v2853_v43, %v2648_v33  ;;  %v2878_v48 = vsel %vm2866_vm7, %v2850_v37, %v2872_v41 }
 0x325   :  { %v2855_v49 = vpop.f32.mrf.mxu1  ;;  %v2896_v54 = vmul.f32 %v2889_v44, %v2878_v48 }
 0x326   :  { %vm2868_vm9 = vcmp.gt.f32.partialorder %v2854_v47, 0.0  ;;  %v2874_v50 = vmul.f32 0.02, %v2854_v47  ;;  %v2856_v51 = vadd.f32 %v2855_v49, %v2652_v35  ;;  %v2879_v52 = vsel %vm2867_vm8, %v2852_v42, %v2873_v46 }
 0x327   :  { %v2859_v53 = vpop.f32.mrf.mxu1  ;;  %v2897_v55 = vmul.f32 %v2893_v45, %v2879_v52 }
 0x328   :  { %vm2869_vm10 = vcmp.gt.f32.partialorder %v2856_v51, 0.0  ;;  %v2875_v56 = vmul.f32 0.02, %v2856_v51  ;;  %v2860_v57 = vadd.f32 %v2859_v53, %v2648_v33  ;;  %v2880_v58 = vsel %vm2868_vm9, %v2854_v47, %v2874_v50 }
 0x329   :  { %v2861_v60 = vpop.f32.mrf.mxu1  ;;  %v2902_v34 = vadd.f32 %v2897_v55, %v2896_v54  ;;  %v2898_v0 = vmul.f32 %v2889_v44, %v2880_v58 }
 0x32a   :  { %vm2870_vm11 = vcmp.gt.f32.partialorder %v2860_v57, 0.0  ;;  %v2876_v39 = vmul.f32 0.02, %v2860_v57  ;;  %v2862_v61 = vadd.f32 %v2861_v60, %v2652_v35  ;;  %v2881_v62 = vsel %vm2869_vm10, %v2856_v51, %v2875_v56 }
 0x32b   :  { %v2863_v63 = vpop.f32.mrf.mxu1  ;;  %2903 = vadd.xlane.f32.xlu0 %v2902_v34  ;;  %v2899_v3 = vmul.f32 %v2893_v45, %v2881_v62 }
 0x32c   :  { %vm2871_vm12 = vcmp.gt.f32.partialorder %v2862_v61, 0.0  ;;  %v2877_v4 = vmul.f32 0.02, %v2862_v61  ;;  %v2882_v1 = vsel %vm2870_vm11, %v2860_v57, %v2876_v39 }
 0x32d   :  { %v2864_v5 = vpop.f32.mrf.mxu1  ;;  %v2905_v6 = vadd.f32 %v2899_v3, %v2898_v0  ;;  %v2900_v9 = vmul.f32 %v2889_v44, %v2882_v1 }
 0x32e   :  { %v2883_v8 = vsel %vm2871_vm12, %v2862_v61, %v2877_v4 }
 0x32f   :  { %2906 = vadd.xlane.f32.xlu0 %v2905_v6  ;;  %v2901_v7 = vmul.f32 %v2893_v45, %v2883_v8 }
 0x331   :  { %v2908_v59 = vadd.f32 %v2901_v7, %v2900_v9 }
 0x333   :  { %2909 = vadd.xlane.f32.xlu1 %v2908_v59 }
 0x3b4   :  { %v2904_v2 = vpop.xlane.xlu0 %2903 }
 0x3b5   :  { %v2918_v12 = vadd.f32 %v3317_v14, %v2904_v2 }
 0x3b7   :  { %v3318_v11 = vmul.f32 -1.442695, %v2918_v12 }
 0x3b8   :  { %v2907_v16 = vpop.xlane.xlu0 %2906 }
 0x3b9   :  { %3868 = vpow2.f32 %v3318_v11  ;;  %v2919_v17 = vadd.f32 %v3317_v14, %v2907_v16 }
 0x3bb   :  { %v3319_v18 = vmul.f32 -1.442695, %v2919_v17 }
 0x3bc   :  { %v2910_v19 = vpop.xlane.xlu1 %2909 }
 0x3bd   :  { %3870 = vpow2.f32 %v3319_v18  ;;  %v2920_v20 = vadd.f32 %v3317_v14, %v2910_v19 }
 0x3bf   :  { %v3320_v15 = vmul.f32 -1.442695, %v2920_v20 }
 0x3c1   :  { %3872 = vpow2.f32 %v3320_v15 }
 0x3c6   :  { %v3869_v13 = vpop.eup %3868 }
 0x3c7   :  { %v2930_v22 = vadd.f32 1.0, %v3869_v13 }
 0x3c9   :  { %3874 = vrcp.f32 %v2930_v22 }
 0x3ca   :  { %v3871_v23 = vpop.eup %3870 }
 0x3cb   :  { %v2931_v10 = vadd.f32 1.0, %v3871_v23 }
 0x3cd   :  { %3876 = vrcp.f32 %v2931_v10 }
 0x3ce   :  { %v3873_v24 = vpop.eup %3872 }
 0x3cf   :  { %v2932_v25 = vadd.f32 1.0, %v3873_v24 }
 0x3d1   :  { %3878 = vrcp.f32 %v2932_v25 }
 0x3d6   :  { %v3875_v26 = vpop.eup %3874 }
 0x3d7   :  { %2940 = vst.msk [vmem:[%s4154_s7] sm:$0xff] %vm2939_vm13, %v3875_v26 }
 0x3da   :  { %v3877_v27 = vpop.eup %3876 }
 0x3db   :  { %2941 = vst.msk [vmem:[%s4154_s7 + $0x8] sm:$0xff] %vm2939_vm13, %v3877_v27 }
 0x3de   :  { %v3879_v28 = vpop.eup %3878 }
 0x3df   :  { %2942 = vst.msk [vmem:[%s4154_s7 + $0x10] sm:$0xff] %vm2939_vm13, %v3879_v28 }
 0x3e0   :  { %2947 = vsyncpa [#allocation4], 1 }
 0x3e1   :  { %2948 = vsyncpa [#allocation6], 1 }
 0x3e2   :  { %2949 = vsyncpa [#allocation9], 1 }
 0x3e3   :  { %2950 = vsyncpa [#allocation12], 1 }

</bundles_post_ra>
